<compile_context>
chip_gen: v7x
topology: tpu7x:2x2x1
jax: 0.10.0
libtpu: 0.0.40
codegen_flags: <defaults>
</compile_context>

<pallas_src>
import numpy as np
import jax
import jax.numpy as jnp
from jax.experimental import pallas as pl
from jax.experimental.pallas import tpu as pltpu


def make_kernel(T, BT, I, H, L):
    """Whole-model kernel for one batch tile of BT rows (BT multiple of 8)."""
    G = 4 * H
    unroll = True if T <= 16 else 8

    def kernel(*refs):
        pos = 0

        def nxt():
            nonlocal pos
            r = refs[pos]
            pos += 1
            return r

        x_ref = nxt()
        encW0, encb0, encWhh0 = nxt(), nxt(), nxt()
        if L >= 2:
            Wp1e, Wp1d, bp1, Whhbd1 = nxt(), nxt(), nxt(), nxt()
            mids = [(nxt(), nxt(), nxt()) for _ in range(L - 2)]
            WdecL, bdecL, decWhhL = nxt(), nxt(), nxt()
        else:
            decW0, decb0, decWhh0 = nxt(), nxt(), nxt()
        linw, linb = nxt(), nxt()
        out_ref = nxt()
        preE, hbuf = nxt(), nxt()
        if L >= 2:
            preP, hpk = nxt(), nxt()

        zeros_h = jnp.zeros((BT, H), jnp.float32)

        def recur_single(pre_ref, Whh, h0, c0, out_buf):
            """One LSTM chain, standard [i|f|g|o] gate layout (4H wide)."""
            def step(t, carry):
                h, c = carry
                r = pl.multiple_of(t * BT, 8)
                gates = (pre_ref[pl.ds(r, BT), :]
                         + jnp.dot(h, Whh, preferred_element_type=jnp.float32))
                sig = jax.nn.sigmoid(gates)          # one full-vreg EUP op
                tnh = jnp.tanh(gates)                # one full-vreg EUP op
                c_new = sig[:, H:2 * H] * c + sig[:, :H] * tnh[:, 2 * H:3 * H]
                h_new = sig[:, 3 * H:] * jnp.tanh(c_new)
                if out_buf is not None:
                    out_buf[pl.ds(r, BT), :] = h_new
                return h_new, c_new

            return jax.lax.fori_loop(0, T, step, (h0, c0), unroll=unroll)

        def recur_packed(pre_ref, Whh_bd, h0, c0, out_buf):
            """Two independent LSTM chains per step (enc layer k || dec layer
            k-1), lane-packed: carries (BT, 2H) = [enc | dec]; gate slab
            (BT, 8H) in interleaved layout [i_e,i_d,f_e,f_d,g_e,g_d,o_e,o_d]
            so every gate of both chains is a contiguous 2H lane slice."""
            H2 = 2 * H

            def step(t, carry):
                h, c = carry                                   # (BT, 2H)
                r = pl.multiple_of(t * BT, 8)
                gates = (pre_ref[pl.ds(r, BT), :]
                         + jnp.dot(h, Whh_bd,
                                   preferred_element_type=jnp.float32))
                sig = jax.nn.sigmoid(gates)
                tnh = jnp.tanh(gates)
                c_new = (sig[:, H2:2 * H2] * c
                         + sig[:, :H2] * tnh[:, 2 * H2:3 * H2])
                h_new = sig[:, 3 * H2:] * jnp.tanh(c_new)
                out_buf[pl.ds(r, BT), :] = h_new               # one (BT,2H) store
                return h_new, c_new

            return jax.lax.fori_loop(0, T, step, (h0, c0), unroll=unroll)

        x2d = x_ref[...]                                        # (T*BT, I)

        # ---- Phase 0: encoder layer 0 alone (dec0 needs enc0's final state).
        # Whole-sequence input projection hoisted out of the recurrence.
        preE[...] = (jnp.dot(x2d, encW0[...],
                             preferred_element_type=jnp.float32) + encb0[...])
        h_e, c_e = recur_single(preE, encWhh0[...], zeros_h, zeros_h,
                                hbuf if L >= 2 else None)

        if L >= 2:
            # ---- Phase 1: enc layer 1 || dec layer 0 (packed).  Both chains'
            # gate inputs projected once into a packed (T*BT, 8H) buffer.
            preP[...] = (jnp.dot(hbuf[...], Wp1e[...],
                                 preferred_element_type=jnp.float32)
                         + jnp.dot(x2d, Wp1d[...],
                                   preferred_element_type=jnp.float32)
                         + bp1[...])
            h0p = jnp.concatenate([zeros_h, h_e], axis=1)
            c0p = jnp.concatenate([zeros_h, c_e], axis=1)
            hp, cp = recur_packed(preP, Whhbd1[...], h0p, c0p, hpk)
            h_e, c_e = hp[:, :H], cp[:, :H]        # enc layer 1 final state

            # ---- Phases k = 2..L-1: enc layer k || dec layer k-1.
            for (Wpk, bpk, Whhbdk) in mids:
                # hpk holds [enc_{k-1} h | dec_{k-2} h]; the packed
                # block-diagonal weight projects both halves in one matmul.
                preP[...] = (jnp.dot(hpk[...], Wpk[...],
                                     preferred_element_type=jnp.float32)
                             + bpk[...])
                h0p = jnp.concatenate([zeros_h, h_e], axis=1)
                c0p = jnp.concatenate([zeros_h, c_e], axis=1)
                hp, cp = recur_packed(preP, Whhbdk[...], h0p, c0p, hpk)
                h_e, c_e = hp[:, :H], cp[:, :H]

            # ---- Final phase: decoder layer L-1 alone.  Its input is the dec
            # half of hpk; WdecL has zero rows for the enc half, so no lane
            # slicing is needed before the matmul.
            preE[...] = (jnp.dot(hpk[...], WdecL[...],
                                 preferred_element_type=jnp.float32)
                         + bdecL[...])
            recur_single(preE, decWhhL[...], h_e, c_e, hbuf)
        else:
            # L == 1: decoder layer 0, initialized with enc layer 0's final.
            preE[...] = (jnp.dot(x2d, decW0[...],
                                 preferred_element_type=jnp.float32)
                         + decb0[...])
            recur_single(preE, decWhh0[...], h_e, c_e, hbuf)

        # ---- Linear head: one matmul over the whole decoder output, padded to
        # 128 output lanes so stores are unmasked full vregs.
        out_ref[...] = (jnp.dot(hbuf[...], linw[...],
                                preferred_element_type=jnp.float32)
                        + linb[...])

    return kernel


def _scatter_gates(w4, half, H):
    """Scatter (in, 4H) [i|f|g|o] columns into the interleaved packed layout
    (in, 8H) = [i_e,i_d,f_e,f_d,g_e,g_d,o_e,o_d]; half=0 -> enc stripes,
    half=1 -> dec stripes.  Unused stripes are zero."""
    in_dim = w4.shape[0]
    out = jnp.zeros((in_dim, 8 * H), w4.dtype)
    for g in range(4):
        out = out.at[:, (2 * g + half) * H:(2 * g + half + 1) * H].set(
            w4[:, g * H:(g + 1) * H])
    return out


def lstm_encoder_decoder(x_bti, params, H, L):
    """x_bti: (B, T, I) float32 (PyTorch batch_first). Returns (B, T, I)."""
    B, T, I = x_bti.shape
    G = 4 * H
    OUTP = max(128, ((I + 127) // 128) * 128)      # lane-dense head output

    # Batch padding / tiling: BT rows per grid step (multiple of 8).  Multiple
    # tiles give the second v7x TensorCore work via dimension_semantics.
    Bp = ((B + 7) // 8) * 8
    if Bp <= 32:
        BT = Bp
    else:
        BT = 32
        Bp = ((Bp + BT - 1) // BT) * BT
    nj = Bp // BT

    xb = x_bti
    if Bp != B:
        xb = jnp.pad(xb, ((0, Bp - B), (0, 0), (0, 0)))
    # Rows ordered (batch_tile, time, batch_in_tile): each batch tile is a
    # contiguous row block and each time step a contiguous (BT, I) slab.
    x2d = (xb.reshape(nj, BT, T, I)
             .transpose(0, 2, 1, 3)
             .reshape(nj * T * BT, I))

    sc = lambda w, half: _scatter_gates(w, half, H)

    inputs = [x2d, params["enc_Wih_0"], params["enc_b_0"], params["enc_Whh_0"]]
    if L >= 2:
        inputs += [
            sc(params["enc_Wih_1"], 0),                            # (H, 8H)
            sc(params["dec_Wih_0"], 1),                            # (I, 8H)
            sc(params["enc_b_1"], 0) + sc(params["dec_b_0"], 1),   # (1, 8H)
            jnp.concatenate([sc(params["enc_Whh_1"], 0),
                             sc(params["dec_Whh_0"], 1)], axis=0), # (2H, 8H)
        ]
        for k in range(2, L):
            inputs += [
                jnp.concatenate([sc(params[f"enc_Wih_{k}"], 0),
                                 sc(params[f"dec_Wih_{k - 1}"], 1)], axis=0),
                sc(params[f"enc_b_{k}"], 0) + sc(params[f"dec_b_{k - 1}"], 1),
                jnp.concatenate([sc(params[f"enc_Whh_{k}"], 0),
                                 sc(params[f"dec_Whh_{k - 1}"], 1)], axis=0),
            ]
        inputs += [
            jnp.concatenate([jnp.zeros((H, G), jnp.float32),
                             params[f"dec_Wih_{L - 1}"]], axis=0),  # (2H, 4H)
            params[f"dec_b_{L - 1}"],
            params[f"dec_Whh_{L - 1}"],
        ]
    else:
        inputs += [params["dec_Wih_0"], params["dec_b_0"], params["dec_Whh_0"]]

    lin_w = jnp.zeros((H, OUTP), jnp.float32).at[:, :I].set(params["lin_w"])
    lin_b = jnp.zeros((1, OUTP), jnp.float32).at[:, :I].set(params["lin_b"])
    inputs += [lin_w, lin_b]

    in_specs = [pl.BlockSpec((T * BT, I), lambda j: (j, 0))]
    for w in inputs[1:]:
        in_specs.append(pl.BlockSpec(w.shape, lambda j: (0, 0)))
    out_spec = pl.BlockSpec((T * BT, OUTP), lambda j: (j, 0))

    scratch_shapes = [pltpu.VMEM((T * BT, G), jnp.float32),      # preE
                      pltpu.VMEM((T * BT, H), jnp.float32)]      # hbuf
    if L >= 2:
        scratch_shapes += [pltpu.VMEM((T * BT, 2 * G), jnp.float32),  # preP
                           pltpu.VMEM((T * BT, 2 * H), jnp.float32)]  # hpk

    # Explicit VMEM budget with margin, clamped below v7x's 64 MiB.
    n_in_elems = sum(int(np.prod(a.shape)) for a in inputs)
    scr_elems = T * BT * (G + H) + (T * BT * (2 * G + 2 * H) if L >= 2 else 0)
    vmem_need = 4 * (n_in_elems + T * BT * OUTP + scr_elems)
    vmem_limit = int(min(max(4 * vmem_need, 16 * 1024 * 1024),
                         56 * 1024 * 1024))

    out2d = pl.pallas_call(
        make_kernel(T, BT, I, H, L),
        out_shape=jax.ShapeDtypeStruct((nj * T * BT, OUTP), jnp.float32),
        grid=(nj,),
        in_specs=in_specs,
        out_specs=out_spec,
        scratch_shapes=scratch_shapes,
        compiler_params=pltpu.CompilerParams(
            dimension_semantics=("parallel",),
            vmem_limit_bytes=vmem_limit),
    )(*inputs)

    out = (out2d.reshape(nj, T, BT, OUTP)
                .transpose(0, 2, 1, 3)
                .reshape(Bp, T, OUTP)[:B, :, :I])
    return out


def init_params(key, I, H, L):
    """Deterministic init mirroring nn.LSTM / nn.Linear default shapes."""
    params = {}
    scale = 1.0 / np.sqrt(H)
    keys = iter(jax.random.split(key, 8 * L + 2))

    def u(k, shape):
        return jax.random.uniform(k, shape, jnp.float32, -scale, scale)

    for net in ("enc", "dec"):
        for l in range(L):
            in_dim = I if l == 0 else H
            Wih = u(next(keys), (4 * H, in_dim))   # torch weight_ih_l{l}
            Whh = u(next(keys), (4 * H, H))        # torch weight_hh_l{l}
            bih = u(next(keys), (4 * H,))
            bhh = u(next(keys), (4 * H,))
            params[f"{net}_Wih_{l}"] = Wih.T                    # (in_dim, 4H)
            params[f"{net}_Whh_{l}"] = Whh.T                    # (H, 4H)
            params[f"{net}_b_{l}"] = (bih + bhh).reshape(1, 4 * H)
    lw = u(next(keys), (I, H))                     # torch Linear weight
    lb = u(next(keys), (I,))
    params["lin_w"] = lw.T                          # (H, I)
    params["lin_b"] = lb.reshape(1, I)
    return params


def ref_forward(x, params, H, L):
    """Pure-JAX reference of the PyTorch forward (batch_first)."""
    B = x.shape[0]
    xt = jnp.transpose(x, (1, 0, 2))
    zeros = jnp.zeros((B, H), jnp.float32)

    def layer(seq, Wih, Whh, b, h0, c0):
        def step(carry, x_t):
            h, c = carry
            gates = x_t @ Wih + h @ Whh + b
            i = jax.nn.sigmoid(gates[:, :H])
            f = jax.nn.sigmoid(gates[:, H:2 * H])
            g = jnp.tanh(gates[:, 2 * H:3 * H])
            o = jax.nn.sigmoid(gates[:, 3 * H:])
            c = f * c + i * g
            h = o * jnp.tanh(c)
            return (h, c), h
        (h, c), out = jax.lax.scan(step, (h0, c0), seq)
        return out, (h, c)

    src, enc_states = xt, []
    for l in range(L):
        src, hc = layer(src, params[f"enc_Wih_{l}"], params[f"enc_Whh_{l}"],
                        params[f"enc_b_{l}"], zeros, zeros)
        enc_states.append(hc)
    src = xt
    for l in range(L):
        h0, c0 = enc_states[l]
        src, _ = layer(src, params[f"dec_Wih_{l}"], params[f"dec_Whh_{l}"],
                       params[f"dec_b_{l}"], h0, c0)
    y = src @ params["lin_w"] + params["lin_b"]
    return jnp.transpose(y, (1, 0, 2))


if __name__ == "__main__":
    B, T, I, H, L = 2, 8, 10, 32, 2
    key = jax.random.PRNGKey(0)
    kx, kp = jax.random.split(key)
    x = jax.random.normal(kx, (B, T, I), jnp.float32)
    params = init_params(kp, I, H, L)

    out = lstm_encoder_decoder(x, params, H, L)
    out = jax.block_until_ready(out)

    ref = ref_forward(x, params, H, L)
    assert out.shape == (B, T, I)
    max_err = float(jnp.max(jnp.abs(out - ref)))
    assert max_err < 2e-2, f"mismatch vs reference: {max_err}"
    print("KERNEL_OK")
</pallas_src>

<mosaic_0001>
module attributes {stable_mosaic.version = 11 : i64} {
  func.func @kernel(%arg0: i32, %arg1: memref<64x10xf32, #tpu.memory_space<vmem>>, %arg2: memref<10x128xf32, #tpu.memory_space<vmem>>, %arg3: memref<1x128xf32, #tpu.memory_space<vmem>>, %arg4: memref<32x128xf32, #tpu.memory_space<vmem>>, %arg5: memref<32x256xf32, #tpu.memory_space<vmem>>, %arg6: memref<10x256xf32, #tpu.memory_space<vmem>>, %arg7: memref<1x256xf32, #tpu.memory_space<vmem>>, %arg8: memref<64x256xf32, #tpu.memory_space<vmem>>, %arg9: memref<64x128xf32, #tpu.memory_space<vmem>>, %arg10: memref<1x128xf32, #tpu.memory_space<vmem>>, %arg11: memref<32x128xf32, #tpu.memory_space<vmem>>, %arg12: memref<32x128xf32, #tpu.memory_space<vmem>>, %arg13: memref<1x128xf32, #tpu.memory_space<vmem>>, %arg14: memref<64x128xf32, #tpu.memory_space<vmem>>, %arg15: memref<64x128xf32, #tpu.memory_space<vmem>>, %arg16: memref<64x32xf32, #tpu.memory_space<vmem>>, %arg17: memref<64x256xf32, #tpu.memory_space<vmem>>, %arg18: memref<64x64xf32, #tpu.memory_space<vmem>>) attributes {dimension_semantics = [#tpu.dimension_semantics<parallel>], iteration_bounds = array<i64: 1>, scalar_prefetch = 0 : i64, scratch_operands = 4 : i64, tpu.core_type = #tpu.core_type<tc>, window_params = [{transform_indices = @transform_0, window_bounds = array<i64: 64, 10>}, {pipeline_mode = #tpu.pipeline_mode<synchronous>, transform_indices = @transform_1, window_bounds = array<i64: 10, 128>}, {pipeline_mode = #tpu.pipeline_mode<synchronous>, transform_indices = @transform_2, window_bounds = array<i64: 1, 128>}, {pipeline_mode = #tpu.pipeline_mode<synchronous>, transform_indices = @transform_3, window_bounds = array<i64: 32, 128>}, {pipeline_mode = #tpu.pipeline_mode<synchronous>, transform_indices = @transform_4, window_bounds = array<i64: 32, 256>}, {pipeline_mode = #tpu.pipeline_mode<synchronous>, transform_indices = @transform_5, window_bounds = array<i64: 10, 256>}, {pipeline_mode = #tpu.pipeline_mode<synchronous>, transform_indices = @transform_6, window_bounds = array<i64: 1, 256>}, {pipeline_mode = #tpu.pipeline_mode<synchronous>, transform_indices = @transform_7, window_bounds = array<i64: 64, 256>}, {pipeline_mode = #tpu.pipeline_mode<synchronous>, transform_indices = @transform_8, window_bounds = array<i64: 64, 128>}, {pipeline_mode = #tpu.pipeline_mode<synchronous>, transform_indices = @transform_9, window_bounds = array<i64: 1, 128>}, {pipeline_mode = #tpu.pipeline_mode<synchronous>, transform_indices = @transform_10, window_bounds = array<i64: 32, 128>}, {pipeline_mode = #tpu.pipeline_mode<synchronous>, transform_indices = @transform_11, window_bounds = array<i64: 32, 128>}, {pipeline_mode = #tpu.pipeline_mode<synchronous>, transform_indices = @transform_12, window_bounds = array<i64: 1, 128>}, {transform_indices = @transform_13, window_bounds = array<i64: 64, 128>}]} {
    %cst = arith.constant 0.000000e+00 : f32
    %0 = vector.broadcast %cst : f32 to vector<8x32xf32>
    %c0 = arith.constant 0 : index
    %c0_0 = arith.constant 0 : index
    %1 = vector.load %arg1[%c0, %c0_0] : memref<64x10xf32, #tpu.memory_space<vmem>>, vector<64x10xf32>
    %c0_1 = arith.constant 0 : index
    %c0_2 = arith.constant 0 : index
    %2 = vector.load %arg2[%c0_1, %c0_2] : memref<10x128xf32, #tpu.memory_space<vmem>>, vector<10x128xf32>
    %cst_3 = arith.constant dense<0.000000e+00> : vector<64x128xf32>
    %3 = tpu.matmul %1, %2, %cst_3 {dimension_numbers = #tpu.dot_dimension_numbers<[1], [0], [0], [1], [0, 0, 1, 1], [], []>} : vector<64x10xf32>, vector<10x128xf32>, vector<64x128xf32> -> vector<64x128xf32>
    %c0_4 = arith.constant 0 : index
    %c0_5 = arith.constant 0 : index
    %4 = vector.load %arg3[%c0_4, %c0_5] : memref<1x128xf32, #tpu.memory_space<vmem>>, vector<1x128xf32>
    %5 = vector.broadcast %4 : vector<1x128xf32> to vector<64x128xf32>
    %6 = arith.addf %3, %5 : vector<64x128xf32>
    %c0_6 = arith.constant 0 : index
    %c0_7 = arith.constant 0 : index
    %7 = vector.load %arg15[%c0_6, %c0_7] : memref<64x128xf32, #tpu.memory_space<vmem>>, vector<64x128xf32>
    tpu.vector_store %arg15[%c0_6, %c0_7], %6 {strides = array<i32>} : memref<64x128xf32, #tpu.memory_space<vmem>>, vector<64x128xf32>,
    %c0_8 = arith.constant 0 : index
    %c0_9 = arith.constant 0 : index
    %8 = vector.load %arg4[%c0_8, %c0_9] : memref<32x128xf32, #tpu.memory_space<vmem>>, vector<32x128xf32>
    %c0_i32 = arith.constant 0 : i32
    %c8_i32 = arith.constant 8 : i32
    %9 = arith.muli %c0_i32, %c8_i32 : i32
    %10 = tpu.assume_multiple %9, 8 : i32
    %11 = arith.index_cast %10 : i32 to index
    %c0_10 = arith.constant 0 : index
    %12 = vector.load %arg15[%11, %c0_10] : memref<64x128xf32, #tpu.memory_space<vmem>>, vector<8x128xf32>
    %cst_11 = arith.constant dense<0.000000e+00> : vector<8x128xf32>
    %13 = tpu.matmul %0, %8, %cst_11 {dimension_numbers = #tpu.dot_dimension_numbers<[1], [0], [0], [1], [0, 0, 1, 1], [], []>} : vector<8x32xf32>, vector<32x128xf32>, vector<8x128xf32> -> vector<8x128xf32>
    %14 = arith.addf %12, %13 : vector<8x128xf32>
    %15 = arith.negf %14 : vector<8x128xf32>
    %16 = math.exp %15 : vector<8x128xf32>
    %cst_12 = arith.constant 1.000000e+00 : f32
    %17 = vector.broadcast %cst_12 : f32 to vector<8x128xf32>
    %18 = arith.addf %17, %16 : vector<8x128xf32>
    %19 = arith.divf %17, %18 : vector<8x128xf32>
    %20 = math.tanh %14 : vector<8x128xf32>
    %21 = vector.extract_strided_slice %19 {offsets = [0, 32], sizes = [8, 32], strides = [1, 1]} : vector<8x128xf32> to vector<8x32xf32>
    %22 = arith.mulf %21, %0 : vector<8x32xf32>
    %23 = vector.extract_strided_slice %19 {offsets = [0, 0], sizes = [8, 32], strides = [1, 1]} : vector<8x128xf32> to vector<8x32xf32>
    %24 = vector.extract_strided_slice %20 {offsets = [0, 64], sizes = [8, 32], strides = [1, 1]} : vector<8x128xf32> to vector<8x32xf32>
    %25 = arith.mulf %23, %24 : vector<8x32xf32>
    %26 = arith.addf %22, %25 : vector<8x32xf32>
    %27 = vector.extract_strided_slice %19 {offsets = [0, 96], sizes = [8, 32], strides = [1, 1]} : vector<8x128xf32> to vector<8x32xf32>
    %28 = math.tanh %26 : vector<8x32xf32>
    %29 = arith.mulf %27, %28 : vector<8x32xf32>
    %30 = arith.index_cast %10 : i32 to index
    %c0_13 = arith.constant 0 : index
    %31 = vector.load %arg16[%30, %c0_13] : memref<64x32xf32, #tpu.memory_space<vmem>>, vector<8x32xf32>
    tpu.vector_store %arg16[%30, %c0_13], %29 {strides = array<i32>} : memref<64x32xf32, #tpu.memory_space<vmem>>, vector<8x32xf32>,
    %c1_i32 = arith.constant 1 : i32
    %c8_i32_14 = arith.constant 8 : i32
    %32 = arith.muli %c1_i32, %c8_i32_14 : i32
    %33 = tpu.assume_multiple %32, 8 : i32
    %34 = arith.index_cast %33 : i32 to index
    %c0_15 = arith.constant 0 : index
    %35 = vector.load %arg15[%34, %c0_15] : memref<64x128xf32, #tpu.memory_space<vmem>>, vector<8x128xf32>
    %cst_16 = arith.constant dense<0.000000e+00> : vector<8x128xf32>
    %36 = tpu.matmul %29, %8, %cst_16 {dimension_numbers = #tpu.dot_dimension_numbers<[1], [0], [0], [1], [0, 0, 1, 1], [], []>} : vector<8x32xf32>, vector<32x128xf32>, vector<8x128xf32> -> vector<8x128xf32>
    %37 = arith.addf %35, %36 : vector<8x128xf32>
    %38 = arith.negf %37 : vector<8x128xf32>
    %39 = math.exp %38 : vector<8x128xf32>
    %cst_17 = arith.constant 1.000000e+00 : f32
    %40 = vector.broadcast %cst_17 : f32 to vector<8x128xf32>
    %41 = arith.addf %40, %39 : vector<8x128xf32>
    %42 = arith.divf %40, %41 : vector<8x128xf32>
    %43 = math.tanh %37 : vector<8x128xf32>
    %44 = vector.extract_strided_slice %42 {offsets = [0, 32], sizes = [8, 32], strides = [1, 1]} : vector<8x128xf32> to vector<8x32xf32>
    %45 = arith.mulf %44, %26 : vector<8x32xf32>
    %46 = vector.extract_strided_slice %42 {offsets = [0, 0], sizes = [8, 32], strides = [1, 1]} : vector<8x128xf32> to vector<8x32xf32>
    %47 = vector.extract_strided_slice %43 {offsets = [0, 64], sizes = [8, 32], strides = [1, 1]} : vector<8x128xf32> to vector<8x32xf32>
    %48 = arith.mulf %46, %47 : vector<8x32xf32>
    %49 = arith.addf %45, %48 : vector<8x32xf32>
    %50 = vector.extract_strided_slice %42 {offsets = [0, 96], sizes = [8, 32], strides = [1, 1]} : vector<8x128xf32> to vector<8x32xf32>
    %51 = math.tanh %49 : vector<8x32xf32>
    %52 = arith.mulf %50, %51 : vector<8x32xf32>
    %53 = arith.index_cast %33 : i32 to index
    %c0_18 = arith.constant 0 : index
    %54 = vector.load %arg16[%53, %c0_18] : memref<64x32xf32, #tpu.memory_space<vmem>>, vector<8x32xf32>
    tpu.vector_store %arg16[%53, %c0_18], %52 {strides = array<i32>} : memref<64x32xf32, #tpu.memory_space<vmem>>, vector<8x32xf32>,
    %c2_i32 = arith.constant 2 : i32
    %c8_i32_19 = arith.constant 8 : i32
    %55 = arith.muli %c2_i32, %c8_i32_19 : i32
    %56 = tpu.assume_multiple %55, 8 : i32
    %57 = arith.index_cast %56 : i32 to index
    %c0_20 = arith.constant 0 : index
    %58 = vector.load %arg15[%57, %c0_20] : memref<64x128xf32, #tpu.memory_space<vmem>>, vector<8x128xf32>
    %cst_21 = arith.constant dense<0.000000e+00> : vector<8x128xf32>
    %59 = tpu.matmul %52, %8, %cst_21 {dimension_numbers = #tpu.dot_dimension_numbers<[1], [0], [0], [1], [0, 0, 1, 1], [], []>} : vector<8x32xf32>, vector<32x128xf32>, vector<8x128xf32> -> vector<8x128xf32>
    %60 = arith.addf %58, %59 : vector<8x128xf32>
    %61 = arith.negf %60 : vector<8x128xf32>
    %62 = math.exp %61 : vector<8x128xf32>
    %cst_22 = arith.constant 1.000000e+00 : f32
    %63 = vector.broadcast %cst_22 : f32 to vector<8x128xf32>
    %64 = arith.addf %63, %62 : vector<8x128xf32>
    %65 = arith.divf %63, %64 : vector<8x128xf32>
    %66 = math.tanh %60 : vector<8x128xf32>
    %67 = vector.extract_strided_slice %65 {offsets = [0, 32], sizes = [8, 32], strides = [1, 1]} : vector<8x128xf32> to vector<8x32xf32>
    %68 = arith.mulf %67, %49 : vector<8x32xf32>
    %69 = vector.extract_strided_slice %65 {offsets = [0, 0], sizes = [8, 32], strides = [1, 1]} : vector<8x128xf32> to vector<8x32xf32>
    %70 = vector.extract_strided_slice %66 {offsets = [0, 64], sizes = [8, 32], strides = [1, 1]} : vector<8x128xf32> to vector<8x32xf32>
    %71 = arith.mulf %69, %70 : vector<8x32xf32>
    %72 = arith.addf %68, %71 : vector<8x32xf32>
    %73 = vector.extract_strided_slice %65 {offsets = [0, 96], sizes = [8, 32], strides = [1, 1]} : vector<8x128xf32> to vector<8x32xf32>
    %74 = math.tanh %72 : vector<8x32xf32>
    %75 = arith.mulf %73, %74 : vector<8x32xf32>
    %76 = arith.index_cast %56 : i32 to index
    %c0_23 = arith.constant 0 : index
    %77 = vector.load %arg16[%76, %c0_23] : memref<64x32xf32, #tpu.memory_space<vmem>>, vector<8x32xf32>
    tpu.vector_store %arg16[%76, %c0_23], %75 {strides = array<i32>} : memref<64x32xf32, #tpu.memory_space<vmem>>, vector<8x32xf32>,
    %c3_i32 = arith.constant 3 : i32
    %c8_i32_24 = arith.constant 8 : i32
    %78 = arith.muli %c3_i32, %c8_i32_24 : i32
    %79 = tpu.assume_multiple %78, 8 : i32
    %80 = arith.index_cast %79 : i32 to index
    %c0_25 = arith.constant 0 : index
    %81 = vector.load %arg15[%80, %c0_25] : memref<64x128xf32, #tpu.memory_space<vmem>>, vector<8x128xf32>
    %cst_26 = arith.constant dense<0.000000e+00> : vector<8x128xf32>
    %82 = tpu.matmul %75, %8, %cst_26 {dimension_numbers = #tpu.dot_dimension_numbers<[1], [0], [0], [1], [0, 0, 1, 1], [], []>} : vector<8x32xf32>, vector<32x128xf32>, vector<8x128xf32> -> vector<8x128xf32>
    %83 = arith.addf %81, %82 : vector<8x128xf32>
    %84 = arith.negf %83 : vector<8x128xf32>
    %85 = math.exp %84 : vector<8x128xf32>
    %cst_27 = arith.constant 1.000000e+00 : f32
    %86 = vector.broadcast %cst_27 : f32 to vector<8x128xf32>
    %87 = arith.addf %86, %85 : vector<8x128xf32>
    %88 = arith.divf %86, %87 : vector<8x128xf32>
    %89 = math.tanh %83 : vector<8x128xf32>
    %90 = vector.extract_strided_slice %88 {offsets = [0, 32], sizes = [8, 32], strides = [1, 1]} : vector<8x128xf32> to vector<8x32xf32>
    %91 = arith.mulf %90, %72 : vector<8x32xf32>
    %92 = vector.extract_strided_slice %88 {offsets = [0, 0], sizes = [8, 32], strides = [1, 1]} : vector<8x128xf32> to vector<8x32xf32>
    %93 = vector.extract_strided_slice %89 {offsets = [0, 64], sizes = [8, 32], strides = [1, 1]} : vector<8x128xf32> to vector<8x32xf32>
    %94 = arith.mulf %92, %93 : vector<8x32xf32>
    %95 = arith.addf %91, %94 : vector<8x32xf32>
    %96 = vector.extract_strided_slice %88 {offsets = [0, 96], sizes = [8, 32], strides = [1, 1]} : vector<8x128xf32> to vector<8x32xf32>
    %97 = math.tanh %95 : vector<8x32xf32>
    %98 = arith.mulf %96, %97 : vector<8x32xf32>
    %99 = arith.index_cast %79 : i32 to index
    %c0_28 = arith.constant 0 : index
    %100 = vector.load %arg16[%99, %c0_28] : memref<64x32xf32, #tpu.memory_space<vmem>>, vector<8x32xf32>
    tpu.vector_store %arg16[%99, %c0_28], %98 {strides = array<i32>} : memref<64x32xf32, #tpu.memory_space<vmem>>, vector<8x32xf32>,
    %c4_i32 = arith.constant 4 : i32
    %c8_i32_29 = arith.constant 8 : i32
    %101 = arith.muli %c4_i32, %c8_i32_29 : i32
    %102 = tpu.assume_multiple %101, 8 : i32
    %103 = arith.index_cast %102 : i32 to index
    %c0_30 = arith.constant 0 : index
    %104 = vector.load %arg15[%103, %c0_30] : memref<64x128xf32, #tpu.memory_space<vmem>>, vector<8x128xf32>
    %cst_31 = arith.constant dense<0.000000e+00> : vector<8x128xf32>
    %105 = tpu.matmul %98, %8, %cst_31 {dimension_numbers = #tpu.dot_dimension_numbers<[1], [0], [0], [1], [0, 0, 1, 1], [], []>} : vector<8x32xf32>, vector<32x128xf32>, vector<8x128xf32> -> vector<8x128xf32>
    %106 = arith.addf %104, %105 : vector<8x128xf32>
    %107 = arith.negf %106 : vector<8x128xf32>
    %108 = math.exp %107 : vector<8x128xf32>
    %cst_32 = arith.constant 1.000000e+00 : f32
    %109 = vector.broadcast %cst_32 : f32 to vector<8x128xf32>
    %110 = arith.addf %109, %108 : vector<8x128xf32>
    %111 = arith.divf %109, %110 : vector<8x128xf32>
    %112 = math.tanh %106 : vector<8x128xf32>
    %113 = vector.extract_strided_slice %111 {offsets = [0, 32], sizes = [8, 32], strides = [1, 1]} : vector<8x128xf32> to vector<8x32xf32>
    %114 = arith.mulf %113, %95 : vector<8x32xf32>
    %115 = vector.extract_strided_slice %111 {offsets = [0, 0], sizes = [8, 32], strides = [1, 1]} : vector<8x128xf32> to vector<8x32xf32>
    %116 = vector.extract_strided_slice %112 {offsets = [0, 64], sizes = [8, 32], strides = [1, 1]} : vector<8x128xf32> to vector<8x32xf32>
    %117 = arith.mulf %115, %116 : vector<8x32xf32>
    %118 = arith.addf %114, %117 : vector<8x32xf32>
    %119 = vector.extract_strided_slice %111 {offsets = [0, 96], sizes = [8, 32], strides = [1, 1]} : vector<8x128xf32> to vector<8x32xf32>
    %120 = math.tanh %118 : vector<8x32xf32>
    %121 = arith.mulf %119, %120 : vector<8x32xf32>
    %122 = arith.index_cast %102 : i32 to index
    %c0_33 = arith.constant 0 : index
    %123 = vector.load %arg16[%122, %c0_33] : memref<64x32xf32, #tpu.memory_space<vmem>>, vector<8x32xf32>
    tpu.vector_store %arg16[%122, %c0_33], %121 {strides = array<i32>} : memref<64x32xf32, #tpu.memory_space<vmem>>, vector<8x32xf32>,
    %c5_i32 = arith.constant 5 : i32
    %c8_i32_34 = arith.constant 8 : i32
    %124 = arith.muli %c5_i32, %c8_i32_34 : i32
    %125 = tpu.assume_multiple %124, 8 : i32
    %126 = arith.index_cast %125 : i32 to index
    %c0_35 = arith.constant 0 : index
    %127 = vector.load %arg15[%126, %c0_35] : memref<64x128xf32, #tpu.memory_space<vmem>>, vector<8x128xf32>
    %cst_36 = arith.constant dense<0.000000e+00> : vector<8x128xf32>
    %128 = tpu.matmul %121, %8, %cst_36 {dimension_numbers = #tpu.dot_dimension_numbers<[1], [0], [0], [1], [0, 0, 1, 1], [], []>} : vector<8x32xf32>, vector<32x128xf32>, vector<8x128xf32> -> vector<8x128xf32>
    %129 = arith.addf %127, %128 : vector<8x128xf32>
    %130 = arith.negf %129 : vector<8x128xf32>
    %131 = math.exp %130 : vector<8x128xf32>
    %cst_37 = arith.constant 1.000000e+00 : f32
    %132 = vector.broadcast %cst_37 : f32 to vector<8x128xf32>
    %133 = arith.addf %132, %131 : vector<8x128xf32>
    %134 = arith.divf %132, %133 : vector<8x128xf32>
    %135 = math.tanh %129 : vector<8x128xf32>
    %136 = vector.extract_strided_slice %134 {offsets = [0, 32], sizes = [8, 32], strides = [1, 1]} : vector<8x128xf32> to vector<8x32xf32>
    %137 = arith.mulf %136, %118 : vector<8x32xf32>
    %138 = vector.extract_strided_slice %134 {offsets = [0, 0], sizes = [8, 32], strides = [1, 1]} : vector<8x128xf32> to vector<8x32xf32>
    %139 = vector.extract_strided_slice %135 {offsets = [0, 64], sizes = [8, 32], strides = [1, 1]} : vector<8x128xf32> to vector<8x32xf32>
    %140 = arith.mulf %138, %139 : vector<8x32xf32>
    %141 = arith.addf %137, %140 : vector<8x32xf32>
    %142 = vector.extract_strided_slice %134 {offsets = [0, 96], sizes = [8, 32], strides = [1, 1]} : vector<8x128xf32> to vector<8x32xf32>
    %143 = math.tanh %141 : vector<8x32xf32>
    %144 = arith.mulf %142, %143 : vector<8x32xf32>
    %145 = arith.index_cast %125 : i32 to index
    %c0_38 = arith.constant 0 : index
    %146 = vector.load %arg16[%145, %c0_38] : memref<64x32xf32, #tpu.memory_space<vmem>>, vector<8x32xf32>
    tpu.vector_store %arg16[%145, %c0_38], %144 {strides = array<i32>} : memref<64x32xf32, #tpu.memory_space<vmem>>, vector<8x32xf32>,
    %c6_i32 = arith.constant 6 : i32
    %c8_i32_39 = arith.constant 8 : i32
    %147 = arith.muli %c6_i32, %c8_i32_39 : i32
    %148 = tpu.assume_multiple %147, 8 : i32
    %149 = arith.index_cast %148 : i32 to index
    %c0_40 = arith.constant 0 : index
    %150 = vector.load %arg15[%149, %c0_40] : memref<64x128xf32, #tpu.memory_space<vmem>>, vector<8x128xf32>
    %cst_41 = arith.constant dense<0.000000e+00> : vector<8x128xf32>
    %151 = tpu.matmul %144, %8, %cst_41 {dimension_numbers = #tpu.dot_dimension_numbers<[1], [0], [0], [1], [0, 0, 1, 1], [], []>} : vector<8x32xf32>, vector<32x128xf32>, vector<8x128xf32> -> vector<8x128xf32>
    %152 = arith.addf %150, %151 : vector<8x128xf32>
    %153 = arith.negf %152 : vector<8x128xf32>
    %154 = math.exp %153 : vector<8x128xf32>
    %cst_42 = arith.constant 1.000000e+00 : f32
    %155 = vector.broadcast %cst_42 : f32 to vector<8x128xf32>
    %156 = arith.addf %155, %154 : vector<8x128xf32>
    %157 = arith.divf %155, %156 : vector<8x128xf32>
    %158 = math.tanh %152 : vector<8x128xf32>
    %159 = vector.extract_strided_slice %157 {offsets = [0, 32], sizes = [8, 32], strides = [1, 1]} : vector<8x128xf32> to vector<8x32xf32>
    %160 = arith.mulf %159, %141 : vector<8x32xf32>
    %161 = vector.extract_strided_slice %157 {offsets = [0, 0], sizes = [8, 32], strides = [1, 1]} : vector<8x128xf32> to vector<8x32xf32>
    %162 = vector.extract_strided_slice %158 {offsets = [0, 64], sizes = [8, 32], strides = [1, 1]} : vector<8x128xf32> to vector<8x32xf32>
    %163 = arith.mulf %161, %162 : vector<8x32xf32>
    %164 = arith.addf %160, %163 : vector<8x32xf32>
    %165 = vector.extract_strided_slice %157 {offsets = [0, 96], sizes = [8, 32], strides = [1, 1]} : vector<8x128xf32> to vector<8x32xf32>
    %166 = math.tanh %164 : vector<8x32xf32>
    %167 = arith.mulf %165, %166 : vector<8x32xf32>
    %168 = arith.index_cast %148 : i32 to index
    %c0_43 = arith.constant 0 : index
    %169 = vector.load %arg16[%168, %c0_43] : memref<64x32xf32, #tpu.memory_space<vmem>>, vector<8x32xf32>
    tpu.vector_store %arg16[%168, %c0_43], %167 {strides = array<i32>} : memref<64x32xf32, #tpu.memory_space<vmem>>, vector<8x32xf32>,
    %c7_i32 = arith.constant 7 : i32
    %c8_i32_44 = arith.constant 8 : i32
    %170 = arith.muli %c7_i32, %c8_i32_44 : i32
    %171 = tpu.assume_multiple %170, 8 : i32
    %172 = arith.index_cast %171 : i32 to index
    %c0_45 = arith.constant 0 : index
    %173 = vector.load %arg15[%172, %c0_45] : memref<64x128xf32, #tpu.memory_space<vmem>>, vector<8x128xf32>
    %cst_46 = arith.constant dense<0.000000e+00> : vector<8x128xf32>
    %174 = tpu.matmul %167, %8, %cst_46 {dimension_numbers = #tpu.dot_dimension_numbers<[1], [0], [0], [1], [0, 0, 1, 1], [], []>} : vector<8x32xf32>, vector<32x128xf32>, vector<8x128xf32> -> vector<8x128xf32>
    %175 = arith.addf %173, %174 : vector<8x128xf32>
    %176 = arith.negf %175 : vector<8x128xf32>
    %177 = math.exp %176 : vector<8x128xf32>
    %cst_47 = arith.constant 1.000000e+00 : f32
    %178 = vector.broadcast %cst_47 : f32 to vector<8x128xf32>
    %179 = arith.addf %178, %177 : vector<8x128xf32>
    %180 = arith.divf %178, %179 : vector<8x128xf32>
    %181 = math.tanh %175 : vector<8x128xf32>
    %182 = vector.extract_strided_slice %180 {offsets = [0, 32], sizes = [8, 32], strides = [1, 1]} : vector<8x128xf32> to vector<8x32xf32>
    %183 = arith.mulf %182, %164 : vector<8x32xf32>
    %184 = vector.extract_strided_slice %180 {offsets = [0, 0], sizes = [8, 32], strides = [1, 1]} : vector<8x128xf32> to vector<8x32xf32>
    %185 = vector.extract_strided_slice %181 {offsets = [0, 64], sizes = [8, 32], strides = [1, 1]} : vector<8x128xf32> to vector<8x32xf32>
    %186 = arith.mulf %184, %185 : vector<8x32xf32>
    %187 = arith.addf %183, %186 : vector<8x32xf32>
    %188 = vector.extract_strided_slice %180 {offsets = [0, 96], sizes = [8, 32], strides = [1, 1]} : vector<8x128xf32> to vector<8x32xf32>
    %189 = math.tanh %187 : vector<8x32xf32>
    %190 = arith.mulf %188, %189 : vector<8x32xf32>
    %191 = arith.index_cast %171 : i32 to index
    %c0_48 = arith.constant 0 : index
    %192 = vector.load %arg16[%191, %c0_48] : memref<64x32xf32, #tpu.memory_space<vmem>>, vector<8x32xf32>
    tpu.vector_store %arg16[%191, %c0_48], %190 {strides = array<i32>} : memref<64x32xf32, #tpu.memory_space<vmem>>, vector<8x32xf32>,
    %c8_i32_49 = arith.constant 8 : i32
    %c0_50 = arith.constant 0 : index
    %c0_51 = arith.constant 0 : index
    %193 = vector.load %arg16[%c0_50, %c0_51] : memref<64x32xf32, #tpu.memory_space<vmem>>, vector<64x32xf32>
    %c0_52 = arith.constant 0 : index
    %c0_53 = arith.constant 0 : index
    %194 = vector.load %arg5[%c0_52, %c0_53] : memref<32x256xf32, #tpu.memory_space<vmem>>, vector<32x256xf32>
    %cst_54 = arith.constant dense<0.000000e+00> : vector<64x256xf32>
    %195 = tpu.matmul %193, %194, %cst_54 {dimension_numbers = #tpu.dot_dimension_numbers<[1], [0], [0], [1], [0, 0, 1, 1], [], []>} : vector<64x32xf32>, vector<32x256xf32>, vector<64x256xf32> -> vector<64x256xf32>
    %c0_55 = arith.constant 0 : index
    %c0_56 = arith.constant 0 : index
    %196 = vector.load %arg6[%c0_55, %c0_56] : memref<10x256xf32, #tpu.memory_space<vmem>>, vector<10x256xf32>
    %cst_57 = arith.constant dense<0.000000e+00> : vector<64x256xf32>
    %197 = tpu.matmul %1, %196, %cst_57 {dimension_numbers = #tpu.dot_dimension_numbers<[1], [0], [0], [1], [0, 0, 1, 1], [], []>} : vector<64x10xf32>, vector<10x256xf32>, vector<64x256xf32> -> vector<64x256xf32>
    %198 = arith.addf %195, %197 : vector<64x256xf32>
    %c0_58 = arith.constant 0 : index
    %c0_59 = arith.constant 0 : index
    %199 = vector.load %arg7[%c0_58, %c0_59] : memref<1x256xf32, #tpu.memory_space<vmem>>, vector<1x256xf32>
    %200 = vector.broadcast %199 : vector<1x256xf32> to vector<64x256xf32>
    %201 = arith.addf %198, %200 : vector<64x256xf32>
    %c0_60 = arith.constant 0 : index
    %c0_61 = arith.constant 0 : index
    %202 = vector.load %arg17[%c0_60, %c0_61] : memref<64x256xf32, #tpu.memory_space<vmem>>, vector<64x256xf32>
    tpu.vector_store %arg17[%c0_60, %c0_61], %201 {strides = array<i32>} : memref<64x256xf32, #tpu.memory_space<vmem>>, vector<64x256xf32>,
    %203 = tpu.concatenate %0, %190 in 1 : vector<8x32xf32>, vector<8x32xf32> -> vector<8x64xf32>
    %204 = tpu.concatenate %0, %187 in 1 : vector<8x32xf32>, vector<8x32xf32> -> vector<8x64xf32>
    %c0_62 = arith.constant 0 : index
    %c0_63 = arith.constant 0 : index
    %205 = vector.load %arg8[%c0_62, %c0_63] : memref<64x256xf32, #tpu.memory_space<vmem>>, vector<64x256xf32>
    %c0_i32_64 = arith.constant 0 : i32
    %c8_i32_65 = arith.constant 8 : i32
    %206 = arith.muli %c0_i32_64, %c8_i32_65 : i32
    %207 = tpu.assume_multiple %206, 8 : i32
    %208 = arith.index_cast %207 : i32 to index
    %c0_66 = arith.constant 0 : index
    %209 = vector.load %arg17[%208, %c0_66] : memref<64x256xf32, #tpu.memory_space<vmem>>, vector<8x256xf32>
    %cst_67 = arith.constant dense<0.000000e+00> : vector<8x256xf32>
    %210 = tpu.matmul %203, %205, %cst_67 {dimension_numbers = #tpu.dot_dimension_numbers<[1], [0], [0], [1], [0, 0, 1, 1], [], []>} : vector<8x64xf32>, vector<64x256xf32>, vector<8x256xf32> -> vector<8x256xf32>
    %211 = arith.addf %209, %210 : vector<8x256xf32>
    %212 = arith.negf %211 : vector<8x256xf32>
    %213 = math.exp %212 : vector<8x256xf32>
    %cst_68 = arith.constant 1.000000e+00 : f32
    %214 = vector.broadcast %cst_68 : f32 to vector<8x256xf32>
    %215 = arith.addf %214, %213 : vector<8x256xf32>
    %216 = arith.divf %214, %215 : vector<8x256xf32>
    %217 = math.tanh %211 : vector<8x256xf32>
    %218 = vector.extract_strided_slice %216 {offsets = [0, 64], sizes = [8, 64], strides = [1, 1]} : vector<8x256xf32> to vector<8x64xf32>
    %219 = arith.mulf %218, %204 : vector<8x64xf32>
    %220 = vector.extract_strided_slice %216 {offsets = [0, 0], sizes = [8, 64], strides = [1, 1]} : vector<8x256xf32> to vector<8x64xf32>
    %221 = vector.extract_strided_slice %217 {offsets = [0, 128], sizes = [8, 64], strides = [1, 1]} : vector<8x256xf32> to vector<8x64xf32>
    %222 = arith.mulf %220, %221 : vector<8x64xf32>
    %223 = arith.addf %219, %222 : vector<8x64xf32>
    %224 = vector.extract_strided_slice %216 {offsets = [0, 192], sizes = [8, 64], strides = [1, 1]} : vector<8x256xf32> to vector<8x64xf32>
    %225 = math.tanh %223 : vector<8x64xf32>
    %226 = arith.mulf %224, %225 : vector<8x64xf32>
    %227 = arith.index_cast %207 : i32 to index
    %c0_69 = arith.constant 0 : index
    %228 = vector.load %arg18[%227, %c0_69] : memref<64x64xf32, #tpu.memory_space<vmem>>, vector<8x64xf32>
    tpu.vector_store %arg18[%227, %c0_69], %226 {strides = array<i32>} : memref<64x64xf32, #tpu.memory_space<vmem>>, vector<8x64xf32>,
    %c1_i32_70 = arith.constant 1 : i32
    %c8_i32_71 = arith.constant 8 : i32
    %229 = arith.muli %c1_i32_70, %c8_i32_71 : i32
    %230 = tpu.assume_multiple %229, 8 : i32
    %231 = arith.index_cast %230 : i32 to index
    %c0_72 = arith.constant 0 : index
    %232 = vector.load %arg17[%231, %c0_72] : memref<64x256xf32, #tpu.memory_space<vmem>>, vector<8x256xf32>
    %cst_73 = arith.constant dense<0.000000e+00> : vector<8x256xf32>
    %233 = tpu.matmul %226, %205, %cst_73 {dimension_numbers = #tpu.dot_dimension_numbers<[1], [0], [0], [1], [0, 0, 1, 1], [], []>} : vector<8x64xf32>, vector<64x256xf32>, vector<8x256xf32> -> vector<8x256xf32>
    %234 = arith.addf %232, %233 : vector<8x256xf32>
    %235 = arith.negf %234 : vector<8x256xf32>
    %236 = math.exp %235 : vector<8x256xf32>
    %cst_74 = arith.constant 1.000000e+00 : f32
    %237 = vector.broadcast %cst_74 : f32 to vector<8x256xf32>
    %238 = arith.addf %237, %236 : vector<8x256xf32>
    %239 = arith.divf %237, %238 : vector<8x256xf32>
    %240 = math.tanh %234 : vector<8x256xf32>
    %241 = vector.extract_strided_slice %239 {offsets = [0, 64], sizes = [8, 64], strides = [1, 1]} : vector<8x256xf32> to vector<8x64xf32>
    %242 = arith.mulf %241, %223 : vector<8x64xf32>
    %243 = vector.extract_strided_slice %239 {offsets = [0, 0], sizes = [8, 64], strides = [1, 1]} : vector<8x256xf32> to vector<8x64xf32>
    %244 = vector.extract_strided_slice %240 {offsets = [0, 128], sizes = [8, 64], strides = [1, 1]} : vector<8x256xf32> to vector<8x64xf32>
    %245 = arith.mulf %243, %244 : vector<8x64xf32>
    %246 = arith.addf %242, %245 : vector<8x64xf32>
    %247 = vector.extract_strided_slice %239 {offsets = [0, 192], sizes = [8, 64], strides = [1, 1]} : vector<8x256xf32> to vector<8x64xf32>
    %248 = math.tanh %246 : vector<8x64xf32>
    %249 = arith.mulf %247, %248 : vector<8x64xf32>
    %250 = arith.index_cast %230 : i32 to index
    %c0_75 = arith.constant 0 : index
    %251 = vector.load %arg18[%250, %c0_75] : memref<64x64xf32, #tpu.memory_space<vmem>>, vector<8x64xf32>
    tpu.vector_store %arg18[%250, %c0_75], %249 {strides = array<i32>} : memref<64x64xf32, #tpu.memory_space<vmem>>, vector<8x64xf32>,
    %c2_i32_76 = arith.constant 2 : i32
    %c8_i32_77 = arith.constant 8 : i32
    %252 = arith.muli %c2_i32_76, %c8_i32_77 : i32
    %253 = tpu.assume_multiple %252, 8 : i32
    %254 = arith.index_cast %253 : i32 to index
    %c0_78 = arith.constant 0 : index
    %255 = vector.load %arg17[%254, %c0_78] : memref<64x256xf32, #tpu.memory_space<vmem>>, vector<8x256xf32>
    %cst_79 = arith.constant dense<0.000000e+00> : vector<8x256xf32>
    %256 = tpu.matmul %249, %205, %cst_79 {dimension_numbers = #tpu.dot_dimension_numbers<[1], [0], [0], [1], [0, 0, 1, 1], [], []>} : vector<8x64xf32>, vector<64x256xf32>, vector<8x256xf32> -> vector<8x256xf32>
    %257 = arith.addf %255, %256 : vector<8x256xf32>
    %258 = arith.negf %257 : vector<8x256xf32>
    %259 = math.exp %258 : vector<8x256xf32>
    %cst_80 = arith.constant 1.000000e+00 : f32
    %260 = vector.broadcast %cst_80 : f32 to vector<8x256xf32>
    %261 = arith.addf %260, %259 : vector<8x256xf32>
    %262 = arith.divf %260, %261 : vector<8x256xf32>
    %263 = math.tanh %257 : vector<8x256xf32>
    %264 = vector.extract_strided_slice %262 {offsets = [0, 64], sizes = [8, 64], strides = [1, 1]} : vector<8x256xf32> to vector<8x64xf32>
    %265 = arith.mulf %264, %246 : vector<8x64xf32>
    %266 = vector.extract_strided_slice %262 {offsets = [0, 0], sizes = [8, 64], strides = [1, 1]} : vector<8x256xf32> to vector<8x64xf32>
    %267 = vector.extract_strided_slice %263 {offsets = [0, 128], sizes = [8, 64], strides = [1, 1]} : vector<8x256xf32> to vector<8x64xf32>
    %268 = arith.mulf %266, %267 : vector<8x64xf32>
    %269 = arith.addf %265, %268 : vector<8x64xf32>
    %270 = vector.extract_strided_slice %262 {offsets = [0, 192], sizes = [8, 64], strides = [1, 1]} : vector<8x256xf32> to vector<8x64xf32>
    %271 = math.tanh %269 : vector<8x64xf32>
    %272 = arith.mulf %270, %271 : vector<8x64xf32>
    %273 = arith.index_cast %253 : i32 to index
    %c0_81 = arith.constant 0 : index
    %274 = vector.load %arg18[%273, %c0_81] : memref<64x64xf32, #tpu.memory_space<vmem>>, vector<8x64xf32>
    tpu.vector_store %arg18[%273, %c0_81], %272 {strides = array<i32>} : memref<64x64xf32, #tpu.memory_space<vmem>>, vector<8x64xf32>,
    %c3_i32_82 = arith.constant 3 : i32
    %c8_i32_83 = arith.constant 8 : i32
    %275 = arith.muli %c3_i32_82, %c8_i32_83 : i32
    %276 = tpu.assume_multiple %275, 8 : i32
    %277 = arith.index_cast %276 : i32 to index
    %c0_84 = arith.constant 0 : index
    %278 = vector.load %arg17[%277, %c0_84] : memref<64x256xf32, #tpu.memory_space<vmem>>, vector<8x256xf32>
    %cst_85 = arith.constant dense<0.000000e+00> : vector<8x256xf32>
    %279 = tpu.matmul %272, %205, %cst_85 {dimension_numbers = #tpu.dot_dimension_numbers<[1], [0], [0], [1], [0, 0, 1, 1], [], []>} : vector<8x64xf32>, vector<64x256xf32>, vector<8x256xf32> -> vector<8x256xf32>
    %280 = arith.addf %278, %279 : vector<8x256xf32>
    %281 = arith.negf %280 : vector<8x256xf32>
    %282 = math.exp %281 : vector<8x256xf32>
    %cst_86 = arith.constant 1.000000e+00 : f32
    %283 = vector.broadcast %cst_86 : f32 to vector<8x256xf32>
    %284 = arith.addf %283, %282 : vector<8x256xf32>
    %285 = arith.divf %283, %284 : vector<8x256xf32>
    %286 = math.tanh %280 : vector<8x256xf32>
    %287 = vector.extract_strided_slice %285 {offsets = [0, 64], sizes = [8, 64], strides = [1, 1]} : vector<8x256xf32> to vector<8x64xf32>
    %288 = arith.mulf %287, %269 : vector<8x64xf32>
    %289 = vector.extract_strided_slice %285 {offsets = [0, 0], sizes = [8, 64], strides = [1, 1]} : vector<8x256xf32> to vector<8x64xf32>
    %290 = vector.extract_strided_slice %286 {offsets = [0, 128], sizes = [8, 64], strides = [1, 1]} : vector<8x256xf32> to vector<8x64xf32>
    %291 = arith.mulf %289, %290 : vector<8x64xf32>
    %292 = arith.addf %288, %291 : vector<8x64xf32>
    %293 = vector.extract_strided_slice %285 {offsets = [0, 192], sizes = [8, 64], strides = [1, 1]} : vector<8x256xf32> to vector<8x64xf32>
    %294 = math.tanh %292 : vector<8x64xf32>
    %295 = arith.mulf %293, %294 : vector<8x64xf32>
    %296 = arith.index_cast %276 : i32 to index
    %c0_87 = arith.constant 0 : index
    %297 = vector.load %arg18[%296, %c0_87] : memref<64x64xf32, #tpu.memory_space<vmem>>, vector<8x64xf32>
    tpu.vector_store %arg18[%296, %c0_87], %295 {strides = array<i32>} : memref<64x64xf32, #tpu.memory_space<vmem>>, vector<8x64xf32>,
    %c4_i32_88 = arith.constant 4 : i32
    %c8_i32_89 = arith.constant 8 : i32
    %298 = arith.muli %c4_i32_88, %c8_i32_89 : i32
    %299 = tpu.assume_multiple %298, 8 : i32
    %300 = arith.index_cast %299 : i32 to index
    %c0_90 = arith.constant 0 : index
    %301 = vector.load %arg17[%300, %c0_90] : memref<64x256xf32, #tpu.memory_space<vmem>>, vector<8x256xf32>
    %cst_91 = arith.constant dense<0.000000e+00> : vector<8x256xf32>
    %302 = tpu.matmul %295, %205, %cst_91 {dimension_numbers = #tpu.dot_dimension_numbers<[1], [0], [0], [1], [0, 0, 1, 1], [], []>} : vector<8x64xf32>, vector<64x256xf32>, vector<8x256xf32> -> vector<8x256xf32>
    %303 = arith.addf %301, %302 : vector<8x256xf32>
    %304 = arith.negf %303 : vector<8x256xf32>
    %305 = math.exp %304 : vector<8x256xf32>
    %cst_92 = arith.constant 1.000000e+00 : f32
    %306 = vector.broadcast %cst_92 : f32 to vector<8x256xf32>
    %307 = arith.addf %306, %305 : vector<8x256xf32>
    %308 = arith.divf %306, %307 : vector<8x256xf32>
    %309 = math.tanh %303 : vector<8x256xf32>
    %310 = vector.extract_strided_slice %308 {offsets = [0, 64], sizes = [8, 64], strides = [1, 1]} : vector<8x256xf32> to vector<8x64xf32>
    %311 = arith.mulf %310, %292 : vector<8x64xf32>
    %312 = vector.extract_strided_slice %308 {offsets = [0, 0], sizes = [8, 64], strides = [1, 1]} : vector<8x256xf32> to vector<8x64xf32>
    %313 = vector.extract_strided_slice %309 {offsets = [0, 128], sizes = [8, 64], strides = [1, 1]} : vector<8x256xf32> to vector<8x64xf32>
    %314 = arith.mulf %312, %313 : vector<8x64xf32>
    %315 = arith.addf %311, %314 : vector<8x64xf32>
    %316 = vector.extract_strided_slice %308 {offsets = [0, 192], sizes = [8, 64], strides = [1, 1]} : vector<8x256xf32> to vector<8x64xf32>
    %317 = math.tanh %315 : vector<8x64xf32>
    %318 = arith.mulf %316, %317 : vector<8x64xf32>
    %319 = arith.index_cast %299 : i32 to index
    %c0_93 = arith.constant 0 : index
    %320 = vector.load %arg18[%319, %c0_93] : memref<64x64xf32, #tpu.memory_space<vmem>>, vector<8x64xf32>
    tpu.vector_store %arg18[%319, %c0_93], %318 {strides = array<i32>} : memref<64x64xf32, #tpu.memory_space<vmem>>, vector<8x64xf32>,
    %c5_i32_94 = arith.constant 5 : i32
    %c8_i32_95 = arith.constant 8 : i32
    %321 = arith.muli %c5_i32_94, %c8_i32_95 : i32
    %322 = tpu.assume_multiple %321, 8 : i32
    %323 = arith.index_cast %322 : i32 to index
    %c0_96 = arith.constant 0 : index
    %324 = vector.load %arg17[%323, %c0_96] : memref<64x256xf32, #tpu.memory_space<vmem>>, vector<8x256xf32>
    %cst_97 = arith.constant dense<0.000000e+00> : vector<8x256xf32>
    %325 = tpu.matmul %318, %205, %cst_97 {dimension_numbers = #tpu.dot_dimension_numbers<[1], [0], [0], [1], [0, 0, 1, 1], [], []>} : vector<8x64xf32>, vector<64x256xf32>, vector<8x256xf32> -> vector<8x256xf32>
    %326 = arith.addf %324, %325 : vector<8x256xf32>
    %327 = arith.negf %326 : vector<8x256xf32>
    %328 = math.exp %327 : vector<8x256xf32>
    %cst_98 = arith.constant 1.000000e+00 : f32
    %329 = vector.broadcast %cst_98 : f32 to vector<8x256xf32>
    %330 = arith.addf %329, %328 : vector<8x256xf32>
    %331 = arith.divf %329, %330 : vector<8x256xf32>
    %332 = math.tanh %326 : vector<8x256xf32>
    %333 = vector.extract_strided_slice %331 {offsets = [0, 64], sizes = [8, 64], strides = [1, 1]} : vector<8x256xf32> to vector<8x64xf32>
    %334 = arith.mulf %333, %315 : vector<8x64xf32>
    %335 = vector.extract_strided_slice %331 {offsets = [0, 0], sizes = [8, 64], strides = [1, 1]} : vector<8x256xf32> to vector<8x64xf32>
    %336 = vector.extract_strided_slice %332 {offsets = [0, 128], sizes = [8, 64], strides = [1, 1]} : vector<8x256xf32> to vector<8x64xf32>
    %337 = arith.mulf %335, %336 : vector<8x64xf32>
    %338 = arith.addf %334, %337 : vector<8x64xf32>
    %339 = vector.extract_strided_slice %331 {offsets = [0, 192], sizes = [8, 64], strides = [1, 1]} : vector<8x256xf32> to vector<8x64xf32>
    %340 = math.tanh %338 : vector<8x64xf32>
    %341 = arith.mulf %339, %340 : vector<8x64xf32>
    %342 = arith.index_cast %322 : i32 to index
    %c0_99 = arith.constant 0 : index
    %343 = vector.load %arg18[%342, %c0_99] : memref<64x64xf32, #tpu.memory_space<vmem>>, vector<8x64xf32>
    tpu.vector_store %arg18[%342, %c0_99], %341 {strides = array<i32>} : memref<64x64xf32, #tpu.memory_space<vmem>>, vector<8x64xf32>,
    %c6_i32_100 = arith.constant 6 : i32
    %c8_i32_101 = arith.constant 8 : i32
    %344 = arith.muli %c6_i32_100, %c8_i32_101 : i32
    %345 = tpu.assume_multiple %344, 8 : i32
    %346 = arith.index_cast %345 : i32 to index
    %c0_102 = arith.constant 0 : index
    %347 = vector.load %arg17[%346, %c0_102] : memref<64x256xf32, #tpu.memory_space<vmem>>, vector<8x256xf32>
    %cst_103 = arith.constant dense<0.000000e+00> : vector<8x256xf32>
    %348 = tpu.matmul %341, %205, %cst_103 {dimension_numbers = #tpu.dot_dimension_numbers<[1], [0], [0], [1], [0, 0, 1, 1], [], []>} : vector<8x64xf32>, vector<64x256xf32>, vector<8x256xf32> -> vector<8x256xf32>
    %349 = arith.addf %347, %348 : vector<8x256xf32>
    %350 = arith.negf %349 : vector<8x256xf32>
    %351 = math.exp %350 : vector<8x256xf32>
    %cst_104 = arith.constant 1.000000e+00 : f32
    %352 = vector.broadcast %cst_104 : f32 to vector<8x256xf32>
    %353 = arith.addf %352, %351 : vector<8x256xf32>
    %354 = arith.divf %352, %353 : vector<8x256xf32>
    %355 = math.tanh %349 : vector<8x256xf32>
    %356 = vector.extract_strided_slice %354 {offsets = [0, 64], sizes = [8, 64], strides = [1, 1]} : vector<8x256xf32> to vector<8x64xf32>
    %357 = arith.mulf %356, %338 : vector<8x64xf32>
    %358 = vector.extract_strided_slice %354 {offsets = [0, 0], sizes = [8, 64], strides = [1, 1]} : vector<8x256xf32> to vector<8x64xf32>
    %359 = vector.extract_strided_slice %355 {offsets = [0, 128], sizes = [8, 64], strides = [1, 1]} : vector<8x256xf32> to vector<8x64xf32>
    %360 = arith.mulf %358, %359 : vector<8x64xf32>
    %361 = arith.addf %357, %360 : vector<8x64xf32>
    %362 = vector.extract_strided_slice %354 {offsets = [0, 192], sizes = [8, 64], strides = [1, 1]} : vector<8x256xf32> to vector<8x64xf32>
    %363 = math.tanh %361 : vector<8x64xf32>
    %364 = arith.mulf %362, %363 : vector<8x64xf32>
    %365 = arith.index_cast %345 : i32 to index
    %c0_105 = arith.constant 0 : index
    %366 = vector.load %arg18[%365, %c0_105] : memref<64x64xf32, #tpu.memory_space<vmem>>, vector<8x64xf32>
    tpu.vector_store %arg18[%365, %c0_105], %364 {strides = array<i32>} : memref<64x64xf32, #tpu.memory_space<vmem>>, vector<8x64xf32>,
    %c7_i32_106 = arith.constant 7 : i32
    %c8_i32_107 = arith.constant 8 : i32
    %367 = arith.muli %c7_i32_106, %c8_i32_107 : i32
    %368 = tpu.assume_multiple %367, 8 : i32
    %369 = arith.index_cast %368 : i32 to index
    %c0_108 = arith.constant 0 : index
    %370 = vector.load %arg17[%369, %c0_108] : memref<64x256xf32, #tpu.memory_space<vmem>>, vector<8x256xf32>
    %cst_109 = arith.constant dense<0.000000e+00> : vector<8x256xf32>
    %371 = tpu.matmul %364, %205, %cst_109 {dimension_numbers = #tpu.dot_dimension_numbers<[1], [0], [0], [1], [0, 0, 1, 1], [], []>} : vector<8x64xf32>, vector<64x256xf32>, vector<8x256xf32> -> vector<8x256xf32>
    %372 = arith.addf %370, %371 : vector<8x256xf32>
    %373 = arith.negf %372 : vector<8x256xf32>
    %374 = math.exp %373 : vector<8x256xf32>
    %cst_110 = arith.constant 1.000000e+00 : f32
    %375 = vector.broadcast %cst_110 : f32 to vector<8x256xf32>
    %376 = arith.addf %375, %374 : vector<8x256xf32>
    %377 = arith.divf %375, %376 : vector<8x256xf32>
    %378 = math.tanh %372 : vector<8x256xf32>
    %379 = vector.extract_strided_slice %377 {offsets = [0, 64], sizes = [8, 64], strides = [1, 1]} : vector<8x256xf32> to vector<8x64xf32>
    %380 = arith.mulf %379, %361 : vector<8x64xf32>
    %381 = vector.extract_strided_slice %377 {offsets = [0, 0], sizes = [8, 64], strides = [1, 1]} : vector<8x256xf32> to vector<8x64xf32>
    %382 = vector.extract_strided_slice %378 {offsets = [0, 128], sizes = [8, 64], strides = [1, 1]} : vector<8x256xf32> to vector<8x64xf32>
    %383 = arith.mulf %381, %382 : vector<8x64xf32>
    %384 = arith.addf %380, %383 : vector<8x64xf32>
    %385 = vector.extract_strided_slice %377 {offsets = [0, 192], sizes = [8, 64], strides = [1, 1]} : vector<8x256xf32> to vector<8x64xf32>
    %386 = math.tanh %384 : vector<8x64xf32>
    %387 = arith.mulf %385, %386 : vector<8x64xf32>
    %388 = arith.index_cast %368 : i32 to index
    %c0_111 = arith.constant 0 : index
    %389 = vector.load %arg18[%388, %c0_111] : memref<64x64xf32, #tpu.memory_space<vmem>>, vector<8x64xf32>
    tpu.vector_store %arg18[%388, %c0_111], %387 {strides = array<i32>} : memref<64x64xf32, #tpu.memory_space<vmem>>, vector<8x64xf32>,
    %c8_i32_112 = arith.constant 8 : i32
    %390 = vector.extract_strided_slice %387 {offsets = [0, 0], sizes = [8, 32], strides = [1, 1]} : vector<8x64xf32> to vector<8x32xf32>
    %391 = vector.extract_strided_slice %384 {offsets = [0, 0], sizes = [8, 32], strides = [1, 1]} : vector<8x64xf32> to vector<8x32xf32>
    %c0_113 = arith.constant 0 : index
    %c0_114 = arith.constant 0 : index
    %392 = vector.load %arg18[%c0_113, %c0_114] : memref<64x64xf32, #tpu.memory_space<vmem>>, vector<64x64xf32>
    %c0_115 = arith.constant 0 : index
    %c0_116 = arith.constant 0 : index
    %393 = vector.load %arg9[%c0_115, %c0_116] : memref<64x128xf32, #tpu.memory_space<vmem>>, vector<64x128xf32>
    %cst_117 = arith.constant dense<0.000000e+00> : vector<64x128xf32>
    %394 = tpu.matmul %392, %393, %cst_117 {dimension_numbers = #tpu.dot_dimension_numbers<[1], [0], [0], [1], [0, 0, 1, 1], [], []>} : vector<64x64xf32>, vector<64x128xf32>, vector<64x128xf32> -> vector<64x128xf32>
    %c0_118 = arith.constant 0 : index
    %c0_119 = arith.constant 0 : index
    %395 = vector.load %arg10[%c0_118, %c0_119] : memref<1x128xf32, #tpu.memory_space<vmem>>, vector<1x128xf32>
    %396 = vector.broadcast %395 : vector<1x128xf32> to vector<64x128xf32>
    %397 = arith.addf %394, %396 : vector<64x128xf32>
    %c0_120 = arith.constant 0 : index
    %c0_121 = arith.constant 0 : index
    %398 = vector.load %arg15[%c0_120, %c0_121] : memref<64x128xf32, #tpu.memory_space<vmem>>, vector<64x128xf32>
    tpu.vector_store %arg15[%c0_120, %c0_121], %397 {strides = array<i32>} : memref<64x128xf32, #tpu.memory_space<vmem>>, vector<64x128xf32>,
    %c0_122 = arith.constant 0 : index
    %c0_123 = arith.constant 0 : index
    %399 = vector.load %arg11[%c0_122, %c0_123] : memref<32x128xf32, #tpu.memory_space<vmem>>, vector<32x128xf32>
    %c0_i32_124 = arith.constant 0 : i32
    %c8_i32_125 = arith.constant 8 : i32
    %400 = arith.muli %c0_i32_124, %c8_i32_125 : i32
    %401 = tpu.assume_multiple %400, 8 : i32
    %402 = arith.index_cast %401 : i32 to index
    %c0_126 = arith.constant 0 : index
    %403 = vector.load %arg15[%402, %c0_126] : memref<64x128xf32, #tpu.memory_space<vmem>>, vector<8x128xf32>
    %cst_127 = arith.constant dense<0.000000e+00> : vector<8x128xf32>
    %404 = tpu.matmul %390, %399, %cst_127 {dimension_numbers = #tpu.dot_dimension_numbers<[1], [0], [0], [1], [0, 0, 1, 1], [], []>} : vector<8x32xf32>, vector<32x128xf32>, vector<8x128xf32> -> vector<8x128xf32>
    %405 = arith.addf %403, %404 : vector<8x128xf32>
    %406 = arith.negf %405 : vector<8x128xf32>
    %407 = math.exp %406 : vector<8x128xf32>
    %cst_128 = arith.constant 1.000000e+00 : f32
    %408 = vector.broadcast %cst_128 : f32 to vector<8x128xf32>
    %409 = arith.addf %408, %407 : vector<8x128xf32>
    %410 = arith.divf %408, %409 : vector<8x128xf32>
    %411 = math.tanh %405 : vector<8x128xf32>
    %412 = vector.extract_strided_slice %410 {offsets = [0, 32], sizes = [8, 32], strides = [1, 1]} : vector<8x128xf32> to vector<8x32xf32>
    %413 = arith.mulf %412, %391 : vector<8x32xf32>
    %414 = vector.extract_strided_slice %410 {offsets = [0, 0], sizes = [8, 32], strides = [1, 1]} : vector<8x128xf32> to vector<8x32xf32>
    %415 = vector.extract_strided_slice %411 {offsets = [0, 64], sizes = [8, 32], strides = [1, 1]} : vector<8x128xf32> to vector<8x32xf32>
    %416 = arith.mulf %414, %415 : vector<8x32xf32>
    %417 = arith.addf %413, %416 : vector<8x32xf32>
    %418 = vector.extract_strided_slice %410 {offsets = [0, 96], sizes = [8, 32], strides = [1, 1]} : vector<8x128xf32> to vector<8x32xf32>
    %419 = math.tanh %417 : vector<8x32xf32>
    %420 = arith.mulf %418, %419 : vector<8x32xf32>
    %421 = arith.index_cast %401 : i32 to index
    %c0_129 = arith.constant 0 : index
    %422 = vector.load %arg16[%421, %c0_129] : memref<64x32xf32, #tpu.memory_space<vmem>>, vector<8x32xf32>
    tpu.vector_store %arg16[%421, %c0_129], %420 {strides = array<i32>} : memref<64x32xf32, #tpu.memory_space<vmem>>, vector<8x32xf32>,
    %c1_i32_130 = arith.constant 1 : i32
    %c8_i32_131 = arith.constant 8 : i32
    %423 = arith.muli %c1_i32_130, %c8_i32_131 : i32
    %424 = tpu.assume_multiple %423, 8 : i32
    %425 = arith.index_cast %424 : i32 to index
    %c0_132 = arith.constant 0 : index
    %426 = vector.load %arg15[%425, %c0_132] : memref<64x128xf32, #tpu.memory_space<vmem>>, vector<8x128xf32>
    %cst_133 = arith.constant dense<0.000000e+00> : vector<8x128xf32>
    %427 = tpu.matmul %420, %399, %cst_133 {dimension_numbers = #tpu.dot_dimension_numbers<[1], [0], [0], [1], [0, 0, 1, 1], [], []>} : vector<8x32xf32>, vector<32x128xf32>, vector<8x128xf32> -> vector<8x128xf32>
    %428 = arith.addf %426, %427 : vector<8x128xf32>
    %429 = arith.negf %428 : vector<8x128xf32>
    %430 = math.exp %429 : vector<8x128xf32>
    %cst_134 = arith.constant 1.000000e+00 : f32
    %431 = vector.broadcast %cst_134 : f32 to vector<8x128xf32>
    %432 = arith.addf %431, %430 : vector<8x128xf32>
    %433 = arith.divf %431, %432 : vector<8x128xf32>
    %434 = math.tanh %428 : vector<8x128xf32>
    %435 = vector.extract_strided_slice %433 {offsets = [0, 32], sizes = [8, 32], strides = [1, 1]} : vector<8x128xf32> to vector<8x32xf32>
    %436 = arith.mulf %435, %417 : vector<8x32xf32>
    %437 = vector.extract_strided_slice %433 {offsets = [0, 0], sizes = [8, 32], strides = [1, 1]} : vector<8x128xf32> to vector<8x32xf32>
    %438 = vector.extract_strided_slice %434 {offsets = [0, 64], sizes = [8, 32], strides = [1, 1]} : vector<8x128xf32> to vector<8x32xf32>
    %439 = arith.mulf %437, %438 : vector<8x32xf32>
    %440 = arith.addf %436, %439 : vector<8x32xf32>
    %441 = vector.extract_strided_slice %433 {offsets = [0, 96], sizes = [8, 32], strides = [1, 1]} : vector<8x128xf32> to vector<8x32xf32>
    %442 = math.tanh %440 : vector<8x32xf32>
    %443 = arith.mulf %441, %442 : vector<8x32xf32>
    %444 = arith.index_cast %424 : i32 to index
    %c0_135 = arith.constant 0 : index
    %445 = vector.load %arg16[%444, %c0_135] : memref<64x32xf32, #tpu.memory_space<vmem>>, vector<8x32xf32>
    tpu.vector_store %arg16[%444, %c0_135], %443 {strides = array<i32>} : memref<64x32xf32, #tpu.memory_space<vmem>>, vector<8x32xf32>,
    %c2_i32_136 = arith.constant 2 : i32
    %c8_i32_137 = arith.constant 8 : i32
    %446 = arith.muli %c2_i32_136, %c8_i32_137 : i32
    %447 = tpu.assume_multiple %446, 8 : i32
    %448 = arith.index_cast %447 : i32 to index
    %c0_138 = arith.constant 0 : index
    %449 = vector.load %arg15[%448, %c0_138] : memref<64x128xf32, #tpu.memory_space<vmem>>, vector<8x128xf32>
    %cst_139 = arith.constant dense<0.000000e+00> : vector<8x128xf32>
    %450 = tpu.matmul %443, %399, %cst_139 {dimension_numbers = #tpu.dot_dimension_numbers<[1], [0], [0], [1], [0, 0, 1, 1], [], []>} : vector<8x32xf32>, vector<32x128xf32>, vector<8x128xf32> -> vector<8x128xf32>
    %451 = arith.addf %449, %450 : vector<8x128xf32>
    %452 = arith.negf %451 : vector<8x128xf32>
    %453 = math.exp %452 : vector<8x128xf32>
    %cst_140 = arith.constant 1.000000e+00 : f32
    %454 = vector.broadcast %cst_140 : f32 to vector<8x128xf32>
    %455 = arith.addf %454, %453 : vector<8x128xf32>
    %456 = arith.divf %454, %455 : vector<8x128xf32>
    %457 = math.tanh %451 : vector<8x128xf32>
    %458 = vector.extract_strided_slice %456 {offsets = [0, 32], sizes = [8, 32], strides = [1, 1]} : vector<8x128xf32> to vector<8x32xf32>
    %459 = arith.mulf %458, %440 : vector<8x32xf32>
    %460 = vector.extract_strided_slice %456 {offsets = [0, 0], sizes = [8, 32], strides = [1, 1]} : vector<8x128xf32> to vector<8x32xf32>
    %461 = vector.extract_strided_slice %457 {offsets = [0, 64], sizes = [8, 32], strides = [1, 1]} : vector<8x128xf32> to vector<8x32xf32>
    %462 = arith.mulf %460, %461 : vector<8x32xf32>
    %463 = arith.addf %459, %462 : vector<8x32xf32>
    %464 = vector.extract_strided_slice %456 {offsets = [0, 96], sizes = [8, 32], strides = [1, 1]} : vector<8x128xf32> to vector<8x32xf32>
    %465 = math.tanh %463 : vector<8x32xf32>
    %466 = arith.mulf %464, %465 : vector<8x32xf32>
    %467 = arith.index_cast %447 : i32 to index
    %c0_141 = arith.constant 0 : index
    %468 = vector.load %arg16[%467, %c0_141] : memref<64x32xf32, #tpu.memory_space<vmem>>, vector<8x32xf32>
    tpu.vector_store %arg16[%467, %c0_141], %466 {strides = array<i32>} : memref<64x32xf32, #tpu.memory_space<vmem>>, vector<8x32xf32>,
    %c3_i32_142 = arith.constant 3 : i32
    %c8_i32_143 = arith.constant 8 : i32
    %469 = arith.muli %c3_i32_142, %c8_i32_143 : i32
    %470 = tpu.assume_multiple %469, 8 : i32
    %471 = arith.index_cast %470 : i32 to index
    %c0_144 = arith.constant 0 : index
    %472 = vector.load %arg15[%471, %c0_144] : memref<64x128xf32, #tpu.memory_space<vmem>>, vector<8x128xf32>
    %cst_145 = arith.constant dense<0.000000e+00> : vector<8x128xf32>
    %473 = tpu.matmul %466, %399, %cst_145 {dimension_numbers = #tpu.dot_dimension_numbers<[1], [0], [0], [1], [0, 0, 1, 1], [], []>} : vector<8x32xf32>, vector<32x128xf32>, vector<8x128xf32> -> vector<8x128xf32>
    %474 = arith.addf %472, %473 : vector<8x128xf32>
    %475 = arith.negf %474 : vector<8x128xf32>
    %476 = math.exp %475 : vector<8x128xf32>
    %cst_146 = arith.constant 1.000000e+00 : f32
    %477 = vector.broadcast %cst_146 : f32 to vector<8x128xf32>
    %478 = arith.addf %477, %476 : vector<8x128xf32>
    %479 = arith.divf %477, %478 : vector<8x128xf32>
    %480 = math.tanh %474 : vector<8x128xf32>
    %481 = vector.extract_strided_slice %479 {offsets = [0, 32], sizes = [8, 32], strides = [1, 1]} : vector<8x128xf32> to vector<8x32xf32>
    %482 = arith.mulf %481, %463 : vector<8x32xf32>
    %483 = vector.extract_strided_slice %479 {offsets = [0, 0], sizes = [8, 32], strides = [1, 1]} : vector<8x128xf32> to vector<8x32xf32>
    %484 = vector.extract_strided_slice %480 {offsets = [0, 64], sizes = [8, 32], strides = [1, 1]} : vector<8x128xf32> to vector<8x32xf32>
    %485 = arith.mulf %483, %484 : vector<8x32xf32>
    %486 = arith.addf %482, %485 : vector<8x32xf32>
    %487 = vector.extract_strided_slice %479 {offsets = [0, 96], sizes = [8, 32], strides = [1, 1]} : vector<8x128xf32> to vector<8x32xf32>
    %488 = math.tanh %486 : vector<8x32xf32>
    %489 = arith.mulf %487, %488 : vector<8x32xf32>
    %490 = arith.index_cast %470 : i32 to index
    %c0_147 = arith.constant 0 : index
    %491 = vector.load %arg16[%490, %c0_147] : memref<64x32xf32, #tpu.memory_space<vmem>>, vector<8x32xf32>
    tpu.vector_store %arg16[%490, %c0_147], %489 {strides = array<i32>} : memref<64x32xf32, #tpu.memory_space<vmem>>, vector<8x32xf32>,
    %c4_i32_148 = arith.constant 4 : i32
    %c8_i32_149 = arith.constant 8 : i32
    %492 = arith.muli %c4_i32_148, %c8_i32_149 : i32
    %493 = tpu.assume_multiple %492, 8 : i32
    %494 = arith.index_cast %493 : i32 to index
    %c0_150 = arith.constant 0 : index
    %495 = vector.load %arg15[%494, %c0_150] : memref<64x128xf32, #tpu.memory_space<vmem>>, vector<8x128xf32>
    %cst_151 = arith.constant dense<0.000000e+00> : vector<8x128xf32>
    %496 = tpu.matmul %489, %399, %cst_151 {dimension_numbers = #tpu.dot_dimension_numbers<[1], [0], [0], [1], [0, 0, 1, 1], [], []>} : vector<8x32xf32>, vector<32x128xf32>, vector<8x128xf32> -> vector<8x128xf32>
    %497 = arith.addf %495, %496 : vector<8x128xf32>
    %498 = arith.negf %497 : vector<8x128xf32>
    %499 = math.exp %498 : vector<8x128xf32>
    %cst_152 = arith.constant 1.000000e+00 : f32
    %500 = vector.broadcast %cst_152 : f32 to vector<8x128xf32>
    %501 = arith.addf %500, %499 : vector<8x128xf32>
    %502 = arith.divf %500, %501 : vector<8x128xf32>
    %503 = math.tanh %497 : vector<8x128xf32>
    %504 = vector.extract_strided_slice %502 {offsets = [0, 32], sizes = [8, 32], strides = [1, 1]} : vector<8x128xf32> to vector<8x32xf32>
    %505 = arith.mulf %504, %486 : vector<8x32xf32>
    %506 = vector.extract_strided_slice %502 {offsets = [0, 0], sizes = [8, 32], strides = [1, 1]} : vector<8x128xf32> to vector<8x32xf32>
    %507 = vector.extract_strided_slice %503 {offsets = [0, 64], sizes = [8, 32], strides = [1, 1]} : vector<8x128xf32> to vector<8x32xf32>
    %508 = arith.mulf %506, %507 : vector<8x32xf32>
    %509 = arith.addf %505, %508 : vector<8x32xf32>
    %510 = vector.extract_strided_slice %502 {offsets = [0, 96], sizes = [8, 32], strides = [1, 1]} : vector<8x128xf32> to vector<8x32xf32>
    %511 = math.tanh %509 : vector<8x32xf32>
    %512 = arith.mulf %510, %511 : vector<8x32xf32>
    %513 = arith.index_cast %493 : i32 to index
    %c0_153 = arith.constant 0 : index
    %514 = vector.load %arg16[%513, %c0_153] : memref<64x32xf32, #tpu.memory_space<vmem>>, vector<8x32xf32>
    tpu.vector_store %arg16[%513, %c0_153], %512 {strides = array<i32>} : memref<64x32xf32, #tpu.memory_space<vmem>>, vector<8x32xf32>,
    %c5_i32_154 = arith.constant 5 : i32
    %c8_i32_155 = arith.constant 8 : i32
    %515 = arith.muli %c5_i32_154, %c8_i32_155 : i32
    %516 = tpu.assume_multiple %515, 8 : i32
    %517 = arith.index_cast %516 : i32 to index
    %c0_156 = arith.constant 0 : index
    %518 = vector.load %arg15[%517, %c0_156] : memref<64x128xf32, #tpu.memory_space<vmem>>, vector<8x128xf32>
    %cst_157 = arith.constant dense<0.000000e+00> : vector<8x128xf32>
    %519 = tpu.matmul %512, %399, %cst_157 {dimension_numbers = #tpu.dot_dimension_numbers<[1], [0], [0], [1], [0, 0, 1, 1], [], []>} : vector<8x32xf32>, vector<32x128xf32>, vector<8x128xf32> -> vector<8x128xf32>
    %520 = arith.addf %518, %519 : vector<8x128xf32>
    %521 = arith.negf %520 : vector<8x128xf32>
    %522 = math.exp %521 : vector<8x128xf32>
    %cst_158 = arith.constant 1.000000e+00 : f32
    %523 = vector.broadcast %cst_158 : f32 to vector<8x128xf32>
    %524 = arith.addf %523, %522 : vector<8x128xf32>
    %525 = arith.divf %523, %524 : vector<8x128xf32>
    %526 = math.tanh %520 : vector<8x128xf32>
    %527 = vector.extract_strided_slice %525 {offsets = [0, 32], sizes = [8, 32], strides = [1, 1]} : vector<8x128xf32> to vector<8x32xf32>
    %528 = arith.mulf %527, %509 : vector<8x32xf32>
    %529 = vector.extract_strided_slice %525 {offsets = [0, 0], sizes = [8, 32], strides = [1, 1]} : vector<8x128xf32> to vector<8x32xf32>
    %530 = vector.extract_strided_slice %526 {offsets = [0, 64], sizes = [8, 32], strides = [1, 1]} : vector<8x128xf32> to vector<8x32xf32>
    %531 = arith.mulf %529, %530 : vector<8x32xf32>
    %532 = arith.addf %528, %531 : vector<8x32xf32>
    %533 = vector.extract_strided_slice %525 {offsets = [0, 96], sizes = [8, 32], strides = [1, 1]} : vector<8x128xf32> to vector<8x32xf32>
    %534 = math.tanh %532 : vector<8x32xf32>
    %535 = arith.mulf %533, %534 : vector<8x32xf32>
    %536 = arith.index_cast %516 : i32 to index
    %c0_159 = arith.constant 0 : index
    %537 = vector.load %arg16[%536, %c0_159] : memref<64x32xf32, #tpu.memory_space<vmem>>, vector<8x32xf32>
    tpu.vector_store %arg16[%536, %c0_159], %535 {strides = array<i32>} : memref<64x32xf32, #tpu.memory_space<vmem>>, vector<8x32xf32>,
    %c6_i32_160 = arith.constant 6 : i32
    %c8_i32_161 = arith.constant 8 : i32
    %538 = arith.muli %c6_i32_160, %c8_i32_161 : i32
    %539 = tpu.assume_multiple %538, 8 : i32
    %540 = arith.index_cast %539 : i32 to index
    %c0_162 = arith.constant 0 : index
    %541 = vector.load %arg15[%540, %c0_162] : memref<64x128xf32, #tpu.memory_space<vmem>>, vector<8x128xf32>
    %cst_163 = arith.constant dense<0.000000e+00> : vector<8x128xf32>
    %542 = tpu.matmul %535, %399, %cst_163 {dimension_numbers = #tpu.dot_dimension_numbers<[1], [0], [0], [1], [0, 0, 1, 1], [], []>} : vector<8x32xf32>, vector<32x128xf32>, vector<8x128xf32> -> vector<8x128xf32>
    %543 = arith.addf %541, %542 : vector<8x128xf32>
    %544 = arith.negf %543 : vector<8x128xf32>
    %545 = math.exp %544 : vector<8x128xf32>
    %cst_164 = arith.constant 1.000000e+00 : f32
    %546 = vector.broadcast %cst_164 : f32 to vector<8x128xf32>
    %547 = arith.addf %546, %545 : vector<8x128xf32>
    %548 = arith.divf %546, %547 : vector<8x128xf32>
    %549 = math.tanh %543 : vector<8x128xf32>
    %550 = vector.extract_strided_slice %548 {offsets = [0, 32], sizes = [8, 32], strides = [1, 1]} : vector<8x128xf32> to vector<8x32xf32>
    %551 = arith.mulf %550, %532 : vector<8x32xf32>
    %552 = vector.extract_strided_slice %548 {offsets = [0, 0], sizes = [8, 32], strides = [1, 1]} : vector<8x128xf32> to vector<8x32xf32>
    %553 = vector.extract_strided_slice %549 {offsets = [0, 64], sizes = [8, 32], strides = [1, 1]} : vector<8x128xf32> to vector<8x32xf32>
    %554 = arith.mulf %552, %553 : vector<8x32xf32>
    %555 = arith.addf %551, %554 : vector<8x32xf32>
    %556 = vector.extract_strided_slice %548 {offsets = [0, 96], sizes = [8, 32], strides = [1, 1]} : vector<8x128xf32> to vector<8x32xf32>
    %557 = math.tanh %555 : vector<8x32xf32>
    %558 = arith.mulf %556, %557 : vector<8x32xf32>
    %559 = arith.index_cast %539 : i32 to index
    %c0_165 = arith.constant 0 : index
    %560 = vector.load %arg16[%559, %c0_165] : memref<64x32xf32, #tpu.memory_space<vmem>>, vector<8x32xf32>
    tpu.vector_store %arg16[%559, %c0_165], %558 {strides = array<i32>} : memref<64x32xf32, #tpu.memory_space<vmem>>, vector<8x32xf32>,
    %c7_i32_166 = arith.constant 7 : i32
    %c8_i32_167 = arith.constant 8 : i32
    %561 = arith.muli %c7_i32_166, %c8_i32_167 : i32
    %562 = tpu.assume_multiple %561, 8 : i32
    %563 = arith.index_cast %562 : i32 to index
    %c0_168 = arith.constant 0 : index
    %564 = vector.load %arg15[%563, %c0_168] : memref<64x128xf32, #tpu.memory_space<vmem>>, vector<8x128xf32>
    %cst_169 = arith.constant dense<0.000000e+00> : vector<8x128xf32>
    %565 = tpu.matmul %558, %399, %cst_169 {dimension_numbers = #tpu.dot_dimension_numbers<[1], [0], [0], [1], [0, 0, 1, 1], [], []>} : vector<8x32xf32>, vector<32x128xf32>, vector<8x128xf32> -> vector<8x128xf32>
    %566 = arith.addf %564, %565 : vector<8x128xf32>
    %567 = arith.negf %566 : vector<8x128xf32>
    %568 = math.exp %567 : vector<8x128xf32>
    %cst_170 = arith.constant 1.000000e+00 : f32
    %569 = vector.broadcast %cst_170 : f32 to vector<8x128xf32>
    %570 = arith.addf %569, %568 : vector<8x128xf32>
    %571 = arith.divf %569, %570 : vector<8x128xf32>
    %572 = math.tanh %566 : vector<8x128xf32>
    %573 = vector.extract_strided_slice %571 {offsets = [0, 32], sizes = [8, 32], strides = [1, 1]} : vector<8x128xf32> to vector<8x32xf32>
    %574 = arith.mulf %573, %555 : vector<8x32xf32>
    %575 = vector.extract_strided_slice %571 {offsets = [0, 0], sizes = [8, 32], strides = [1, 1]} : vector<8x128xf32> to vector<8x32xf32>
    %576 = vector.extract_strided_slice %572 {offsets = [0, 64], sizes = [8, 32], strides = [1, 1]} : vector<8x128xf32> to vector<8x32xf32>
    %577 = arith.mulf %575, %576 : vector<8x32xf32>
    %578 = arith.addf %574, %577 : vector<8x32xf32>
    %579 = vector.extract_strided_slice %571 {offsets = [0, 96], sizes = [8, 32], strides = [1, 1]} : vector<8x128xf32> to vector<8x32xf32>
    %580 = math.tanh %578 : vector<8x32xf32>
    %581 = arith.mulf %579, %580 : vector<8x32xf32>
    %582 = arith.index_cast %562 : i32 to index
    %c0_171 = arith.constant 0 : index
    %583 = vector.load %arg16[%582, %c0_171] : memref<64x32xf32, #tpu.memory_space<vmem>>, vector<8x32xf32>
    tpu.vector_store %arg16[%582, %c0_171], %581 {strides = array<i32>} : memref<64x32xf32, #tpu.memory_space<vmem>>, vector<8x32xf32>,
    %c8_i32_172 = arith.constant 8 : i32
    %c0_173 = arith.constant 0 : index
    %c0_174 = arith.constant 0 : index
    %584 = vector.load %arg16[%c0_173, %c0_174] : memref<64x32xf32, #tpu.memory_space<vmem>>, vector<64x32xf32>
    %c0_175 = arith.constant 0 : index
    %c0_176 = arith.constant 0 : index
    %585 = vector.load %arg12[%c0_175, %c0_176] : memref<32x128xf32, #tpu.memory_space<vmem>>, vector<32x128xf32>
    %cst_177 = arith.constant dense<0.000000e+00> : vector<64x128xf32>
    %586 = tpu.matmul %584, %585, %cst_177 {dimension_numbers = #tpu.dot_dimension_numbers<[1], [0], [0], [1], [0, 0, 1, 1], [], []>} : vector<64x32xf32>, vector<32x128xf32>, vector<64x128xf32> -> vector<64x128xf32>
    %c0_178 = arith.constant 0 : index
    %c0_179 = arith.constant 0 : index
    %587 = vector.load %arg13[%c0_178, %c0_179] : memref<1x128xf32, #tpu.memory_space<vmem>>, vector<1x128xf32>
    %588 = vector.broadcast %587 : vector<1x128xf32> to vector<64x128xf32>
    %589 = arith.addf %586, %588 : vector<64x128xf32>
    %c0_180 = arith.constant 0 : index
    %c0_181 = arith.constant 0 : index
    %590 = vector.load %arg14[%c0_180, %c0_181] : memref<64x128xf32, #tpu.memory_space<vmem>>, vector<64x128xf32>
    tpu.vector_store %arg14[%c0_180, %c0_181], %589 {strides = array<i32>} : memref<64x128xf32, #tpu.memory_space<vmem>>, vector<64x128xf32>,
    return
  }
  func.func @transform_0(%arg0: i32) -> (i32, i32) {
    %c0_i32 = arith.constant 0 : i32
    %c0_i32_0 = arith.constant 0 : i32
    return %arg0, %c0_i32 : i32, i32
  }
  func.func @transform_1(%arg0: i32) -> (i32, i32) {
    %c0_i32 = arith.constant 0 : i32
    %c0_i32_0 = arith.constant 0 : i32
    %c0_i32_1 = arith.constant 0 : i32
    return %c0_i32, %c0_i32_0 : i32, i32
  }
  func.func @transform_2(%arg0: i32) -> (i32, i32) {
    %c0_i32 = arith.constant 0 : i32
    %c0_i32_0 = arith.constant 0 : i32
    %c0_i32_1 = arith.constant 0 : i32
    return %c0_i32, %c0_i32_0 : i32, i32
  }
  func.func @transform_3(%arg0: i32) -> (i32, i32) {
    %c0_i32 = arith.constant 0 : i32
    %c0_i32_0 = arith.constant 0 : i32
    %c0_i32_1 = arith.constant 0 : i32
    return %c0_i32, %c0_i32_0 : i32, i32
  }
  func.func @transform_4(%arg0: i32) -> (i32, i32) {
    %c0_i32 = arith.constant 0 : i32
    %c0_i32_0 = arith.constant 0 : i32
    %c0_i32_1 = arith.constant 0 : i32
    return %c0_i32, %c0_i32_0 : i32, i32
  }
  func.func @transform_5(%arg0: i32) -> (i32, i32) {
    %c0_i32 = arith.constant 0 : i32
    %c0_i32_0 = arith.constant 0 : i32
    %c0_i32_1 = arith.constant 0 : i32
    return %c0_i32, %c0_i32_0 : i32, i32
  }
  func.func @transform_6(%arg0: i32) -> (i32, i32) {
    %c0_i32 = arith.constant 0 : i32
    %c0_i32_0 = arith.constant 0 : i32
    %c0_i32_1 = arith.constant 0 : i32
    return %c0_i32, %c0_i32_0 : i32, i32
  }
  func.func @transform_7(%arg0: i32) -> (i32, i32) {
    %c0_i32 = arith.constant 0 : i32
    %c0_i32_0 = arith.constant 0 : i32
    %c0_i32_1 = arith.constant 0 : i32
    return %c0_i32, %c0_i32_0 : i32, i32
  }
  func.func @transform_8(%arg0: i32) -> (i32, i32) {
    %c0_i32 = arith.constant 0 : i32
    %c0_i32_0 = arith.constant 0 : i32
    %c0_i32_1 = arith.constant 0 : i32
    return %c0_i32, %c0_i32_0 : i32, i32
  }
  func.func @transform_9(%arg0: i32) -> (i32, i32) {
    %c0_i32 = arith.constant 0 : i32
    %c0_i32_0 = arith.constant 0 : i32
    %c0_i32_1 = arith.constant 0 : i32
    return %c0_i32, %c0_i32_0 : i32, i32
  }
  func.func @transform_10(%arg0: i32) -> (i32, i32) {
    %c0_i32 = arith.constant 0 : i32
    %c0_i32_0 = arith.constant 0 : i32
    %c0_i32_1 = arith.constant 0 : i32
    return %c0_i32, %c0_i32_0 : i32, i32
  }
  func.func @transform_11(%arg0: i32) -> (i32, i32) {
    %c0_i32 = arith.constant 0 : i32
    %c0_i32_0 = arith.constant 0 : i32
    %c0_i32_1 = arith.constant 0 : i32
    return %c0_i32, %c0_i32_0 : i32, i32
  }
  func.func @transform_12(%arg0: i32) -> (i32, i32) {
    %c0_i32 = arith.constant 0 : i32
    %c0_i32_0 = arith.constant 0 : i32
    %c0_i32_1 = arith.constant 0 : i32
    return %c0_i32, %c0_i32_0 : i32, i32
  }
  func.func @transform_13(%arg0: i32) -> (i32, i32) {
    %c0_i32 = arith.constant 0 : i32
    %c0_i32_0 = arith.constant 0 : i32
    return %arg0, %c0_i32 : i32, i32
  }
}

</mosaic_0001>

<bundles_post_ra>
// kernel: tpu_custom_call.1
= control target key start
LH: loop header
LB: loop body
LE: loop exit
PB: predicated region body
PF: predicated region fallthrough
CT: control target
= control target key end

     0   :  { %18 = vsyncpa [#allocation7], 0  ;;  %s5593_s0 = inlined_call_operand.vmem [shape: f32[64,10], index: 0, kind: input, shape index: {}]   ;;  %s5594_s1 = inlined_call_operand.hbm [shape: f32[10,128], index: 1, kind: input, shape index: {}]   ;;  %s5595_s2 = inlined_call_operand.hbm [shape: f32[1,128], index: 2, kind: input, shape index: {}]   ;;  %s5596_s3 = inlined_call_operand.hbm [shape: f32[32,128], index: 3, kind: input, shape index: {}]   ;;  %s5597_s4 = inlined_call_operand.vmem [shape: f32[32,256], index: 4, kind: input, shape index: {}]   ;;  %s5598_s5 = inlined_call_operand.vmem [shape: f32[10,256], index: 5, kind: input, shape index: {}]   ;;  %s5599_s6 = inlined_call_operand.vmem [shape: f32[1,256], index: 6, kind: input, shape index: {}]   ;;  %s5600_s7 = inlined_call_operand.hbm [shape: f32[64,256], index: 7, kind: input, shape index: {}]   ;;  %s5601_s8 = inlined_call_operand.hbm [shape: f32[64,128], index: 8, kind: input, shape index: {}]   ;;  %s5602_s9 = inlined_call_operand.vmem [shape: f32[1,128], index: 9, kind: input, shape index: {}]   ;;  %s5603_s10 = inlined_call_operand.hbm [shape: f32[32,128], index: 10, kind: input, shape index: {}]   ;;  %s5604_s11 = inlined_call_operand.hbm [shape: f32[32,128], index: 11, kind: input, shape index: {}]   ;;  %s5605_s12 = inlined_call_operand.vmem [shape: f32[1,128], index: 12, kind: input, shape index: {}]   ;;  %s5606_s13 = inlined_call_operand.hbm [shape: f32[64,128], index: 13, kind: output, shape index: {}]  }
   0x1   :  { %19 = vsyncpa [#allocation10], 0 }
   0x2   :  { %20 = vsyncpa [#allocation13], 0 }
   0x3   :  { %21 = vsyncpa [#allocation16], 0 }
   0x4   :  { %22 = vsyncpa [#allocation8], 0  ;;  %s4732_s25 = smov [#allocation9]   ;;  %s4733_s27 = smov [#allocation12]  }
   0x5   :  { %s43_s26 = sshll.u32 %s4732_s25, 4  ;;  %s70_s28 = sshll.u32 %s4733_s27, 4  ;;  %s44_s26 = int_to_ptr.vmem [resolvable:$true] %s43_s26  ;;  %s4821_s28 = int_to_ptr.vmem [resolvable:$true] %s70_s28 }
   0x6   :  { %s4546_s14 = scalar_lea.hbm %s5595_s2, 16 }
   0x7   :  { %p4547_p0 = scmp.ne.s32.totalorder %s5595_s2, %s4546_s14  ;;  %p4550_p1 = scmp.lt.u32.totalorder %s4546_s14, %s5595_s2 }
   0x9   :  { %p4552_p2 = pnand %p4550_p1, %p4547_p0 }
   0xb   :  { %4555 = shalt.err (!%p4552_p2)
}
   0xc   :  { %s4556_s19 = scalar_lea.vmem %s44_s26, 16  ;;  %s4560_s20 = scalar_lea.vmem %s44_s26, 32 }
   0xd   :  { %p4557_p3 = scmp.ne.s32.totalorder %s44_s26, %s4556_s19  ;;  %p4561_p4 = scmp.lt.s32.totalorder %s44_s26, %s44_s26 }
   0xe   :  { %p4562_p5 = scmp.lt.s32.totalorder %s4560_s20, %s4556_s19 }
  0x10   :  { %p4563_p6 = por %p4562_p5, %p4561_p4 }
  0x12   :  { %p4564_p7 = pnand %p4563_p6, %p4557_p3 }
  0x14   :  { %4567 = shalt.err (!%p4564_p7)
}
  0x15   :  { %46 = dma.hbm_to_vmem [thread:$0]  %s5595_s2, 16, %s44_s26, [#allocation10]  }
  0x16   :  { %s4568_s25 = scalar_lea.hbm %s5600_s7, 2048 }
  0x17   :  { %p4569_p8 = scmp.ne.s32.totalorder %s5600_s7, %s4568_s25  ;;  %p4572_p9 = scmp.lt.u32.totalorder %s4568_s25, %s5600_s7 }
  0x19   :  { %p4574_p10 = pnand %p4572_p9, %p4569_p8 }
  0x1b   :  { %4577 = shalt.err (!%p4574_p10)
}
  0x1c   :  { %s4578_s15 = scalar_lea.vmem %s4821_s28, 2048  ;;  %p4583_p12 = scmp.lt.s32.totalorder %s4821_s28, %s4821_s28 }
  0x1d   :  { %p4579_p11 = scmp.ne.s32.totalorder %s4821_s28, %s4578_s15  ;;  %p4584_p13 = scmp.lt.s32.totalorder %s4578_s15, %s4578_s15 }
  0x1f   :  { %p4585_p0 = por %p4584_p13, %p4583_p12 }
  0x21   :  { %p4586_p1 = pnand %p4585_p0, %p4579_p11 }
  0x23   :  { %4589 = shalt.err (!%p4586_p1)
}
  0x24   :  { %s4734_s2 = smov 256   ;;  %s4735_s26 = smov 16  }
  0x25   :  { %76 = dma.hbm_to_vmem [thread:$0]  %s5600_s7, 2048, %s4821_s28, [#allocation13], %s4734_s2, %s4734_s2, %s4735_s26  }
  0x26   :  { %s4736_s18 = smov [#allocation15]   ;;  %s4737_s20 = smov [#allocation6]  }
  0x27   :  { %s96_s19 = sshll.u32 %s4736_s18, 4  ;;  %s30_s21 = sshll.u32 %s4737_s20, 4  ;;  %s97_s19 = int_to_ptr.vmem [resolvable:$true] %s96_s19  ;;  %s4852_s21 = int_to_ptr.vmem [resolvable:$true] %s30_s21 }
  0x28   :  { %s4590_s24 = scalar_lea.hbm %s5603_s10, 512 }
  0x29   :  { %p4591_p2 = scmp.ne.s32.totalorder %s5603_s10, %s4590_s24  ;;  %p4594_p3 = scmp.lt.u32.totalorder %s4590_s24, %s5603_s10 }
  0x2b   :  { %p4596_p4 = pnand %p4594_p3, %p4591_p2 }
  0x2d   :  { %4599 = shalt.err (!%p4596_p4)
}
  0x2e   :  { %s4600_s7 = scalar_lea.vmem %s97_s19, 512  ;;  %p4605_p6 = scmp.lt.s32.totalorder %s97_s19, %s97_s19 }
  0x2f   :  { %p4601_p5 = scmp.ne.s32.totalorder %s97_s19, %s4600_s7  ;;  %p4606_p7 = scmp.lt.s32.totalorder %s4600_s7, %s4600_s7 }
  0x31   :  { %p4607_p8 = por %p4606_p7, %p4605_p6 }
  0x33   :  { %p4608_p9 = pnand %p4607_p8, %p4601_p5 }
  0x35   :  { %4611 = shalt.err (!%p4608_p9)
}
  0x36   :  { %s4738_s28 = smov 128   ;;  %s4739_s14 = smov 8  }
  0x37   :  { %102 = dma.hbm_to_vmem [thread:$0]  %s5603_s10, 512, %s97_s19, [#allocation16], %s4738_s28, %s4738_s28, %s4739_s14  }
  0x38   :  { %s4612_s17 = scalar_lea.hbm %s5594_s1, 256 }
  0x39   :  { %p4613_p10 = scmp.ne.s32.totalorder %s5594_s1, %s4612_s17  ;;  %p4616_p11 = scmp.lt.u32.totalorder %s4612_s17, %s5594_s1 }
  0x3b   :  { %p4618_p12 = pnand %p4616_p11, %p4613_p10 }
  0x3d   :  { %4621 = shalt.err (!%p4618_p12)
}
  0x3e   :  { %s4622_s24 = scalar_lea.vmem %s4852_s21, 256  ;;  %p4627_p0 = scmp.lt.s32.totalorder %s4852_s21, %s4852_s21 }
  0x3f   :  { %p4623_p13 = scmp.ne.s32.totalorder %s4852_s21, %s4622_s24  ;;  %p4628_p1 = scmp.lt.s32.totalorder %s4622_s24, %s4622_s24 }
  0x41   :  { %p4629_p2 = por %p4628_p1, %p4627_p0 }
  0x43   :  { %p4630_p3 = pnand %p4629_p2, %p4623_p13 }
  0x45   :  { %4633 = shalt.err (!%p4630_p3)
}
  0x46   :  { %36 = dma.hbm_to_vmem [thread:$0]  %s5594_s1, 256, %s4852_s21, [#allocation7], %s4738_s28, %s4738_s28, %s4739_s14  }
  0x47   :  { %s4740_s25 = smov [#allocation11]   ;;  %s4741_s29 = smov [#allocation14]  }
  0x48   :  { %s52_s27 = sshll.u32 %s4740_s25, 4  ;;  %s82_s30 = sshll.u32 %s4741_s29, 4  ;;  %s53_s27 = int_to_ptr.vmem [resolvable:$true] %s52_s27  ;;  %s4889_s30 = int_to_ptr.vmem [resolvable:$true] %s82_s30 }
  0x49   :  { %s4634_s2 = scalar_lea.hbm %s5596_s3, 512 }
  0x4a   :  { %p4635_p4 = scmp.ne.s32.totalorder %s5596_s3, %s4634_s2  ;;  %p4638_p5 = scmp.lt.u32.totalorder %s4634_s2, %s5596_s3 }
  0x4c   :  { %p4640_p6 = pnand %p4638_p5, %p4635_p4 }
  0x4e   :  { %4643 = shalt.err (!%p4640_p6)
}
  0x4f   :  { %s4644_s1 = scalar_lea.vmem %s53_s27, 512  ;;  %p4649_p8 = scmp.lt.s32.totalorder %s53_s27, %s53_s27 }
  0x50   :  { %p4645_p7 = scmp.ne.s32.totalorder %s53_s27, %s4644_s1  ;;  %p4650_p9 = scmp.lt.s32.totalorder %s4644_s1, %s4644_s1 }
  0x52   :  { %p4651_p10 = por %p4650_p9, %p4649_p8 }
  0x54   :  { %p4652_p11 = pnand %p4651_p10, %p4645_p7 }
  0x56   :  { %4655 = shalt.err (!%p4652_p11)
}
  0x57   :  { %58 = dma.hbm_to_vmem [thread:$0]  %s5596_s3, 512, %s53_s27, [#allocation10], %s4738_s28, %s4738_s28, %s4739_s14  }
  0x58   :  { %s4656_s24 = scalar_lea.hbm %s5601_s8, 1024 }
  0x59   :  { %p4657_p12 = scmp.ne.s32.totalorder %s5601_s8, %s4656_s24  ;;  %p4660_p13 = scmp.lt.u32.totalorder %s4656_s24, %s5601_s8 }
  0x5b   :  { %p4662_p0 = pnand %p4660_p13, %p4657_p12 }
  0x5d   :  { %4665 = shalt.err (!%p4662_p0)
}
  0x5e   :  { %s4666_s7 = scalar_lea.vmem %s4889_s30, 1024  ;;  %p4671_p2 = scmp.lt.s32.totalorder %s4889_s30, %s4889_s30 }
  0x5f   :  { %p4667_p1 = scmp.ne.s32.totalorder %s4889_s30, %s4666_s7  ;;  %p4672_p3 = scmp.lt.s32.totalorder %s4666_s7, %s4666_s7 }
  0x61   :  { %p4673_p4 = por %p4672_p3, %p4671_p2 }
  0x63   :  { %p4674_p5 = pnand %p4673_p4, %p4667_p1 }
  0x65   :  { %4677 = shalt.err (!%p4674_p5)
}
  0x66   :  { %88 = dma.hbm_to_vmem [thread:$0]  %s5601_s8, 1024, %s4889_s30, [#allocation13], %s4738_s28, %s4738_s28, %s4739_s14  }
  0x67   :  { %s4742_s15 = smov [#allocation17]   ;;  %s4678_s17 = scalar_lea.hbm %s5604_s11, 512 }
  0x68   :  { %s108_s2 = sshll.u32 %s4742_s15, 4  ;;  %p4679_p6 = scmp.ne.s32.totalorder %s5604_s11, %s4678_s17  ;;  %s109_s2 = int_to_ptr.vmem [resolvable:$true] %s108_s2 }
  0x69   :  { %p4682_p7 = scmp.lt.u32.totalorder %s4678_s17, %s5604_s11 }
  0x6b   :  { %p4684_p8 = pnand %p4682_p7, %p4679_p6 }
  0x6d   :  { %4687 = shalt.err (!%p4684_p8)
}
  0x6e   :  { %s4688_s22 = scalar_lea.vmem %s109_s2, 512  ;;  %p4693_p10 = scmp.lt.s32.totalorder %s109_s2, %s109_s2 }
  0x6f   :  { %p4689_p9 = scmp.ne.s32.totalorder %s109_s2, %s4688_s22  ;;  %p4694_p11 = scmp.lt.s32.totalorder %s4688_s22, %s4688_s22 }
  0x71   :  { %p4695_p12 = por %p4694_p11, %p4693_p10 }
  0x73   :  { %p4696_p13 = pnand %p4695_p12, %p4689_p9 }
  0x75   :  { %4699 = shalt.err (!%p4696_p13)
}
  0x76   :  { %114 = dma.hbm_to_vmem [thread:$0]  %s5604_s11, 512, %s109_s2, [#allocation16], %s4738_s28, %s4738_s28, %s4739_s14  }
  0x77   :  { %4722 = dma.done.wait [#allocation7], 256  }
  0x78   :  { %4723 = vsyncadd [#allocation7], 4294967040 }
  0x79   :  { %4724 = dma.done.wait [#allocation10], 528  }
  0x7a   :  { %4725 = vsyncadd [#allocation10], 4294966768 }
  0x7b   :  { %4726 = dma.done.wait [#allocation13], 3072  }
  0x7c   :  { %4727 = vsyncadd [#allocation13], 4294964224 }
  0x7d   :  { %4728 = dma.done.wait [#allocation16], 1024  }
  0x7e   :  { %4729 = vsyncadd [#allocation16], 4294966272  ;;  %vm180_vm0 = vcmask 1041408   ;;  %vm155_vm1 = vcmask 80896   ;;  %vm4743_vm2 = vmmov 1   ;;  %v146_v1 = vld [vmem:[#allocation6] sm:$0xff] }
  0x7f   :  { %vm4941_vm3 = vmpackc.low %vm180_vm0, %vm4743_vm2  ;;  %v147_v2 = vld [vmem:[#allocation6 + $0x8] sm:$0x3]  ;;  %v4948_v3 = vld [vmem:[%s5593_s0 + $0x20] sm:$0xff]  ;;  %v4744_v11 = vmov 0.0|0.0   ;;  %vm4745_vm4 = vmmov 0   ;;  %v4746_v17 = vmov 0.0  }
  0x80   :  { %v3985_v4 = vpack.c.bf16 %v147_v2, %v146_v1  ;;  %3755 = vmatprep.mubr.msk.f32.mxu1 %vm155_vm1, %v4948_v3  ;;  %v297_v5 = vld [vmem:[#allocation11] sm:$0xff]  ;;  %v298_v6 = vld [vmem:[#allocation11 + $0x8] sm:$0xff]  ;;  %v4966_v8 = vld [vmem:[%s5593_s0 + $0x28] sm:$0xff]  ;;  %s4747_s26 = smov 64   ;;  %s4748_s16 = smov 32   ;;  %vm302_vm5 = vcmask 261120  }
  0x81   :  { %v4955_v7 = vld [vmem:[%s5593_s0] sm:$0xff]  ;;  %v4968_v9 = vpack.c.bf16 %v298_v6, %v297_v5  ;;  %v4975_v10 = vld [vmem:[%s5593_s0 + $0x8] sm:$0xff]  ;;  %v4981_v12 = vld [vmem:[%s5593_s0 + $0x30] sm:$0xff]  ;;  %vm1487_vm6 = vcmask 523264  }
  0x82   :  { %4253 = vmatprep.subr.msk.bf16.mxu1 %vm4941_vm3, %v3985_v4  ;;  %3987 = vmatprep.subr.msk.bf16.mxu0 %vm4941_vm3, %v3985_v4  ;;  %v299_v13 = vld [vmem:[#allocation11 + $0x10] sm:$0xff]  ;;  %v300_v14 = vld [vmem:[#allocation11 + $0x18] sm:$0xff]  ;;  %v4996_v15 = vld [vmem:[%s5593_s0 + $0x38] sm:$0xff] }
  0x83   :  { %4254 = vmatpush3.bf16.msk.msra.mxu1 %vm4941_vm3, %v3985_v4  ;;  %3990 = vmatpush3.bf16.msk.msra.mxu0 %vm4941_vm3, %v3985_v4  ;;  %v4998_v16 = vpack.c.bf16 %v300_v14, %v299_v13  ;;  %v5022_v22 = vld [vmem:[#allocation9] ss:$0 sm:$0xff]  ;;  %v5052_v58 = vld [vmem:[%s5593_s0 + $0x18] sm:$0xff]  ;;  %v1149_v0 = vld [vmem:[%s5597_s4] sm:$0xff] }
  0x84   :  { %3991 = vmatprep.subr.bf16.mxu1 %v4744_v11  ;;  %3749 = vmatprep.mubr.msk.f32.mxu0 %vm155_vm1, %v4955_v7  ;;  %v5047_v57 = vld [vmem:[%s5593_s0 + $0x10] sm:$0xff] }
  0x85   :  { %4003 = vmatprep.subr.bf16.mxu0 %v4744_v11 }
  0x86   :  { %3756 = vmatmul.mubr.msk.f32.vlgmr.msra.gmra.mrb[0].mxu1 %vm155_vm1, %v4966_v8  ;;  %3750 = vmatmul.mubr.msk.f32.vlgmr.msra.gmra.mrb[0].mxu0 %vm155_vm1, %v4975_v10 }
  0x87   :  { %3993 = vmatpush3.bf16.msra.mxu1 %v4968_v9  ;;  %3758 = vmatprep.mubr.msk.f32.mxu1 %vm155_vm1, %v4981_v12 }
  0x88   :  { %3994 = vmatprep.subr.bf16.mxu1 %v4744_v11  ;;  %4005 = vmatpush3.bf16.msra.mxu0 %v4968_v9 }
  0x89   :  { %4006 = vmatprep.subr.bf16.mxu0 %v4744_v11  ;;  %3752 = vmatprep.mubr.msk.f32.mxu0 %vm155_vm1, %v5047_v57 }
  0x8a   :  { %3759 = vmatmul.mubr.msk.f32.gmra.mrb[2].mxu1 %vm155_vm1, %v4996_v15  ;;  %3753 = vmatmul.mubr.msk.f32.gmra.mrb[2].mxu0 %vm155_vm1, %v5052_v58 }
  0x8b   :  { %3996 = vmatpush3.bf16.msra.mxu1 %v4998_v16  ;;  %3769 = vmatprep.mubr.msk.f32.mxu1 %vm4745_vm4, %v4746_v17 }
  0x8c   :  { %3997 = vmatprep.subr.bf16.mxu1 %v4744_v11  ;;  %4008 = vmatpush3.bf16.msra.mxu0 %v4998_v16 }
  0x8d   :  { %4015 = vmatprep.subr.bf16.mxu0 %v4744_v11  ;;  %3791 = vmatprep.mubr.msk.f32.mxu0 %vm4745_vm4, %v4746_v17 }
  0x8e   :  { %3770 = vmatmul.mubr.f32.vlgmr.msra.gmra.mrb[4].mxu1 %v4746_v17 }
  0x8f   :  { %3999 = vmatpush3.bf16.msra.mxu1 %v4968_v9  ;;  %3780 = vmatprep.mubr.msk.f32.mxu1 %vm4745_vm4, %v4746_v17 }
  0x90   :  { %4000 = vmatprep.subr.bf16.mxu1 %v4744_v11 }
  0x93   :  { %4002 = vmatpush3.bf16.msra.mxu1 %v4998_v16 }
  0x94   :  { %4009 = vmatprep.subr.bf16.mxu1 %v4744_v11 }
 0x159   :  { %v5018_v18 = vpop.f32.mrb[0].mxu1  ;;  %v3751_v19 = vpop.f32.mrb[0].mxu0 }
 0x15a   :  { %v5020_v20 = vpop.f32.mrb[1].mxu1  ;;  %v250_v21 = vpop.f32.mrb[1].mxu0  ;;  %v256_v43 = vadd.f32 %v3751_v19, %v5022_v22 }
 0x15b   :  { %v251_v25 = vadd.f32 %v5022_v22, %v250_v21 }
 0x15d   :  { %v5024_v23 = vpop.f32.mrb[2].mxu1  ;;  %v3754_v62 = vpop.f32.mrb[2].mxu0 }
 0x15e   :  { %v5026_v24 = vpop.f32.mrb[3].mxu1  ;;  %v260_v63 = vpop.f32.mrb[3].mxu0 }
 0x15f   :  { %v261_v2 = vadd.f32 %v5022_v22, %v260_v63 }
 0x161   :  { %v372_v26 = vpop.f32.mrb[4].mxu1 }
 0x162   :  { %v376_v27 = vadd.f32 %v372_v26, %v251_v25  ;;  %v3771_v28 = vpop.f32.mrb[5].mxu1 }
 0x164   :  { %4322 = vtanh.f32 %v376_v27  ;;  %v3536_v30 = vmul.f32 -1.442695, %v376_v27 }
 0x166   :  { %4324 = vpow2.f32 %v3536_v30 }
 0x16e   :  { %v4323_v29 = vpop.eup %4322 }
 0x16f   :  { %386 = vrot.lane.b32.xlu0 %v4323_v29, %s4747_s26 }
 0x170   :  { %v4325_v31 = vpop.eup %4324 }
 0x171   :  { %v380_v32 = vadd.f32 1.0, %v4325_v31 }
 0x173   :  { %4326 = vrcp.f32 %v380_v32 }
 0x17d   :  { %v4327_v33 = vpop.eup %4326 }
 0x17e   :  { %v384_v36 = vmul.f32 0.0, %v4327_v33 }
 0x1e1   :  { %v387_v34 = vpop.permute.xlu0 %386 }
 0x1e2   :  { %v389_v35 = vmul.f32 %v4327_v33, %v387_v34 }
 0x1e4   :  { %391 = vrot.lane.b32.xlu0 %v389_v35, %s4748_s16  ;;  %v266_v35 = vadd.f32 %v3754_v62, %v5022_v22 }
 0x256   :  { %v392_v37 = vpop.permute.xlu0 %391 }
 0x257   :  { %v394_v38 = vadd.f32 %v392_v37, %v384_v36 }
 0x259   :  { %4328 = vtanh.f32 %v394_v38 }
 0x263   :  { %v4329_v39 = vpop.eup %4328 }
 0x264   :  { %397 = vrot.lane.b32.xlu1 %v4329_v39, %s4747_s26 }
 0x2d6   :  { %v398_v40 = vpop.permute.xlu1 %397 }
 0x2d7   :  { %v400_v41 = vmul.f32 %v4327_v33, %v398_v40 }
 0x2d9   :  { %402 = vrot.lane.b32.xlu1 %v400_v41, %s4748_s16 }
 0x34b   :  { %v403_v42 = vpop.permute.xlu1 %402 }
 0x34c   :  { %405 = vst.msk [vmem:[#allocation3] sm:$0xff] %vm302_vm5, %v403_v42  ;;  %3781 = vmatmul.mubr.msk.f32.vlgmr.msra.gmra.mrb[6].mxu1 %vm302_vm5, %v403_v42 }
 0x34d   :  { %4011 = vmatpush3.bf16.msra.mxu1 %v4968_v9  ;;  %3802 = vmatprep.mubr.msk.f32.mxu1 %vm4745_vm4, %v4746_v17 }
 0x34e   :  { %4012 = vmatprep.subr.bf16.mxu1 %v4744_v11 }
 0x351   :  { %4014 = vmatpush3.bf16.msra.mxu1 %v4998_v16 }
 0x352   :  { %4021 = vmatprep.subr.bf16.mxu1 %v4744_v11 }
 0x41f   :  { %v476_v44 = vpop.f32.mrb[6].mxu1 }
 0x420   :  { %v480_v45 = vadd.f32 %v476_v44, %v256_v43  ;;  %v3782_v46 = vpop.f32.mrb[7].mxu1 }
 0x422   :  { %4330 = vtanh.f32 %v480_v45  ;;  %v3538_v48 = vmul.f32 -1.442695, %v480_v45 }
 0x424   :  { %4332 = vpow2.f32 %v3538_v48 }
 0x42c   :  { %v4331_v47 = vpop.eup %4330 }
 0x42d   :  { %490 = vrot.lane.b32.xlu0 %v4331_v47, %s4747_s26 }
 0x42e   :  { %v4333_v49 = vpop.eup %4332 }
 0x42f   :  { %v484_v50 = vadd.f32 1.0, %v4333_v49 }
 0x431   :  { %4334 = vrcp.f32 %v484_v50 }
 0x43b   :  { %v4335_v51 = vpop.eup %4334 }
 0x43c   :  { %v488_v54 = vmul.f32 %v4335_v51, %v394_v38 }
 0x49f   :  { %v491_v52 = vpop.permute.xlu0 %490 }
 0x4a0   :  { %v493_v53 = vmul.f32 %v4335_v51, %v491_v52 }
 0x4a2   :  { %495 = vrot.lane.b32.xlu1 %v493_v53, %s4748_s16  ;;  %v271_v53 = vadd.f32 %v5022_v22, %v5020_v20 }
 0x514   :  { %v496_v55 = vpop.permute.xlu1 %495 }
 0x515   :  { %v498_v56 = vadd.f32 %v496_v55, %v488_v54 }
 0x517   :  { %4336 = vtanh.f32 %v498_v56 }
 0x521   :  { %v4337_v59 = vpop.eup %4336 }
 0x522   :  { %501 = vrot.lane.b32.xlu0 %v4337_v59, %s4747_s26 }
 0x594   :  { %v502_v60 = vpop.permute.xlu0 %501 }
 0x595   :  { %v504_v61 = vmul.f32 %v4335_v51, %v502_v60 }
 0x597   :  { %506 = vrot.lane.b32.xlu1 %v504_v61, %s4748_s16 }
 0x609   :  { %v507_v1 = vpop.permute.xlu1 %506 }
 0x60a   :  { %510 = vst.msk [vmem:[#allocation3 + $0x8] sm:$0xff] %vm302_vm5, %v507_v1  ;;  %3792 = vmatmul.mubr.msk.f32.vlgmr.msra.gmra.mrb[4].mxu0 %vm302_vm5, %v507_v1 }
 0x60b   :  { %4017 = vmatpush3.bf16.msra.mxu0 %v4968_v9  ;;  %3813 = vmatprep.mubr.msk.f32.mxu0 %vm4745_vm4, %v4746_v17 }
 0x60c   :  { %4018 = vmatprep.subr.bf16.mxu0 %v4744_v11 }
 0x60f   :  { %4020 = vmatpush3.bf16.msra.mxu0 %v4998_v16 }
 0x610   :  { %4027 = vmatprep.subr.bf16.mxu0 %v4744_v11 }
 0x6dd   :  { %v581_v4 = vpop.f32.mrb[4].mxu0 }
 0x6de   :  { %v585_v5 = vadd.f32 %v581_v4, %v261_v2  ;;  %v3793_v6 = vpop.f32.mrb[5].mxu0 }
 0x6e0   :  { %4338 = vtanh.f32 %v585_v5  ;;  %v3540_v14 = vmul.f32 -1.442695, %v585_v5 }
 0x6e2   :  { %4340 = vpow2.f32 %v3540_v14 }
 0x6ea   :  { %v4339_v13 = vpop.eup %4338 }
 0x6eb   :  { %595 = vrot.lane.b32.xlu0 %v4339_v13, %s4747_s26 }
 0x6ec   :  { %v4341_v19 = vpop.eup %4340 }
 0x6ed   :  { %v589_v21 = vadd.f32 1.0, %v4341_v19 }
 0x6ef   :  { %4342 = vrcp.f32 %v589_v21  ;;  %v276_v21 = vadd.f32 %v5018_v18, %v5022_v22 }
 0x6f9   :  { %v4343_v25 = vpop.eup %4342 }
 0x6fa   :  { %v593_v28 = vmul.f32 %v4343_v25, %v498_v56 }
 0x75d   :  { %v596_v26 = vpop.permute.xlu0 %595 }
 0x75e   :  { %v598_v27 = vmul.f32 %v4343_v25, %v596_v26 }
 0x760   :  { %600 = vrot.lane.b32.xlu1 %v598_v27, %s4748_s16 }
 0x7d2   :  { %v601_v29 = vpop.permute.xlu1 %600 }
 0x7d3   :  { %v603_v30 = vadd.f32 %v601_v29, %v593_v28 }
 0x7d5   :  { %4344 = vtanh.f32 %v603_v30 }
 0x7df   :  { %v4345_v31 = vpop.eup %4344 }
 0x7e0   :  { %606 = vrot.lane.b32.xlu0 %v4345_v31, %s4747_s26 }
 0x852   :  { %v607_v32 = vpop.permute.xlu0 %606 }
 0x853   :  { %v609_v33 = vmul.f32 %v4343_v25, %v607_v32 }
 0x855   :  { %611 = vrot.lane.b32.xlu1 %v609_v33, %s4748_s16 }
 0x8c7   :  { %v612_v34 = vpop.permute.xlu1 %611 }
 0x8c8   :  { %615 = vst.msk [vmem:[#allocation3 + $0x10] sm:$0xff] %vm302_vm5, %v612_v34  ;;  %3803 = vmatmul.mubr.msk.f32.vlgmr.msra.gmra.mrb[8].mxu1 %vm302_vm5, %v612_v34 }
 0x8c9   :  { %4023 = vmatpush3.bf16.msra.mxu1 %v4968_v9  ;;  %3824 = vmatprep.mubr.msk.f32.mxu1 %vm4745_vm4, %v4746_v17 }
 0x8ca   :  { %4024 = vmatprep.subr.bf16.mxu1 %v4744_v11 }
 0x8cd   :  { %4026 = vmatpush3.bf16.msra.mxu1 %v4998_v16 }
 0x8ce   :  { %4033 = vmatprep.subr.bf16.mxu1 %v4744_v11 }
 0x99b   :  { %v686_v36 = vpop.f32.mrb[8].mxu1 }
 0x99c   :  { %v690_v37 = vadd.f32 %v686_v36, %v266_v35  ;;  %v3804_v38 = vpop.f32.mrb[9].mxu1 }
 0x99e   :  { %4346 = vtanh.f32 %v690_v37  ;;  %v3542_v40 = vmul.f32 -1.442695, %v690_v37 }
 0x9a0   :  { %4348 = vpow2.f32 %v3542_v40 }
 0x9a8   :  { %v4347_v39 = vpop.eup %4346 }
 0x9a9   :  { %700 = vrot.lane.b32.xlu0 %v4347_v39, %s4747_s26  ;;  %v281_v39 = vadd.f32 %v5022_v22, %v5026_v24 }
 0x9aa   :  { %v4349_v41 = vpop.eup %4348 }
 0x9ab   :  { %v694_v42 = vadd.f32 1.0, %v4349_v41 }
 0x9ad   :  { %4350 = vrcp.f32 %v694_v42 }
 0x9b7   :  { %v4351_v43 = vpop.eup %4350 }
 0x9b8   :  { %v698_v46 = vmul.f32 %v4351_v43, %v603_v30 }
 0xa1b   :  { %v701_v44 = vpop.permute.xlu0 %700 }
 0xa1c   :  { %v703_v45 = vmul.f32 %v4351_v43, %v701_v44 }
 0xa1e   :  { %705 = vrot.lane.b32.xlu1 %v703_v45, %s4748_s16 }
 0xa90   :  { %v706_v47 = vpop.permute.xlu1 %705 }
 0xa91   :  { %v708_v48 = vadd.f32 %v706_v47, %v698_v46 }
 0xa93   :  { %4352 = vtanh.f32 %v708_v48 }
 0xa9d   :  { %v4353_v49 = vpop.eup %4352 }
 0xa9e   :  { %711 = vrot.lane.b32.xlu0 %v4353_v49, %s4747_s26 }
 0xb10   :  { %v712_v50 = vpop.permute.xlu0 %711 }
 0xb11   :  { %v714_v51 = vmul.f32 %v4351_v43, %v712_v50 }
 0xb13   :  { %716 = vrot.lane.b32.xlu1 %v714_v51, %s4748_s16 }
 0xb85   :  { %v717_v52 = vpop.permute.xlu1 %716 }
 0xb86   :  { %720 = vst.msk [vmem:[#allocation3 + $0x18] sm:$0xff] %vm302_vm5, %v717_v52  ;;  %3814 = vmatmul.mubr.msk.f32.vlgmr.msra.gmra.mrb[6].mxu0 %vm302_vm5, %v717_v52  ;;  %v1150_v52 = vld [vmem:[%s5597_s4 + $0x8] sm:$0xff] }
 0xb87   :  { %4029 = vmatpush3.bf16.msra.mxu0 %v4968_v9  ;;  %3835 = vmatprep.mubr.msk.f32.mxu0 %vm4745_vm4, %v4746_v17 }
 0xb88   :  { %4030 = vmatprep.subr.bf16.mxu0 %v4744_v11 }
 0xb8b   :  { %4032 = vmatpush3.bf16.msra.mxu0 %v4998_v16 }
 0xc59   :  { %v791_v54 = vpop.f32.mrb[6].mxu0 }
 0xc5a   :  { %v795_v55 = vadd.f32 %v791_v54, %v271_v53  ;;  %v3815_v56 = vpop.f32.mrb[7].mxu0  ;;  %v1152_v53 = vld [vmem:[%s5597_s4 + $0x18] sm:$0xff] }
 0xc5b   :  { %v4045_v54 = vpack.c.bf16 %v1152_v53, %v1150_v52  ;;  %v1158_v56 = vld [vmem:[%s5598_s5 + $0x8] sm:$0xff] }
 0xc5c   :  { %4354 = vtanh.f32 %v795_v55  ;;  %v3544_v60 = vmul.f32 -1.442695, %v795_v55 }
 0xc5e   :  { %4356 = vpow2.f32 %v3544_v60 }
 0xc66   :  { %v4355_v59 = vpop.eup %4354 }
 0xc67   :  { %805 = vrot.lane.b32.xlu0 %v4355_v59, %s4747_s26  ;;  %v1160_v59 = vld [vmem:[%s5598_s5 + $0x18] sm:$0x3] }
 0xc68   :  { %v4357_v61 = vpop.eup %4356  ;;  %v4039_v60 = vpack.c.bf16 %v1160_v59, %v1158_v56 }
 0xc69   :  { %v799_v62 = vadd.f32 1.0, %v4357_v61  ;;  %v1157_v61 = vld [vmem:[%s5598_s5] sm:$0xff] }
 0xc6a   :  { %4041 = vmatprep.subr.msk.bf16.mxu0 %vm4941_vm3, %v4039_v60 }
 0xc6b   :  { %4358 = vrcp.f32 %v799_v62  ;;  %v1159_v62 = vld [vmem:[%s5598_s5 + $0x10] sm:$0x3] }
 0xc75   :  { %v4359_v63 = vpop.eup %4358 }
 0xc76   :  { %v803_v4 = vmul.f32 %v4359_v63, %v708_v48 }
 0xcd9   :  { %v806_v1 = vpop.permute.xlu0 %805 }
 0xcda   :  { %v808_v2 = vmul.f32 %v4359_v63, %v806_v1 }
 0xcdc   :  { %810 = vrot.lane.b32.xlu1 %v808_v2, %s4748_s16 }
 0xd4e   :  { %v811_v5 = vpop.permute.xlu1 %810 }
 0xd4f   :  { %v813_v20 = vadd.f32 %v811_v5, %v803_v4  ;;  %v1141_v5 = vld [vmem:[#allocation3] sm:$0xff] }
 0xd51   :  { %4360 = vtanh.f32 %v813_v20 }
 0xd5b   :  { %v4361_v6 = vpop.eup %4360 }
 0xd5c   :  { %816 = vrot.lane.b32.xlu0 %v4361_v6, %s4747_s26  ;;  %v1143_v6 = vld [vmem:[#allocation3 + $0x10] sm:$0xff] }
 0xdce   :  { %v817_v13 = vpop.permute.xlu0 %816 }
 0xdcf   :  { %v819_v14 = vmul.f32 %v4359_v63, %v817_v13  ;;  %v4042_v63 = vpack.c.bf16 %v1159_v62, %v1157_v61  ;;  %v1144_v13 = vld [vmem:[#allocation3 + $0x18] sm:$0xff] }
 0xdd1   :  { %821 = vrot.lane.b32.xlu1 %v819_v14, %s4748_s16 }
 0xe43   :  { %v822_v19 = vpop.permute.xlu1 %821 }
 0xe44   :  { %825 = vst.msk [vmem:[#allocation3 + $0x20] sm:$0xff] %vm302_vm5, %v822_v19  ;;  %3825 = vmatmul.mubr.msk.f32.vlgmr.msra.gmra.mrb[10].mxu1 %vm302_vm5, %v822_v19 }
 0xe45   :  { %4035 = vmatpush3.bf16.msra.mxu1 %v4968_v9  ;;  %3846 = vmatprep.mubr.msk.f32.mxu1 %vm4745_vm4, %v4746_v17 }
 0xe46   :  { %4036 = vmatprep.subr.bf16.mxu1 %v4744_v11 }
 0xe49   :  { %4038 = vmatpush3.bf16.msra.mxu1 %v4998_v16 }
 0xe4a   :  { %4046 = vmatprep.subr.bf16.mxu1 %v4045_v54 }
 0xe4b   :  { %v1145_v14 = vld [vmem:[#allocation3 + $0x20] sm:$0xff] }
 0xf17   :  { %v896_v25 = vpop.f32.mrb[10].mxu1 }
 0xf18   :  { %v900_v26 = vadd.f32 %v896_v25, %v276_v21  ;;  %v3826_v27 = vpop.f32.mrb[11].mxu1 }
 0xf1a   :  { %4362 = vtanh.f32 %v900_v26  ;;  %v3546_v29 = vmul.f32 -1.442695, %v900_v26 }
 0xf1c   :  { %4364 = vpow2.f32 %v3546_v29 }
 0xf24   :  { %v4363_v28 = vpop.eup %4362 }
 0xf25   :  { %910 = vrot.lane.b32.xlu0 %v4363_v28, %s4747_s26 }
 0xf26   :  { %v4365_v9 = vpop.eup %4364 }
 0xf27   :  { %v904_v30 = vadd.f32 1.0, %v4365_v9 }
 0xf29   :  { %4366 = vrcp.f32 %v904_v30 }
 0xf33   :  { %v4367_v31 = vpop.eup %4366 }
 0xf34   :  { %v908_v16 = vmul.f32 %v4367_v31, %v813_v20  ;;  %v1142_v20 = vld [vmem:[#allocation3 + $0x8] sm:$0xff] }
 0xf97   :  { %v911_v32 = vpop.permute.xlu0 %910 }
 0xf98   :  { %v913_v33 = vmul.f32 %v4367_v31, %v911_v32 }
 0xf9a   :  { %915 = vrot.lane.b32.xlu1 %v913_v33, %s4748_s16 }
0x100c   :  { %v916_v34 = vpop.permute.xlu1 %915 }
0x100d   :  { %v918_v18 = vadd.f32 %v916_v34, %v908_v16 }
0x100f   :  { %4368 = vtanh.f32 %v918_v18 }
0x1019   :  { %v4369_v35 = vpop.eup %4368 }
0x101a   :  { %921 = vrot.lane.b32.xlu0 %v4369_v35, %s4747_s26 }
0x108c   :  { %v922_v36 = vpop.permute.xlu0 %921 }
0x108d   :  { %v924_v37 = vmul.f32 %v4367_v31, %v922_v36  ;;  %v286_v36 = vadd.f32 %v5024_v23, %v5022_v22 }
0x108f   :  { %926 = vrot.lane.b32.xlu1 %v924_v37, %s4748_s16 }
0x1101   :  { %v927_v38 = vpop.permute.xlu1 %926 }
0x1102   :  { %930 = vst.msk [vmem:[#allocation3 + $0x28] sm:$0xff] %vm302_vm5, %v927_v38  ;;  %3836 = vmatmul.mubr.msk.f32.vlgmr.msra.gmra.mrb[8].mxu0 %vm302_vm5, %v927_v38 }
0x1103   :  { %1231 = vmatprep.mubr.f32.mxu0 %v4746_v17  ;;  %4044 = vmatpush1.bf16.msk.msra.mxu0 %vm4941_vm3, %v4042_v63 }
0x1106   :  { %3553 = vmatmul.mubr.msk.f32.vlgmr.msra.gmra.mrb[10].mxu0 %vm155_vm1, %v4955_v7  ;;  %v1154_v7 = vld [vmem:[%s5597_s4 + $0x28] sm:$0xff] }
0x1107   :  { %1237 = vmatprep.mubr.f32.mxu0 %v4746_v17 }
0x1109   :  { %v1146_v19 = vld [vmem:[#allocation3 + $0x28] sm:$0xff] }
0x110a   :  { %3554 = vmatmul.mubr.msk.f32.gmra.mrb[12].mxu0 %vm155_vm1, %v4975_v10 }
0x110b   :  { %1243 = vmatprep.mubr.f32.mxu0 %v4746_v17 }
0x110e   :  { %3555 = vmatmul.mubr.msk.f32.gmra.mrb[14].mxu0 %vm155_vm1, %v5047_v57  ;;  %v1155_v57 = vld [vmem:[%s5597_s4 + $0x30] sm:$0xff] }
0x110f   :  { %1249 = vmatprep.mubr.f32.mxu0 %v4746_v17 }
0x1112   :  { %3556 = vmatmul.mubr.msk.f32.gmra.mrb[16].mxu0 %vm155_vm1, %v5052_v58 }
0x1113   :  { %1255 = vmatprep.mubr.f32.mxu0 %v4746_v17 }
0x1116   :  { %3557 = vmatmul.mubr.msk.f32.gmra.mrb[18].mxu0 %vm155_vm1, %v4948_v3  ;;  %v1151_v3 = vld [vmem:[%s5597_s4 + $0x10] sm:$0xff] }
0x1117   :  { %1261 = vmatprep.mubr.f32.mxu0 %v4746_v17  ;;  %v4047_v10 = vpack.c.bf16 %v1151_v3, %v1149_v0 }
0x111a   :  { %3558 = vmatmul.mubr.msk.f32.gmra.mrb[20].mxu0 %vm155_vm1, %v4966_v8  ;;  %v1156_v8 = vld [vmem:[%s5597_s4 + $0x38] sm:$0xff] }
0x111b   :  { %1267 = vmatprep.mubr.f32.mxu0 %v4746_v17 }
0x111e   :  { %3559 = vmatmul.mubr.msk.f32.gmra.mrb[22].mxu0 %vm155_vm1, %v4981_v12  ;;  %v4049_v12 = vpack.c.bf16 %v1156_v8, %v1154_v7 }
0x111f   :  { %1273 = vmatprep.mubr.f32.mxu0 %v4746_v17 }
0x1122   :  { %3560 = vmatmul.mubr.msk.f32.gmra.mrb[24].mxu0 %vm155_vm1, %v4996_v15  ;;  %v1153_v15 = vld [vmem:[%s5597_s4 + $0x20] sm:$0xff] }
0x1123   :  { %1555 = vmatprep.mubr.f32.mxu0 %v4746_v17  ;;  %v4051_v4 = vpack.c.bf16 %v1155_v57, %v1153_v15 }
0x11d5   :  { %v1001_v40 = vpop.f32.mrb[8].mxu0 }
0x11d6   :  { %v1005_v41 = vadd.f32 %v1001_v40, %v281_v39  ;;  %v3837_v42 = vpop.f32.mrb[9].mxu0 }
0x11d8   :  { %4370 = vtanh.f32 %v1005_v41  ;;  %v3548_v44 = vmul.f32 -1.442695, %v1005_v41 }
0x11d9   :  { %v1233_v25 = vpop.f32.mrb[10].mxu0 }
0x11da   :  { %4372 = vpow2.f32 %v3548_v44  ;;  %v1235_v26 = vpop.f32.mrb[11].mxu0 }
0x11dd   :  { %v1239_v27 = vpop.f32.mrb[12].mxu0 }
0x11de   :  { %v1241_v28 = vpop.f32.mrb[13].mxu0 }
0x11e1   :  { %v1245_v29 = vpop.f32.mrb[14].mxu0 }
0x11e2   :  { %v4371_v43 = vpop.eup %4370  ;;  %v1247_v9 = vpop.f32.mrb[15].mxu0 }
0x11e3   :  { %1015 = vrot.lane.b32.xlu0 %v4371_v43, %s4747_s26 }
0x11e4   :  { %v4373_v45 = vpop.eup %4372 }
0x11e5   :  { %v1009_v46 = vadd.f32 1.0, %v4373_v45  ;;  %v1251_v30 = vpop.f32.mrb[16].mxu0 }
0x11e6   :  { %v1253_v31 = vpop.f32.mrb[17].mxu0 }
0x11e7   :  { %4374 = vrcp.f32 %v1009_v46 }
0x11e9   :  { %v1257_v32 = vpop.f32.mrb[18].mxu0 }
0x11ea   :  { %v1259_v33 = vpop.f32.mrb[19].mxu0 }
0x11ed   :  { %v1263_v16 = vpop.f32.mrb[20].mxu0 }
0x11ee   :  { %v1265_v34 = vpop.f32.mrb[21].mxu0 }
0x11f1   :  { %v4375_v47 = vpop.eup %4374 }
0x11f2   :  { %v1013_v50 = vmul.f32 %v4375_v47, %v918_v18  ;;  %v1269_v18 = vpop.f32.mrb[22].mxu0 }
0x11f3   :  { %v1271_v35 = vpop.f32.mrb[23].mxu0 }
0x1255   :  { %v1016_v48 = vpop.permute.xlu0 %1015 }
0x1256   :  { %v1018_v49 = vmul.f32 %v4375_v47, %v1016_v48 }
0x1258   :  { %1020 = vrot.lane.b32.xlu1 %v1018_v49, %s4748_s16 }
0x12ca   :  { %v1021_v51 = vpop.permute.xlu1 %1020 }
0x12cb   :  { %v5121_v24 = vadd.f32 %v1021_v51, %v1013_v50 }
0x12cd   :  { %4376 = vtanh.f32 %v5121_v24 }
0x12d7   :  { %v4377_v55 = vpop.eup %4376 }
0x12d8   :  { %1026 = vrot.lane.b32.xlu0 %v4377_v55, %s4747_s26 }
0x134a   :  { %v1027_v1 = vpop.permute.xlu0 %1026 }
0x134b   :  { %v1029_v2 = vmul.f32 %v4375_v47, %v1027_v1 }
0x134d   :  { %1031 = vrot.lane.b32.xlu1 %v1029_v2, %s4748_s16 }
0x13bf   :  { %v1032_v58 = vpop.permute.xlu1 %1031 }
0x13c0   :  { %1035 = vst.msk [vmem:[#allocation3 + $0x30] sm:$0xff] %vm302_vm5, %v1032_v58  ;;  %3847 = vmatmul.mubr.msk.f32.vlgmr.msra.gmra.mrb[12].mxu1 %vm302_vm5, %v1032_v58 }
0x13c1   :  { %4048 = vmatpush1.bf16.msra.mxu1 %v4047_v10  ;;  %1368 = vmatprep.mubr.f32.mxu1 %v4746_v17 }
0x13c2   :  { %4050 = vmatprep.subr.bf16.mxu1 %v4049_v12 }
0x13c5   :  { %4052 = vmatpush1.bf16.msra.mxu1 %v4051_v4 }
0x13c7   :  { %v1147_v21 = vld [vmem:[#allocation3 + $0x30] sm:$0xff] }
0x13c8   :  { %3561 = vmatmul.mubr.msk.f32.vlgmr.msra.gmra.mrb[14].mxu1 %vm302_vm5, %v1141_v5 }
0x13c9   :  { %1374 = vmatprep.mubr.f32.mxu1 %v4746_v17 }
0x13cc   :  { %3562 = vmatmul.mubr.msk.f32.gmra.mrb[16].mxu1 %vm302_vm5, %v1142_v20 }
0x13cd   :  { %1380 = vmatprep.mubr.f32.mxu1 %v4746_v17 }
0x13d0   :  { %3563 = vmatmul.mubr.msk.f32.gmra.mrb[18].mxu1 %vm302_vm5, %v1143_v6  ;;  %v1467_v6 = vld [vmem:[#allocation12 + $0x8] sm:$0xff] }
0x13d1   :  { %1386 = vmatprep.mubr.f32.mxu1 %v4746_v17 }
0x13d4   :  { %3564 = vmatmul.mubr.msk.f32.gmra.mrb[20].mxu1 %vm302_vm5, %v1144_v13  ;;  %v1469_v13 = vld [vmem:[#allocation12 + $0x18] sm:$0xff] }
0x13d5   :  { %1392 = vmatprep.mubr.f32.mxu1 %v4746_v17 }
0x13d8   :  { %3565 = vmatmul.mubr.msk.f32.gmra.mrb[22].mxu1 %vm302_vm5, %v1145_v14  ;;  %v1466_v14 = vld [vmem:[#allocation12] sm:$0xff] }
0x13d9   :  { %1398 = vmatprep.mubr.f32.mxu1 %v4746_v17 }
0x13dc   :  { %3566 = vmatmul.mubr.msk.f32.gmra.mrb[24].mxu1 %vm302_vm5, %v1146_v19  ;;  %v5240_v19 = vpack.c.bf16 %v1469_v13, %v1467_v6 }
0x13dd   :  { %1404 = vmatprep.mubr.f32.mxu1 %v4746_v17 }
0x13de   :  { %4054 = vmatprep.subr.bf16.mxu0 %v5240_v19 }
0x13e0   :  { %3567 = vmatmul.mubr.msk.f32.gmra.mrb[26].mxu1 %vm302_vm5, %v1147_v21  ;;  %v1468_v21 = vld [vmem:[#allocation12 + $0x10] sm:$0xff] }
0x13e1   :  { %1410 = vmatprep.mubr.f32.mxu1 %v4746_v17 }
0x1493   :  { %v1106_v37 = vpop.f32.mrb[12].mxu1 }
0x1494   :  { %v1110_v38 = vadd.f32 %v1106_v37, %v286_v36  ;;  %v3848_v39 = vpop.f32.mrb[13].mxu1 }
0x1495   :  { %v1480_v39 = vld [vmem:[#allocation12 + $0x70] sm:$0xff] }
0x1496   :  { %4378 = vtanh.f32 %v1110_v38  ;;  %v3550_v8 = vmul.f32 -1.442695, %v1110_v38  ;;  %v1478_v38 = vld [vmem:[#allocation12 + $0x60] sm:$0xff] }
0x1498   :  { %4380 = vpow2.f32 %v3550_v8 }
0x149b   :  { %v1370_v40 = vpop.f32.mrb[14].mxu1 }
0x149c   :  { %v5209_v41 = vadd.f32 %v1370_v40, %v1233_v25  ;;  %v1372_v42 = vpop.f32.mrb[15].mxu1  ;;  %v1471_v25 = vld [vmem:[#allocation12 + $0x28] sm:$0xff]  ;;  %v5261_v40 = vpack.c.bf16 %v1480_v39, %v1478_v38 }
0x149d   :  { %v5211_v43 = vadd.f32 %v1372_v42, %v1235_v26  ;;  %v1473_v26 = vld [vmem:[#allocation12 + $0x38] sm:$0xff] }
0x149f   :  { %v1376_v44 = vpop.f32.mrb[16].mxu1 }
0x14a0   :  { %v4379_v45 = vpop.eup %4378  ;;  %v5213_v46 = vadd.f32 %v1376_v44, %v1239_v27  ;;  %v1378_v47 = vpop.f32.mrb[17].mxu1  ;;  %v5242_v27 = vpack.c.bf16 %v1468_v21, %v1466_v14 }
0x14a1   :  { %v5215_v48 = vadd.f32 %v1378_v47, %v1241_v28  ;;  %1120 = vrot.lane.b32.xlu0 %v4379_v45, %s4747_s26  ;;  %v5244_v28 = vpack.c.bf16 %v1473_v26, %v1471_v25  ;;  %v5268_v44 = vpop.f32.mrb[24].mxu0 }
0x14a2   :  { %v4381_v10 = vpop.eup %4380  ;;  %4056 = vmatpush1.bf16.msra.mxu0 %v5242_v27  ;;  %v5270_v45 = vpop.f32.mrb[25].mxu0 }
0x14a3   :  { %v1382_v22 = vpop.f32.mrb[18].mxu1  ;;  %v1114_v12 = vadd.f32 1.0, %v4381_v10  ;;  %4058 = vmatprep.subr.bf16.mxu0 %v5244_v28 }
0x14a4   :  { %v5218_v23 = vadd.f32 %v1382_v22, %v1245_v29  ;;  %v1384_v49 = vpop.f32.mrb[19].mxu1  ;;  %v1470_v29 = vld [vmem:[#allocation12 + $0x20] sm:$0xff] }
0x14a5   :  { %v5220_v50 = vadd.f32 %v1384_v49, %v1247_v9  ;;  %4382 = vrcp.f32 %v1114_v12  ;;  %v1472_v9 = vld [vmem:[#allocation12 + $0x30] sm:$0xff] }
0x14a7   :  { %v1388_v51 = vpop.f32.mrb[20].mxu1 }
0x14a8   :  { %v5222_v52 = vadd.f32 %v1388_v51, %v1251_v30  ;;  %v1390_v53 = vpop.f32.mrb[21].mxu1  ;;  %v1475_v30 = vld [vmem:[#allocation12 + $0x48] sm:$0xff] }
0x14a9   :  { %v5224_v54 = vadd.f32 %v1390_v53, %v1253_v31  ;;  %v5248_v31 = vpack.c.bf16 %v1472_v9, %v1470_v29  ;;  %v1419_v53 = vlaneseq }
0x14ab   :  { %v1394_v55 = vpop.f32.mrb[22].mxu1  ;;  %4060 = vmatpush1.bf16.msra.mxu0 %v5248_v31 }
0x14ac   :  { %v5226_v56 = vadd.f32 %v1394_v55, %v1257_v32  ;;  %v1396_v59 = vpop.f32.mrb[23].mxu1  ;;  %v1420_v55 = vshrl.u32 %v1419_v53, 7 }
0x14ad   :  { %v5228_v60 = vadd.f32 %v1396_v59, %v1259_v33  ;;  %v1474_v33 = vld [vmem:[#allocation12 + $0x40] sm:$0xff] }
0x14ae   :  { %v1421_v59 = vsub.s32 0, %v1420_v55 }
0x14af   :  { %v1400_v61 = vpop.f32.mrb[24].mxu1  ;;  %v4383_v15 = vpop.eup %4382 }
0x14b0   :  { %v5230_v62 = vadd.f32 %v1400_v61, %v1263_v16  ;;  %v1402_v63 = vpop.f32.mrb[25].mxu1  ;;  %v1118_v4 = vmul.f32 %v4383_v15, %v5121_v24  ;;  %v1477_v24 = vld [vmem:[#allocation12 + $0x58] sm:$0xff]  ;;  %v1476_v16 = vld [vmem:[#allocation12 + $0x50] sm:$0xff]  ;;  %v1417_v61 = vld [vmem:[%s5599_s6] sm:$0x3]  ;;  %s4749_s6 = smov 96  }
0x14b1   :  { %v5232_v1 = vadd.f32 %v1402_v63, %v1265_v34  ;;  %v5251_v32 = vpack.c.bf16 %v1477_v24, %v1475_v30  ;;  %v1479_v34 = vld [vmem:[#allocation12 + $0x68] sm:$0xff]  ;;  %v1425_v63 = vsub.s32 1, %v1420_v55 }
0x14b3   :  { %v1406_v2 = vpop.f32.mrb[26].mxu1  ;;  %4062 = vmatprep.subr.bf16.mxu0 %v5251_v32 }
0x14b4   :  { %v5234_v0 = vadd.f32 %v1406_v2, %v1269_v18  ;;  %v1408_v3 = vpop.f32.mrb[27].mxu1  ;;  %v1481_v18 = vld [vmem:[#allocation12 + $0x78] sm:$0xff]  ;;  %v5290_v2 = vrot.slane %v1417_v61, %v1421_v59 }
0x14b5   :  { %v5236_v7 = vadd.f32 %v1408_v3, %v1271_v35  ;;  %v5254_v35 = vpack.c.bf16 %v1476_v16, %v1474_v33  ;;  %v5257_v37 = vpack.c.bf16 %v1481_v18, %v1479_v34  ;;  %v5292_v3 = vrot.slane %v1417_v61, %v1425_v63 }
0x14b6   :  { %v1429_v8 = vadd.f32 %v5290_v2, %v5209_v41  ;;  %v1431_v34 = vadd.f32 %v5290_v2, %v5213_v46 }
0x14b7   :  { %4064 = vmatpush1.bf16.msra.mxu0 %v5254_v35  ;;  %v1430_v12 = vadd.f32 %v5292_v3, %v5211_v43 }
0x14b8   :  { %4066 = vmatprep.subr.bf16.mxu0 %v5257_v37 }
0x14bb   :  { %4068 = vmatpush1.bf16.msra.mxu0 %v5261_v40 }
0x14bc   :  { %4070 = vmatprep.subr.bf16.mxu0 %v5240_v19 }
0x1513   :  { %v1121_v57 = vpop.permute.xlu0 %1120 }
0x1514   :  { %v1123_v58 = vmul.f32 %v4383_v15, %v1121_v57 }
0x1516   :  { %1125 = vrot.lane.b32.xlu1 %v1123_v58, %s4748_s16 }
0x1588   :  { %v1126_v5 = vpop.permute.xlu1 %1125 }
0x1589   :  { %v1128_v20 = vadd.f32 %v1126_v5, %v1118_v4 }
0x158b   :  { %4384 = vtanh.f32 %v1128_v20  ;;  %v1465_v42 = vsel %vm302_vm5, 0.0, %v1128_v20 }
0x1595   :  { %v4385_v36 = vpop.eup %4384 }
0x1596   :  { %1131 = vrot.lane.b32.xlu0 %v4385_v36, %s4747_s26  ;;  %v1432_v36 = vadd.f32 %v5292_v3, %v5215_v48 }
0x159a   :  { %1578 = vrot.lane.b32.xlu0 %v1465_v42, %s4747_s26 }
0x1608   :  { %v1132_v47 = vpop.permute.xlu0 %1131 }
0x1609   :  { %v5272_v22 = vmul.f32 %v4383_v15, %v1132_v47 }
0x160b   :  { %1461 = vrot.lane.b32.xlu1 %v5272_v22, %s4747_s26 }
0x160c   :  { %v1579_v25 = vpop.permute.xlu0 %1578 }
0x167d   :  { %v1462_v49 = vpop.permute.xlu1 %1461 }
0x167e   :  { %v1464_v51 = vsel %vm302_vm5, 0.0, %v1462_v49 }
0x167f   :  { %3569 = vmatmul.mubr.msk.f32.vlgmr.msra.gmra.mrb[26].mxu0 %vm1487_vm6, %v1464_v51 }
0x1680   :  { %4072 = vmatpush1.bf16.msra.mxu0 %v5242_v27  ;;  %1666 = vmatprep.mubr.f32.mxu0 %v4746_v17 }
0x1681   :  { %4074 = vmatprep.subr.bf16.mxu0 %v5244_v28 }
0x1684   :  { %4076 = vmatpush1.bf16.msra.mxu0 %v5248_v31 }
0x1685   :  { %4078 = vmatprep.subr.bf16.mxu0 %v5251_v32 }
0x1688   :  { %4080 = vmatpush1.bf16.msra.mxu0 %v5254_v35 }
0x1689   :  { %4082 = vmatprep.subr.bf16.mxu0 %v5257_v37 }
0x168c   :  { %4084 = vmatpush1.bf16.msra.mxu0 %v5261_v40 }
0x168d   :  { %4086 = vmatprep.subr.bf16.mxu0 %v5240_v19 }
0x1752   :  { %v1557_v10 = vpop.f32.mrb[26].mxu0 }
0x1753   :  { %v1562_v15 = vadd.f32 %v1557_v10, %v1429_v8  ;;  %v1559_v57 = vpop.f32.mrb[27].mxu0 }
0x1754   :  { %v1563_v58 = vadd.f32 %v1559_v57, %v1430_v12 }
0x1755   :  { %v3570_v4 = vmul.f32 -1.442695, %v1562_v15 }
0x1756   :  { %v3571_v21 = vmul.f32 -1.442695, %v1563_v58 }
0x1757   :  { %4386 = vpow2.f32 %v3570_v4  ;;  %v1433_v4 = vadd.f32 %v5290_v2, %v5218_v23 }
0x1758   :  { %4388 = vtanh.f32 %v1563_v58 }
0x1761   :  { %v4387_v5 = vpop.eup %4386 }
0x1762   :  { %v1570_v20 = vadd.f32 1.0, %v4387_v5  ;;  %v4389_v6 = vpop.eup %4388 }
0x1764   :  { %4390 = vrcp.f32 %v1570_v20  ;;  %v1434_v20 = vadd.f32 %v5292_v3, %v5220_v50 }
0x1765   :  { %4392 = vpow2.f32 %v3571_v21 }
0x176e   :  { %v4391_v13 = vpop.eup %4390 }
0x176f   :  { %v1582_v14 = vmul.f32 %v4391_v13, %v4389_v6  ;;  %v4393_v41 = vpop.eup %4392  ;;  %v1581_v43 = vmul.f32 %v4391_v13, %v1579_v25 }
0x1770   :  { %v1571_v26 = vadd.f32 1.0, %v4393_v41 }
0x1771   :  { %1584 = vrot.lane.b32.xlu1 %v1582_v14, %s4747_s26 }
0x1772   :  { %4394 = vrcp.f32 %v1571_v26 }
0x177c   :  { %v4395_v30 = vpop.eup %4394 }
0x17e3   :  { %v1585_v29 = vpop.permute.xlu1 %1584 }
0x17e4   :  { %v1587_v9 = vadd.f32 %v1585_v29, %v1581_v43 }
0x17e6   :  { %4396 = vtanh.f32 %v1587_v9 }
0x17f0   :  { %v4397_v24 = vpop.eup %4396 }
0x17f1   :  { %v1589_v33 = vmul.f32 %v4397_v24, %v4395_v30 }
0x17f3   :  { %1591 = vrot.lane.b32.xlu0 %v1589_v33, %s4747_s26 }
0x1865   :  { %v1592_v16 = vpop.permute.xlu0 %1591 }
0x1866   :  { %1594 = vst.msk [vmem:[#allocation5] sm:$0xff] %vm1487_vm6, %v1592_v16  ;;  %3572 = vmatmul.mubr.msk.f32.vlgmr.msra.gmra.mrb[28].mxu0 %vm1487_vm6, %v1592_v16 }
0x1867   :  { %4088 = vmatpush1.bf16.msra.mxu0 %v5242_v27  ;;  %1774 = vmatprep.mubr.f32.mxu0 %v4746_v17 }
0x1868   :  { %4090 = vmatprep.subr.bf16.mxu0 %v5244_v28 }
0x186b   :  { %4092 = vmatpush1.bf16.msra.mxu0 %v5248_v31 }
0x186c   :  { %4094 = vmatprep.subr.bf16.mxu0 %v5251_v32 }
0x186f   :  { %4096 = vmatpush1.bf16.msra.mxu0 %v5254_v35 }
0x1870   :  { %4098 = vmatprep.subr.bf16.mxu0 %v5257_v37 }
0x1873   :  { %4100 = vmatpush1.bf16.msra.mxu0 %v5261_v40 }
0x1874   :  { %4102 = vmatprep.subr.bf16.mxu0 %v5240_v19 }
0x1939   :  { %v1668_v18 = vpop.f32.mrb[28].mxu0 }
0x193a   :  { %v1673_v38 = vadd.f32 %v1668_v18, %v1431_v34  ;;  %v1670_v39 = vpop.f32.mrb[29].mxu0 }
0x193b   :  { %v1674_v42 = vadd.f32 %v1670_v39, %v1432_v36 }
0x193c   :  { %v3573_v47 = vmul.f32 -1.442695, %v1673_v38  ;;  %v1435_v38 = vadd.f32 %v5290_v2, %v5222_v52 }
0x193d   :  { %v3574_v61 = vmul.f32 -1.442695, %v1674_v42 }
0x193e   :  { %4398 = vpow2.f32 %v3573_v47 }
0x193f   :  { %4400 = vtanh.f32 %v1674_v42  ;;  %v1436_v42 = vadd.f32 %v5292_v3, %v5224_v54 }
0x1948   :  { %v4399_v49 = vpop.eup %4398 }
0x1949   :  { %v1681_v51 = vadd.f32 1.0, %v4399_v49  ;;  %v4401_v53 = vpop.eup %4400 }
0x194b   :  { %4402 = vrcp.f32 %v1681_v51 }
0x194c   :  { %4404 = vpow2.f32 %v3574_v61 }
0x1955   :  { %v4403_v55 = vpop.eup %4402 }
0x1956   :  { %v1689_v59 = vmul.f32 %v4403_v55, %v4401_v53  ;;  %v4405_v46 = vpop.eup %4404  ;;  %v1688_v8 = vmul.f32 %v4403_v55, %v1587_v9 }
0x1957   :  { %v1682_v63 = vadd.f32 1.0, %v4405_v46 }
0x1958   :  { %1691 = vrot.lane.b32.xlu1 %v1689_v59, %s4747_s26 }
0x1959   :  { %4406 = vrcp.f32 %v1682_v63 }
0x1963   :  { %v4407_v12 = vpop.eup %4406 }
0x19ca   :  { %v1692_v48 = vpop.permute.xlu1 %1691 }
0x19cb   :  { %v1694_v10 = vadd.f32 %v1692_v48, %v1688_v8 }
0x19cd   :  { %4408 = vtanh.f32 %v1694_v10 }
0x19d7   :  { %v4409_v15 = vpop.eup %4408 }
0x19d8   :  { %v1696_v57 = vmul.f32 %v4409_v15, %v4407_v12 }
0x19da   :  { %1698 = vrot.lane.b32.xlu0 %v1696_v57, %s4747_s26 }
0x1a4c   :  { %v1699_v58 = vpop.permute.xlu0 %1698 }
0x1a4d   :  { %1702 = vst.msk [vmem:[#allocation5 + $0x8] sm:$0xff] %vm1487_vm6, %v1699_v58  ;;  %3575 = vmatmul.mubr.msk.f32.vlgmr.msra.gmra.mrb[30].mxu0 %vm1487_vm6, %v1699_v58 }
0x1a4e   :  { %4104 = vmatpush1.bf16.msra.mxu0 %v5242_v27  ;;  %1882 = vmatprep.mubr.f32.mxu0 %v4746_v17 }
0x1a4f   :  { %4106 = vmatprep.subr.bf16.mxu0 %v5244_v28 }
0x1a52   :  { %4108 = vmatpush1.bf16.msra.mxu0 %v5248_v31 }
0x1a53   :  { %4110 = vmatprep.subr.bf16.mxu0 %v5251_v32 }
0x1a56   :  { %4112 = vmatpush1.bf16.msra.mxu0 %v5254_v35 }
0x1a57   :  { %4114 = vmatprep.subr.bf16.mxu0 %v5257_v37 }
0x1a5a   :  { %4116 = vmatpush1.bf16.msra.mxu0 %v5261_v40 }
0x1a5b   :  { %4118 = vmatprep.subr.bf16.mxu0 %v5240_v19 }
0x1b20   :  { %v1776_v5 = vpop.f32.mrb[30].mxu0 }
0x1b21   :  { %v1781_v6 = vadd.f32 %v1776_v5, %v1433_v4  ;;  %v1778_v13 = vpop.f32.mrb[31].mxu0  ;;  %v1437_v5 = vadd.f32 %v5290_v2, %v5226_v56 }
0x1b22   :  { %v1782_v14 = vadd.f32 %v1778_v13, %v1434_v20 }
0x1b23   :  { %v3576_v21 = vmul.f32 -1.442695, %v1781_v6  ;;  %v1438_v6 = vadd.f32 %v5292_v3, %v5228_v60 }
0x1b24   :  { %v3577_v9 = vmul.f32 -1.442695, %v1782_v14 }
0x1b25   :  { %4410 = vpow2.f32 %v3576_v21 }
0x1b26   :  { %4412 = vtanh.f32 %v1782_v14 }
0x1b2f   :  { %v4411_v41 = vpop.eup %4410 }
0x1b30   :  { %v1789_v25 = vadd.f32 1.0, %v4411_v41  ;;  %v4413_v26 = vpop.eup %4412 }
0x1b32   :  { %4414 = vrcp.f32 %v1789_v25 }
0x1b33   :  { %4416 = vpow2.f32 %v3577_v9 }
0x1b3c   :  { %v4415_v43 = vpop.eup %4414 }
0x1b3d   :  { %v1797_v29 = vmul.f32 %v4415_v43, %v4413_v26  ;;  %v4417_v23 = vpop.eup %4416  ;;  %v1796_v24 = vmul.f32 %v4415_v43, %v1694_v10 }
0x1b3e   :  { %v1790_v30 = vadd.f32 1.0, %v4417_v23 }
0x1b3f   :  { %1799 = vrot.lane.b32.xlu1 %v1797_v29, %s4747_s26 }
0x1b40   :  { %4418 = vrcp.f32 %v1790_v30 }
0x1b4a   :  { %v4419_v16 = vpop.eup %4418 }
0x1bb1   :  { %v1800_v50 = vpop.permute.xlu1 %1799 }
0x1bb2   :  { %v1802_v33 = vadd.f32 %v1800_v50, %v1796_v24 }
0x1bb4   :  { %4420 = vtanh.f32 %v1802_v33 }
0x1bbe   :  { %v4421_v34 = vpop.eup %4420 }
0x1bbf   :  { %v1804_v18 = vmul.f32 %v4421_v34, %v4419_v16 }
0x1bc1   :  { %1806 = vrot.lane.b32.xlu0 %v1804_v18, %s4747_s26 }
0x1c33   :  { %v1807_v36 = vpop.permute.xlu0 %1806 }
0x1c34   :  { %1810 = vst.msk [vmem:[#allocation5 + $0x10] sm:$0xff] %vm1487_vm6, %v1807_v36  ;;  %3578 = vmatmul.mubr.msk.f32.vlgmr.msra.gmra.mrb[32].mxu0 %vm1487_vm6, %v1807_v36  ;;  %v1439_v36 = vadd.f32 %v5290_v2, %v5230_v62 }
0x1c35   :  { %4120 = vmatpush1.bf16.msra.mxu0 %v5242_v27  ;;  %1990 = vmatprep.mubr.f32.mxu0 %v4746_v17 }
0x1c36   :  { %4122 = vmatprep.subr.bf16.mxu0 %v5244_v28 }
0x1c39   :  { %4124 = vmatpush1.bf16.msra.mxu0 %v5248_v31 }
0x1c3a   :  { %4126 = vmatprep.subr.bf16.mxu0 %v5251_v32 }
0x1c3d   :  { %4128 = vmatpush1.bf16.msra.mxu0 %v5254_v35 }
0x1c3e   :  { %4130 = vmatprep.subr.bf16.mxu0 %v5257_v37 }
0x1c41   :  { %4132 = vmatpush1.bf16.msra.mxu0 %v5261_v40 }
0x1c42   :  { %4134 = vmatprep.subr.bf16.mxu0 %v5240_v19 }
0x1d07   :  { %v1884_v39 = vpop.f32.mrb[32].mxu0 }
0x1d08   :  { %v1889_v47 = vadd.f32 %v1884_v39, %v1435_v38  ;;  %v1886_v49 = vpop.f32.mrb[33].mxu0  ;;  %v1440_v39 = vadd.f32 %v5292_v3, %v5232_v1 }
0x1d09   :  { %v1890_v51 = vadd.f32 %v1886_v49, %v1436_v42 }
0x1d0a   :  { %v3579_v53 = vmul.f32 -1.442695, %v1889_v47 }
0x1d0b   :  { %v3580_v8 = vmul.f32 -1.442695, %v1890_v51 }
0x1d0c   :  { %4422 = vpow2.f32 %v3579_v53 }
0x1d0d   :  { %4424 = vtanh.f32 %v1890_v51 }
0x1d16   :  { %v4423_v55 = vpop.eup %4422 }
0x1d17   :  { %v1897_v59 = vadd.f32 1.0, %v4423_v55  ;;  %v4425_v61 = vpop.eup %4424 }
0x1d19   :  { %4426 = vrcp.f32 %v1897_v59 }
0x1d1a   :  { %4428 = vpow2.f32 %v3580_v8 }
0x1d23   :  { %v4427_v46 = vpop.eup %4426 }
0x1d24   :  { %v1905_v63 = vmul.f32 %v4427_v46, %v4425_v61  ;;  %v4429_v52 = vpop.eup %4428  ;;  %v1904_v10 = vmul.f32 %v4427_v46, %v1802_v33 }
0x1d25   :  { %v1898_v48 = vadd.f32 1.0, %v4429_v52 }
0x1d26   :  { %1907 = vrot.lane.b32.xlu1 %v1905_v63, %s4747_s26 }
0x1d27   :  { %4430 = vrcp.f32 %v1898_v48  ;;  %v2359_v48 = vld [vmem:[#allocation14] sm:$0xff] }
0x1d31   :  { %v4431_v15 = vpop.eup %4430 }
0x1d98   :  { %v1908_v54 = vpop.permute.xlu1 %1907 }
0x1d99   :  { %v1910_v12 = vadd.f32 %v1908_v54, %v1904_v10  ;;  %v2360_v10 = vld [vmem:[#allocation14 + $0x8] sm:$0xff] }
0x1d9a   :  { %v4181_v54 = vpack.c.bf16 %v2360_v10, %v2359_v48 }
0x1d9b   :  { %4432 = vtanh.f32 %v1910_v12 }
0x1d9c   :  { %4182 = vmatprep.subr.bf16.mxu1 %v4181_v54 }
0x1d9d   :  { %4184 = vmatpush3.bf16.msra.mxu1 %v4181_v54 }
0x1da5   :  { %v4433_v57 = vpop.eup %4432 }
0x1da6   :  { %v1912_v58 = vmul.f32 %v4433_v57, %v4431_v15  ;;  %v2362_v15 = vld [vmem:[#allocation14 + $0x18] sm:$0xff] }
0x1da8   :  { %1914 = vrot.lane.b32.xlu0 %v1912_v58, %s4747_s26  ;;  %v2363_v58 = vld [vmem:[#allocation14 + $0x20] sm:$0xff] }
0x1e1a   :  { %v1915_v4 = vpop.permute.xlu0 %1914 }
0x1e1b   :  { %1918 = vst.msk [vmem:[#allocation5 + $0x18] sm:$0xff] %vm1487_vm6, %v1915_v4  ;;  %3581 = vmatmul.mubr.msk.f32.vlgmr.msra.gmra.mrb[34].mxu0 %vm1487_vm6, %v1915_v4  ;;  %v2364_v4 = vld [vmem:[#allocation14 + $0x28] sm:$0xff] }
0x1e1c   :  { %4136 = vmatpush1.bf16.msra.mxu0 %v5242_v27  ;;  %2098 = vmatprep.mubr.f32.mxu0 %v4746_v17 }
0x1e1d   :  { %4138 = vmatprep.subr.bf16.mxu0 %v5244_v28 }
0x1e20   :  { %4140 = vmatpush1.bf16.msra.mxu0 %v5248_v31 }
0x1e21   :  { %4142 = vmatprep.subr.bf16.mxu0 %v5251_v32 }
0x1e24   :  { %4144 = vmatpush1.bf16.msra.mxu0 %v5254_v35 }
0x1e25   :  { %4146 = vmatprep.subr.bf16.mxu0 %v5257_v37 }
0x1e28   :  { %4148 = vmatpush1.bf16.msra.mxu0 %v5261_v40 }
0x1e29   :  { %4150 = vmatprep.subr.bf16.mxu0 %v5240_v19 }
0x1eee   :  { %v1992_v20 = vpop.f32.mrb[34].mxu0 }
0x1eef   :  { %v1997_v13 = vadd.f32 %v1992_v20, %v1437_v5  ;;  %v1994_v14 = vpop.f32.mrb[35].mxu0  ;;  %v4189_v5 = vpack.c.bf16 %v2364_v4, %v2363_v58 }
0x1ef0   :  { %v1998_v21 = vadd.f32 %v1994_v14, %v1438_v6  ;;  %v2366_v14 = vld [vmem:[#allocation14 + $0x38] sm:$0xff] }
0x1ef1   :  { %v3582_v41 = vmul.f32 -1.442695, %v1997_v13  ;;  %v2365_v13 = vld [vmem:[#allocation14 + $0x30] sm:$0xff] }
0x1ef2   :  { %v3583_v23 = vmul.f32 -1.442695, %v1998_v21 }
0x1ef3   :  { %4434 = vpow2.f32 %v3582_v41  ;;  %v4193_v41 = vpack.c.bf16 %v2366_v14, %v2365_v13 }
0x1ef4   :  { %4436 = vtanh.f32 %v1998_v21 }
0x1efd   :  { %v4435_v25 = vpop.eup %4434 }
0x1efe   :  { %v2005_v26 = vadd.f32 1.0, %v4435_v25  ;;  %v4437_v43 = vpop.eup %4436 }
0x1f00   :  { %4438 = vrcp.f32 %v2005_v26 }
0x1f01   :  { %4440 = vpow2.f32 %v3583_v23 }
0x1f0a   :  { %v4439_v29 = vpop.eup %4438 }
0x1f0b   :  { %v2013_v9 = vmul.f32 %v4439_v29, %v4437_v43  ;;  %v4441_v56 = vpop.eup %4440  ;;  %v2012_v24 = vmul.f32 %v4439_v29, %v1910_v12  ;;  %v2361_v12 = vld [vmem:[#allocation14 + $0x10] sm:$0xff] }
0x1f0c   :  { %v2006_v30 = vadd.f32 1.0, %v4441_v56  ;;  %v4185_v57 = vpack.c.bf16 %v2362_v15, %v2361_v12  ;;  %v2351_v43 = vld [vmem:[#allocation5] sm:$0xff] }
0x1f0d   :  { %2015 = vrot.lane.b32.xlu1 %v2013_v9, %s4747_s26 }
0x1f0e   :  { %4442 = vrcp.f32 %v2006_v30  ;;  %4186 = vmatprep.subr.bf16.mxu1 %v4185_v57 }
0x1f0f   :  { %4188 = vmatpush3.bf16.msra.mxu1 %v4185_v57 }
0x1f10   :  { %4190 = vmatprep.subr.bf16.mxu1 %v4189_v5 }
0x1f13   :  { %4192 = vmatpush3.bf16.msra.mxu1 %v4189_v5 }
0x1f14   :  { %4194 = vmatprep.subr.bf16.mxu1 %v4193_v41 }
0x1f17   :  { %4196 = vmatpush3.bf16.msra.mxu1 %v4193_v41 }
0x1f18   :  { %v4443_v33 = vpop.eup %4442  ;;  %4197 = vmatprep.subr.bf16.mxu1 %v4744_v11 }
0x1f7f   :  { %v2016_v60 = vpop.permute.xlu1 %2015 }
0x1f80   :  { %v2018_v50 = vadd.f32 %v2016_v60, %v2012_v24 }
0x1f82   :  { %4444 = vtanh.f32 %v2018_v50 }
0x1f8c   :  { %v4445_v16 = vpop.eup %4444 }
0x1f8d   :  { %v2020_v34 = vmul.f32 %v4445_v16, %v4443_v33 }
0x1f8f   :  { %2022 = vrot.lane.b32.xlu0 %v2020_v34, %s4747_s26 }
0x2001   :  { %v2023_v18 = vpop.permute.xlu0 %2022 }
0x2002   :  { %2026 = vst.msk [vmem:[#allocation5 + $0x20] sm:$0xff] %vm1487_vm6, %v2023_v18  ;;  %3584 = vmatmul.mubr.msk.f32.vlgmr.msra.gmra.mrb[36].mxu0 %vm1487_vm6, %v2023_v18 }
0x2003   :  { %4152 = vmatpush1.bf16.msra.mxu0 %v5242_v27  ;;  %2206 = vmatprep.mubr.f32.mxu0 %v4746_v17 }
0x2004   :  { %4154 = vmatprep.subr.bf16.mxu0 %v5244_v28 }
0x2007   :  { %4156 = vmatpush1.bf16.msra.mxu0 %v5248_v31 }
0x2008   :  { %4158 = vmatprep.subr.bf16.mxu0 %v5251_v32 }
0x200b   :  { %4160 = vmatpush1.bf16.msra.mxu0 %v5254_v35 }
0x200c   :  { %4162 = vmatprep.subr.bf16.mxu0 %v5257_v37 }
0x200f   :  { %4164 = vmatpush1.bf16.msra.mxu0 %v5261_v40 }
0x2010   :  { %4166 = vmatprep.subr.bf16.mxu0 %v5240_v19 }
0x20d5   :  { %v2100_v38 = vpop.f32.mrb[36].mxu0 }
0x20d6   :  { %v2105_v42 = vadd.f32 %v2100_v38, %v1439_v36  ;;  %v2102_v47 = vpop.f32.mrb[37].mxu0 }
0x20d7   :  { %v2106_v49 = vadd.f32 %v2102_v47, %v1440_v39 }
0x20d8   :  { %v3585_v51 = vmul.f32 -1.442695, %v2105_v42 }
0x20d9   :  { %v3586_v19 = vmul.f32 -1.442695, %v2106_v49 }
0x20da   :  { %4446 = vpow2.f32 %v3585_v51 }
0x20db   :  { %4448 = vtanh.f32 %v2106_v49 }
0x20e4   :  { %v4447_v53 = vpop.eup %4446 }
0x20e5   :  { %v2113_v55 = vadd.f32 1.0, %v4447_v53  ;;  %v4449_v59 = vpop.eup %4448 }
0x20e7   :  { %4450 = vrcp.f32 %v2113_v55 }
0x20e8   :  { %4452 = vpow2.f32 %v3586_v19 }
0x20f1   :  { %v4451_v61 = vpop.eup %4450 }
0x20f2   :  { %v2121_v46 = vmul.f32 %v4451_v61, %v4449_v59  ;;  %v4453_v62 = vpop.eup %4452  ;;  %v2120_v8 = vmul.f32 %v4451_v61, %v2018_v50 }
0x20f3   :  { %v2114_v63 = vadd.f32 1.0, %v4453_v62 }
0x20f4   :  { %2123 = vrot.lane.b32.xlu1 %v2121_v46, %s4747_s26 }
0x20f5   :  { %4454 = vrcp.f32 %v2114_v63 }
0x20ff   :  { %v4455_v20 = vpop.eup %4454 }
0x2166   :  { %v2124_v1 = vpop.permute.xlu1 %2123 }
0x2167   :  { %v5384_v52 = vadd.f32 %v2124_v1, %v2120_v8 }
0x2169   :  { %4456 = vtanh.f32 %v5384_v52 }
0x2173   :  { %v4457_v6 = vpop.eup %4456 }
0x2174   :  { %v2128_v21 = vmul.f32 %v4457_v6, %v4455_v20  ;;  %v2511_v20 = vld [vmem:[#allocation15] sm:$0xff]  ;;  %v2512_v6 = vld [vmem:[#allocation15 + $0x8] sm:$0xff] }
0x2176   :  { %2130 = vrot.lane.b32.xlu0 %v2128_v21, %s4747_s26 }
0x217a   :  { %1136 = vrot.lane.b32.xlu0 %v5272_v22, %s4748_s16 }
0x21e8   :  { %v2131_v25 = vpop.permute.xlu0 %2130 }
0x21e9   :  { %2134 = vst.msk [vmem:[#allocation5 + $0x28] sm:$0xff] %vm1487_vm6, %v2131_v25  ;;  %3587 = vmatmul.mubr.msk.f32.vlgmr.msra.gmra.mrb[38].mxu0 %vm1487_vm6, %v2131_v25 }
0x21ea   :  { %4168 = vmatpush1.bf16.msra.mxu0 %v5242_v27  ;;  %2314 = vmatprep.mubr.f32.mxu0 %v4746_v17  ;;  %v2352_v27 = vld [vmem:[#allocation5 + $0x8] sm:$0xff] }
0x21eb   :  { %4170 = vmatprep.subr.bf16.mxu0 %v5244_v28  ;;  %v2353_v28 = vld [vmem:[#allocation5 + $0x10] sm:$0xff] }
0x21ec   :  { %v1137_v26 = vpop.permute.xlu0 %1136 }
0x21ed   :  { %1140 = vst.msk [vmem:[#allocation3 + $0x38] sm:$0xff] %vm302_vm5, %v1137_v26  ;;  %v2513_v26 = vld [vmem:[#allocation15 + $0x10] sm:$0xff] }
0x21ee   :  { %4172 = vmatpush1.bf16.msra.mxu0 %v5248_v31  ;;  %v2354_v31 = vld [vmem:[#allocation5 + $0x18] sm:$0xff] }
0x21ef   :  { %4174 = vmatprep.subr.bf16.mxu0 %v5251_v32  ;;  %v2355_v32 = vld [vmem:[#allocation5 + $0x20] sm:$0xff] }
0x21f2   :  { %4176 = vmatpush1.bf16.msra.mxu0 %v5254_v35  ;;  %v2356_v35 = vld [vmem:[#allocation5 + $0x28] sm:$0xff] }
0x21f3   :  { %4178 = vmatprep.subr.bf16.mxu0 %v5257_v37  ;;  %v1441_v37 = vadd.f32 %v5290_v2, %v5234_v0 }
0x21f4   :  { %v1148_v22 = vld [vmem:[#allocation3 + $0x38] sm:$0xff] }
0x21f5   :  { %3568 = vmatmul.mubr.msk.f32.gmra.mrb[28].mxu1 %vm302_vm5, %v1148_v22  ;;  %v2514_v22 = vld [vmem:[#allocation15 + $0x18] sm:$0xff] }
0x21f6   :  { %3865 = vmatprep.mubr.msk.f32.mxu1 %vm1487_vm6, %v2351_v43  ;;  %4180 = vmatpush1.bf16.msra.mxu0 %v5261_v40  ;;  %v1442_v40 = vadd.f32 %v5292_v3, %v5236_v7  ;;  %v5440_v43 = vpack.c.bf16 %v2514_v22, %v2513_v26 }
0x21f9   :  { %3866 = vmatmul.mubr.msk.f32.vlgmr.msra.gmra.mrb[30].mxu1 %vm1487_vm6, %v2352_v27 }
0x21fa   :  { %3868 = vmatprep.mubr.msk.f32.mxu1 %vm1487_vm6, %v2353_v28 }
0x21fd   :  { %3869 = vmatmul.mubr.msk.f32.gmra.mrb[32].mxu1 %vm1487_vm6, %v2354_v31 }
0x21fe   :  { %3871 = vmatprep.mubr.msk.f32.mxu1 %vm1487_vm6, %v2355_v32 }
0x2201   :  { %3872 = vmatmul.mubr.msk.f32.gmra.mrb[34].mxu1 %vm1487_vm6, %v2356_v35 }
0x22bc   :  { %v2208_v29 = vpop.f32.mrb[38].mxu0 }
0x22bd   :  { %v2213_v9 = vadd.f32 %v2208_v29, %v1441_v37  ;;  %v2210_v23 = vpop.f32.mrb[39].mxu0  ;;  %v5459_v37 = vld [vmem:[%s5602_s9] ss:$0 sm:$0xff] }
0x22be   :  { %v2214_v56 = vadd.f32 %v2210_v23, %v1442_v40 }
0x22bf   :  { %v3588_v30 = vmul.f32 -1.442695, %v2213_v9 }
0x22c1   :  { %4458 = vpow2.f32 %v3588_v30 }
0x22c2   :  { %4460 = vtanh.f32 %v2214_v56 }
0x22c8   :  { %v1412_v24 = vpop.f32.mrb[28].mxu1 }
0x22c9   :  { %v1413_v60 = vadd.f32 %v1412_v24, %v5268_v44  ;;  %v1414_v50 = vpop.f32.mrb[29].mxu1 }
0x22ca   :  { %v1415_v33 = vadd.f32 %v1414_v50, %v5270_v45  ;;  %v3589_v45 = vmul.f32 -1.442695, %v2214_v56 }
0x22cb   :  { %v4459_v16 = vpop.eup %4458  ;;  %v1443_v8 = vadd.f32 %v5290_v2, %v1413_v60  ;;  %v5436_v2 = vpack.c.bf16 %v2512_v6, %v2511_v20 }
0x22cc   :  { %v2221_v34 = vadd.f32 1.0, %v4459_v16  ;;  %v5415_v18 = vpop.f32.mrb[30].mxu1  ;;  %v4461_v44 = vpop.eup %4460 }
0x22cd   :  { %v5417_v0 = vpop.f32.mrb[31].mxu1  ;;  %4199 = vmatpush3.bf16.msra.mxu1 %v5436_v2 }
0x22ce   :  { %4462 = vrcp.f32 %v2221_v34  ;;  %4200 = vmatprep.subr.bf16.mxu1 %v4744_v11  ;;  %v2465_v9 = vadd.f32 %v5459_v37, %v5417_v0 }
0x22cf   :  { %4464 = vpow2.f32 %v3589_v45 }
0x22d0   :  { %v5419_v7 = vpop.f32.mrb[32].mxu1 }
0x22d1   :  { %v5421_v36 = vpop.f32.mrb[33].mxu1  ;;  %4202 = vmatpush3.bf16.msra.mxu1 %v5440_v43 }
0x22d2   :  { %4203 = vmatprep.subr.bf16.mxu1 %v4744_v11 }
0x22d4   :  { %v5423_v38 = vpop.f32.mrb[34].mxu1 }
0x22d5   :  { %v5425_v39 = vpop.f32.mrb[35].mxu1 }
0x22d8   :  { %v4463_v42 = vpop.eup %4462 }
0x22d9   :  { %v2229_v47 = vmul.f32 %v4463_v42, %v4461_v44  ;;  %v4465_v49 = vpop.eup %4464  ;;  %v2228_v53 = vmul.f32 %v4463_v42, %v5384_v52  ;;  %v1444_v52 = vadd.f32 %v5292_v3, %v1415_v33 }
0x22da   :  { %v2222_v51 = vadd.f32 1.0, %v4465_v49 }
0x22db   :  { %2231 = vrot.lane.b32.xlu1 %v2229_v47, %s4747_s26 }
0x22dc   :  { %4466 = vrcp.f32 %v2222_v51 }
0x22e6   :  { %v4467_v61 = vpop.eup %4466 }
0x234d   :  { %v2232_v55 = vpop.permute.xlu1 %2231 }
0x234e   :  { %v2234_v59 = vadd.f32 %v2232_v55, %v2228_v53 }
0x2350   :  { %4468 = vtanh.f32 %v2234_v59 }
0x235a   :  { %v4469_v46 = vpop.eup %4468 }
0x235b   :  { %v2236_v19 = vmul.f32 %v4469_v46, %v4467_v61 }
0x235d   :  { %2238 = vrot.lane.b32.xlu1 %v2236_v19, %s4747_s26 }
0x23cf   :  { %v2239_v62 = vpop.permute.xlu1 %2238 }
0x23d0   :  { %2242 = vst.msk [vmem:[#allocation5 + $0x30] sm:$0xff] %vm1487_vm6, %v2239_v62  ;;  %3590 = vmatmul.mubr.msk.f32.vlgmr.msra.gmra.mrb[40].mxu0 %vm1487_vm6, %v2239_v62 }
0x23d7   :  { %v2357_v63 = vld [vmem:[#allocation5 + $0x30] sm:$0xff] }
0x23d8   :  { %3874 = vmatprep.mubr.msk.f32.mxu1 %vm1487_vm6, %v2357_v63 }
0x24a3   :  { %v2316_v1 = vpop.f32.mrb[40].mxu0 }
0x24a4   :  { %v2321_v48 = vadd.f32 %v2316_v1, %v1443_v8  ;;  %v2318_v10 = vpop.f32.mrb[41].mxu0 }
0x24a5   :  { %v2322_v54 = vadd.f32 %v2318_v10, %v1444_v52 }
0x24a6   :  { %v3591_v12 = vmul.f32 -1.442695, %v2321_v48 }
0x24a7   :  { %v3592_v3 = vmul.f32 -1.442695, %v2322_v54 }
0x24a8   :  { %4470 = vpow2.f32 %v3591_v12 }
0x24a9   :  { %4472 = vtanh.f32 %v2322_v54 }
0x24b2   :  { %v4471_v15 = vpop.eup %4470 }
0x24b3   :  { %v2329_v57 = vadd.f32 1.0, %v4471_v15  ;;  %v4473_v58 = vpop.eup %4472 }
0x24b5   :  { %4474 = vrcp.f32 %v2329_v57 }
0x24b6   :  { %4476 = vpow2.f32 %v3592_v3 }
0x24bf   :  { %v4475_v4 = vpop.eup %4474 }
0x24c0   :  { %v2337_v5 = vmul.f32 %v4475_v4, %v4473_v58  ;;  %v4477_v13 = vpop.eup %4476  ;;  %v2336_v21 = vmul.f32 %v4475_v4, %v2234_v59  ;;  %v2470_v59 = vadd.f32 %v5415_v18, %v5459_v37 }
0x24c1   :  { %v2330_v14 = vadd.f32 1.0, %v4477_v13 }
0x24c2   :  { %2339 = vrot.lane.b32.xlu0 %v2337_v5, %s4747_s26  ;;  %v2475_v5 = vadd.f32 %v5459_v37, %v5421_v36 }
0x24c3   :  { %4478 = vrcp.f32 %v2330_v14 }
0x24cd   :  { %v4479_v27 = vpop.eup %4478 }
0x2534   :  { %v2340_v41 = vpop.permute.xlu0 %2339 }
0x2535   :  { %v2342_v25 = vadd.f32 %v2340_v41, %v2336_v21 }
0x2537   :  { %4480 = vtanh.f32 %v2342_v25 }
0x2541   :  { %v4481_v28 = vpop.eup %4480 }
0x2542   :  { %v2344_v31 = vmul.f32 %v4481_v28, %v4479_v27 }
0x2544   :  { %2346 = vrot.lane.b32.xlu1 %v2344_v31, %s4747_s26 }
0x2548   :  { %2597 = vrot.lane.b32.xlu1 %v2342_v25, %s4749_s6 }
0x25b6   :  { %v2347_v32 = vpop.permute.xlu1 %2346 }
0x25b7   :  { %2350 = vst.msk [vmem:[#allocation5 + $0x38] sm:$0xff] %vm1487_vm6, %v2347_v32 }
0x25ba   :  { %v2598_v42 = vpop.permute.xlu1 %2597 }
0x25be   :  { %v2358_v35 = vld [vmem:[#allocation5 + $0x38] sm:$0xff] }
0x25bf   :  { %3875 = vmatmul.mubr.msk.f32.gmra.mrb[36].mxu1 %vm1487_vm6, %v2358_v35 }
0x25c0   :  { %3885 = vmatprep.mubr.msk.f32.mxu1 %vm4745_vm4, %v4746_v17 }
0x25c3   :  { %3886 = vmatmul.mubr.msk.f32.vlgmr.msra.gmra.mrb[38].mxu1 %vm302_vm5, %v2347_v32 }
0x25c4   :  { %4205 = vmatpush3.bf16.msra.mxu1 %v5436_v2  ;;  %3896 = vmatprep.mubr.msk.f32.mxu1 %vm4745_vm4, %v4746_v17 }
0x25c5   :  { %4206 = vmatprep.subr.bf16.mxu1 %v4744_v11 }
0x25c8   :  { %4208 = vmatpush3.bf16.msra.mxu1 %v5440_v43 }
0x25c9   :  { %4209 = vmatprep.subr.bf16.mxu1 %v4744_v11 }
0x2692   :  { %v5461_v29 = vpop.f32.mrb[36].mxu1 }
0x2693   :  { %v5463_v40 = vpop.f32.mrb[37].mxu1 }
0x2696   :  { %v2584_v23 = vpop.f32.mrb[38].mxu1 }
0x2697   :  { %v2588_v56 = vadd.f32 %v2584_v23, %v2465_v9  ;;  %v3887_v30 = vpop.f32.mrb[39].mxu1  ;;  %v2480_v23 = vadd.f32 %v5419_v7, %v5459_v37 }
0x2699   :  { %4482 = vtanh.f32 %v2588_v56  ;;  %v3603_v60 = vmul.f32 -1.442695, %v2588_v56 }
0x269b   :  { %4484 = vpow2.f32 %v3603_v60 }
0x26a3   :  { %v4483_v24 = vpop.eup %4482 }
0x26a4   :  { %2602 = vrot.lane.b32.xlu0 %v4483_v24, %s4747_s26 }
0x26a5   :  { %v4485_v50 = vpop.eup %4484 }
0x26a6   :  { %v2592_v33 = vadd.f32 1.0, %v4485_v50 }
0x26a8   :  { %4486 = vrcp.f32 %v2592_v33 }
0x26b2   :  { %v4487_v16 = vpop.eup %4486 }
0x26b3   :  { %v2600_v47 = vmul.f32 %v4487_v16, %v2598_v42 }
0x2716   :  { %v2603_v34 = vpop.permute.xlu0 %2602 }
0x2717   :  { %v2605_v44 = vmul.f32 %v4487_v16, %v2603_v34 }
0x2719   :  { %2607 = vrot.lane.b32.xlu0 %v2605_v44, %s4748_s16 }
0x278b   :  { %v2608_v0 = vpop.permute.xlu0 %2607 }
0x278c   :  { %v2610_v45 = vadd.f32 %v2608_v0, %v2600_v47 }
0x278e   :  { %4488 = vtanh.f32 %v2610_v45 }
0x2798   :  { %v4489_v49 = vpop.eup %4488 }
0x2799   :  { %2613 = vrot.lane.b32.xlu1 %v4489_v49, %s4747_s26 }
0x280b   :  { %v2614_v51 = vpop.permute.xlu1 %2613 }
0x280c   :  { %v2616_v53 = vmul.f32 %v4487_v16, %v2614_v51 }
0x280e   :  { %2618 = vrot.lane.b32.xlu0 %v2616_v53, %s4748_s16 }
0x2880   :  { %v2619_v55 = vpop.permute.xlu0 %2618 }
0x2881   :  { %2621 = vst.msk [vmem:[#allocation3] sm:$0xff] %vm302_vm5, %v2619_v55  ;;  %3897 = vmatmul.mubr.msk.f32.vlgmr.msra.gmra.mrb[40].mxu1 %vm302_vm5, %v2619_v55  ;;  %v2485_v55 = vadd.f32 %v5459_v37, %v5425_v39 }
0x2882   :  { %4211 = vmatpush3.bf16.msra.mxu1 %v5436_v2  ;;  %3907 = vmatprep.mubr.msk.f32.mxu1 %vm4745_vm4, %v4746_v17 }
0x2883   :  { %4212 = vmatprep.subr.bf16.mxu1 %v4744_v11 }
0x2886   :  { %4214 = vmatpush3.bf16.msra.mxu1 %v5440_v43 }
0x2887   :  { %4215 = vmatprep.subr.bf16.mxu1 %v4744_v11 }
0x2954   :  { %v2691_v61 = vpop.f32.mrb[40].mxu1 }
0x2955   :  { %v2695_v46 = vadd.f32 %v2691_v61, %v2470_v59  ;;  %v3898_v19 = vpop.f32.mrb[41].mxu1 }
0x2957   :  { %4490 = vtanh.f32 %v2695_v46  ;;  %v3605_v63 = vmul.f32 -1.442695, %v2695_v46 }
0x2959   :  { %4492 = vpow2.f32 %v3605_v63 }
0x2961   :  { %v4491_v62 = vpop.eup %4490 }
0x2962   :  { %2705 = vrot.lane.b32.xlu1 %v4491_v62, %s4747_s26 }
0x2963   :  { %v4493_v8 = vpop.eup %4492 }
0x2964   :  { %v2699_v1 = vadd.f32 1.0, %v4493_v8 }
0x2966   :  { %4494 = vrcp.f32 %v2699_v1 }
0x2970   :  { %v4495_v52 = vpop.eup %4494 }
0x2971   :  { %v2703_v54 = vmul.f32 %v4495_v52, %v2610_v45 }
0x29d4   :  { %v2706_v48 = vpop.permute.xlu1 %2705 }
0x29d5   :  { %v2708_v10 = vmul.f32 %v4495_v52, %v2706_v48 }
0x29d7   :  { %2710 = vrot.lane.b32.xlu0 %v2708_v10, %s4748_s16 }
0x2a49   :  { %v2711_v12 = vpop.permute.xlu0 %2710 }
0x2a4a   :  { %v2713_v18 = vadd.f32 %v2711_v12, %v2703_v54 }
0x2a4c   :  { %4496 = vtanh.f32 %v2713_v18 }
0x2a56   :  { %v4497_v15 = vpop.eup %4496 }
0x2a57   :  { %2716 = vrot.lane.b32.xlu1 %v4497_v15, %s4747_s26 }
0x2ac9   :  { %v2717_v57 = vpop.permute.xlu1 %2716 }
0x2aca   :  { %v2719_v58 = vmul.f32 %v4495_v52, %v2717_v57 }
0x2acc   :  { %2721 = vrot.lane.b32.xlu0 %v2719_v58, %s4748_s16  ;;  %v2490_v58 = vadd.f32 %v5423_v38, %v5459_v37 }
0x2b3e   :  { %v2722_v4 = vpop.permute.xlu0 %2721 }
0x2b3f   :  { %2724 = vst.msk [vmem:[#allocation3 + $0x8] sm:$0xff] %vm302_vm5, %v2722_v4  ;;  %3908 = vmatmul.mubr.msk.f32.vlgmr.msra.gmra.mrb[42].mxu1 %vm302_vm5, %v2722_v4 }
0x2b40   :  { %4217 = vmatpush3.bf16.msra.mxu1 %v5436_v2  ;;  %3918 = vmatprep.mubr.msk.f32.mxu1 %vm4745_vm4, %v4746_v17 }
0x2b41   :  { %4218 = vmatprep.subr.bf16.mxu1 %v4744_v11 }
0x2b44   :  { %4220 = vmatpush3.bf16.msra.mxu1 %v5440_v43 }
0x2b45   :  { %4221 = vmatprep.subr.bf16.mxu1 %v4744_v11 }
0x2c12   :  { %v2794_v20 = vpop.f32.mrb[42].mxu1 }
0x2c13   :  { %v2798_v6 = vadd.f32 %v2794_v20, %v2475_v5  ;;  %v3909_v3 = vpop.f32.mrb[43].mxu1 }
0x2c15   :  { %4498 = vtanh.f32 %v2798_v6  ;;  %v3607_v14 = vmul.f32 -1.442695, %v2798_v6 }
0x2c17   :  { %4500 = vpow2.f32 %v3607_v14 }
0x2c1f   :  { %v4499_v13 = vpop.eup %4498 }
0x2c20   :  { %2808 = vrot.lane.b32.xlu1 %v4499_v13, %s4747_s26 }
0x2c21   :  { %v4501_v21 = vpop.eup %4500 }
0x2c22   :  { %v2802_v41 = vadd.f32 1.0, %v4501_v21 }
0x2c24   :  { %4502 = vrcp.f32 %v2802_v41 }
0x2c2e   :  { %v4503_v25 = vpop.eup %4502 }
0x2c2f   :  { %v2806_v27 = vmul.f32 %v4503_v25, %v2713_v18 }
0x2c92   :  { %v2809_v26 = vpop.permute.xlu1 %2808 }
0x2c93   :  { %v2811_v22 = vmul.f32 %v4503_v25, %v2809_v26 }
0x2c95   :  { %2813 = vrot.lane.b32.xlu0 %v2811_v22, %s4748_s16 }
0x2d07   :  { %v2814_v28 = vpop.permute.xlu0 %2813 }
0x2d08   :  { %v2816_v36 = vadd.f32 %v2814_v28, %v2806_v27 }
0x2d0a   :  { %4504 = vtanh.f32 %v2816_v36 }
0x2d14   :  { %v4505_v31 = vpop.eup %4504 }
0x2d15   :  { %2819 = vrot.lane.b32.xlu1 %v4505_v31, %s4747_s26 }
0x2d87   :  { %v2820_v32 = vpop.permute.xlu1 %2819 }
0x2d88   :  { %v2822_v35 = vmul.f32 %v4503_v25, %v2820_v32  ;;  %v2495_v32 = vadd.f32 %v5459_v37, %v5463_v40 }
0x2d8a   :  { %2824 = vrot.lane.b32.xlu0 %v2822_v35, %s4748_s16 }
0x2dfc   :  { %v2825_v9 = vpop.permute.xlu0 %2824 }
0x2dfd   :  { %2827 = vst.msk [vmem:[#allocation3 + $0x10] sm:$0xff] %vm302_vm5, %v2825_v9  ;;  %3919 = vmatmul.mubr.msk.f32.vlgmr.msra.gmra.mrb[44].mxu1 %vm302_vm5, %v2825_v9 }
0x2dfe   :  { %4223 = vmatpush3.bf16.msra.mxu1 %v5436_v2  ;;  %3929 = vmatprep.mubr.msk.f32.mxu1 %vm4745_vm4, %v4746_v17 }
0x2dff   :  { %4224 = vmatprep.subr.bf16.mxu1 %v4744_v11 }
0x2e02   :  { %4226 = vmatpush3.bf16.msra.mxu1 %v5440_v43 }
0x2e03   :  { %4227 = vmatprep.subr.bf16.mxu1 %v4744_v11 }
0x2ed0   :  { %v2897_v56 = vpop.f32.mrb[44].mxu1 }
0x2ed1   :  { %v2901_v30 = vadd.f32 %v2897_v56, %v2480_v23  ;;  %v3920_v24 = vpop.f32.mrb[45].mxu1 }
0x2ed3   :  { %4506 = vtanh.f32 %v2901_v30  ;;  %v3609_v50 = vmul.f32 -1.442695, %v2901_v30 }
0x2ed5   :  { %4508 = vpow2.f32 %v3609_v50 }
0x2edd   :  { %v4507_v60 = vpop.eup %4506 }
0x2ede   :  { %2911 = vrot.lane.b32.xlu1 %v4507_v60, %s4747_s26 }
0x2edf   :  { %v4509_v33 = vpop.eup %4508 }
0x2ee0   :  { %v2905_v16 = vadd.f32 1.0, %v4509_v33  ;;  %v3351_v33 = vld [vmem:[#allocation17] sm:$0xff] }
0x2ee2   :  { %4510 = vrcp.f32 %v2905_v16  ;;  %v3352_v16 = vld [vmem:[#allocation17 + $0x8] sm:$0xff] }
0x2eec   :  { %v4511_v34 = vpop.eup %4510 }
0x2eed   :  { %v2909_v47 = vmul.f32 %v4511_v34, %v2816_v36 }
0x2f50   :  { %v2912_v44 = vpop.permute.xlu1 %2911 }
0x2f51   :  { %v2914_v42 = vmul.f32 %v4511_v34, %v2912_v44 }
0x2f53   :  { %2916 = vrot.lane.b32.xlu0 %v2914_v42, %s4748_s16 }
0x2fc5   :  { %v2917_v0 = vpop.permute.xlu0 %2916 }
0x2fc6   :  { %v2919_v7 = vadd.f32 %v2917_v0, %v2909_v47  ;;  %v3353_v0 = vld [vmem:[#allocation17 + $0x10] sm:$0xff] }
0x2fc8   :  { %4512 = vtanh.f32 %v2919_v7 }
0x2fd2   :  { %v4513_v45 = vpop.eup %4512 }
0x2fd3   :  { %2922 = vrot.lane.b32.xlu1 %v4513_v45, %s4747_s26 }
0x3045   :  { %v2923_v49 = vpop.permute.xlu1 %2922 }
0x3046   :  { %v2925_v51 = vmul.f32 %v4511_v34, %v2923_v49  ;;  %v4245_v34 = vpack.c.bf16 %v3352_v16, %v3351_v33 }
0x3048   :  { %2927 = vrot.lane.b32.xlu0 %v2925_v51, %s4748_s16  ;;  %v3343_v51 = vld [vmem:[#allocation3] sm:$0xff] }
0x30ba   :  { %v2928_v53 = vpop.permute.xlu0 %2927 }
0x30bb   :  { %2930 = vst.msk [vmem:[#allocation3 + $0x18] sm:$0xff] %vm302_vm5, %v2928_v53  ;;  %3930 = vmatmul.mubr.msk.f32.vlgmr.msra.gmra.mrb[46].mxu1 %vm302_vm5, %v2928_v53  ;;  %v3344_v53 = vld [vmem:[#allocation3 + $0x8] sm:$0xff] }
0x30bc   :  { %4229 = vmatpush3.bf16.msra.mxu1 %v5436_v2  ;;  %3940 = vmatprep.mubr.msk.f32.mxu1 %vm4745_vm4, %v4746_v17 }
0x30bd   :  { %4230 = vmatprep.subr.bf16.mxu1 %v4744_v11 }
0x30c0   :  { %4232 = vmatpush3.bf16.msra.mxu1 %v5440_v43 }
0x30c1   :  { %4233 = vmatprep.subr.bf16.mxu1 %v4744_v11 }
0x318e   :  { %v3000_v59 = vpop.f32.mrb[46].mxu1 }
0x318f   :  { %v3004_v61 = vadd.f32 %v3000_v59, %v2485_v55  ;;  %v3931_v46 = vpop.f32.mrb[47].mxu1  ;;  %v3345_v55 = vld [vmem:[#allocation3 + $0x10] sm:$0xff]  ;;  %v3346_v59 = vld [vmem:[#allocation3 + $0x18] sm:$0xff] }
0x3191   :  { %4514 = vtanh.f32 %v3004_v61  ;;  %v3611_v62 = vmul.f32 -1.442695, %v3004_v61 }
0x3193   :  { %4516 = vpow2.f32 %v3611_v62  ;;  %v2500_v62 = vadd.f32 %v5461_v29, %v5459_v37 }
0x319b   :  { %v4515_v19 = vpop.eup %4514 }
0x319c   :  { %3014 = vrot.lane.b32.xlu1 %v4515_v19, %s4747_s26 }
0x319d   :  { %v4517_v63 = vpop.eup %4516 }
0x319e   :  { %v3008_v8 = vadd.f32 1.0, %v4517_v63 }
0x31a0   :  { %4518 = vrcp.f32 %v3008_v8 }
0x31aa   :  { %v4519_v1 = vpop.eup %4518 }
0x31ab   :  { %v3012_v10 = vmul.f32 %v4519_v1, %v2919_v7  ;;  %v3354_v7 = vld [vmem:[#allocation17 + $0x18] sm:$0xff] }
0x31ac   :  { %v4249_v45 = vpack.c.bf16 %v3354_v7, %v3353_v0 }
0x320e   :  { %v3015_v52 = vpop.permute.xlu1 %3014 }
0x320f   :  { %v3017_v48 = vmul.f32 %v4519_v1, %v3015_v52  ;;  %v3618_v52 = vld [vmem:[%s5605_s12] ss:$0 sm:$0xff]  ;;  %s4750_s12 = smov [#allocation18]  }
0x3210   :  { %s3504_s24 = sshll.u32 %s4750_s12, 4  ;;  %s3505_s24 = int_to_ptr.vmem [resolvable:$true] %s3504_s24 }
0x3211   :  { %3019 = vrot.lane.b32.xlu0 %v3017_v48, %s4748_s16  ;;  %p4705_p1 = scmp.lt.s32.totalorder %s3505_s24, %s3505_s24 }
0x3283   :  { %v3020_v54 = vpop.permute.xlu0 %3019 }
0x3284   :  { %v3022_v39 = vadd.f32 %v3020_v54, %v3012_v10 }
0x3286   :  { %4520 = vtanh.f32 %v3022_v39 }
0x3290   :  { %v4521_v12 = vpop.eup %4520 }
0x3291   :  { %3025 = vrot.lane.b32.xlu1 %v4521_v12, %s4747_s26 }
0x3303   :  { %v3026_v18 = vpop.permute.xlu1 %3025 }
0x3304   :  { %v3028_v15 = vmul.f32 %v4519_v1, %v3026_v18 }
0x3306   :  { %3030 = vrot.lane.b32.xlu0 %v3028_v15, %s4748_s16 }
0x3378   :  { %v3031_v57 = vpop.permute.xlu0 %3030 }
0x3379   :  { %3033 = vst.msk [vmem:[#allocation3 + $0x20] sm:$0xff] %vm302_vm5, %v3031_v57  ;;  %3941 = vmatmul.mubr.msk.f32.vlgmr.msra.gmra.mrb[48].mxu1 %vm302_vm5, %v3031_v57 }
0x337a   :  { %4235 = vmatpush3.bf16.msra.mxu1 %v5436_v2  ;;  %3951 = vmatprep.mubr.msk.f32.mxu1 %vm4745_vm4, %v4746_v17 }
0x337b   :  { %4236 = vmatprep.subr.bf16.mxu1 %v4744_v11 }
0x337e   :  { %4238 = vmatpush3.bf16.msra.mxu1 %v5440_v43 }
0x337f   :  { %4239 = vmatprep.subr.bf16.mxu1 %v4744_v11 }
0x3380   :  { %v3347_v61 = vld [vmem:[#allocation3 + $0x20] sm:$0xff] }
0x344c   :  { %v3103_v4 = vpop.f32.mrb[48].mxu1 }
0x344d   :  { %v3107_v5 = vadd.f32 %v3103_v4, %v2490_v58  ;;  %v3942_v20 = vpop.f32.mrb[49].mxu1 }
0x344f   :  { %4522 = vtanh.f32 %v3107_v5  ;;  %v3613_v3 = vmul.f32 -1.442695, %v3107_v5 }
0x3451   :  { %4524 = vpow2.f32 %v3613_v3 }
0x3459   :  { %v4523_v6 = vpop.eup %4522 }
0x345a   :  { %3117 = vrot.lane.b32.xlu1 %v4523_v6, %s4747_s26 }
0x345b   :  { %v4525_v13 = vpop.eup %4524 }
0x345c   :  { %v3111_v14 = vadd.f32 1.0, %v4525_v13 }
0x345e   :  { %4526 = vrcp.f32 %v3111_v14 }
0x3468   :  { %v4527_v21 = vpop.eup %4526 }
0x3469   :  { %v3115_v26 = vmul.f32 %v4527_v21, %v3022_v39 }
0x34cc   :  { %v3118_v41 = vpop.permute.xlu1 %3117 }
0x34cd   :  { %v3120_v25 = vmul.f32 %v4527_v21, %v3118_v41 }
0x34cf   :  { %3122 = vrot.lane.b32.xlu0 %v3120_v25, %s4748_s16 }
0x3541   :  { %v3123_v22 = vpop.permute.xlu0 %3122 }
0x3542   :  { %v3125_v38 = vadd.f32 %v3123_v22, %v3115_v26 }
0x3544   :  { %4528 = vtanh.f32 %v3125_v38 }
0x354e   :  { %v4529_v27 = vpop.eup %4528 }
0x354f   :  { %3128 = vrot.lane.b32.xlu1 %v4529_v27, %s4747_s26 }
0x35c1   :  { %v3129_v28 = vpop.permute.xlu1 %3128 }
0x35c2   :  { %v3131_v36 = vmul.f32 %v4527_v21, %v3129_v28 }
0x35c4   :  { %3133 = vrot.lane.b32.xlu0 %v3131_v36, %s4748_s16 }
0x3636   :  { %v3134_v31 = vpop.permute.xlu0 %3133 }
0x3637   :  { %3136 = vst.msk [vmem:[#allocation3 + $0x28] sm:$0xff] %vm302_vm5, %v3134_v31  ;;  %3952 = vmatmul.mubr.msk.f32.vlgmr.msra.gmra.mrb[50].mxu1 %vm302_vm5, %v3134_v31 }
0x3638   :  { %4241 = vmatpush3.bf16.msra.mxu1 %v5436_v2  ;;  %3962 = vmatprep.mubr.msk.f32.mxu1 %vm4745_vm4, %v4746_v17 }
0x3639   :  { %4242 = vmatprep.subr.bf16.mxu1 %v4744_v11 }
0x363c   :  { %4244 = vmatpush3.bf16.msra.mxu1 %v5440_v43 }
0x363d   :  { %4246 = vmatprep.subr.bf16.mxu1 %v4245_v34 }
0x363e   :  { %v3348_v46 = vld [vmem:[#allocation3 + $0x28] sm:$0xff] }
0x370a   :  { %v3206_v35 = vpop.f32.mrb[50].mxu1 }
0x370b   :  { %v3210_v9 = vadd.f32 %v3206_v35, %v2495_v32  ;;  %v3953_v23 = vpop.f32.mrb[51].mxu1 }
0x370d   :  { %4530 = vtanh.f32 %v3210_v9  ;;  %v3615_v30 = vmul.f32 -1.442695, %v3210_v9 }
0x370f   :  { %4532 = vpow2.f32 %v3615_v30 }
0x3717   :  { %v4531_v56 = vpop.eup %4530 }
0x3718   :  { %3220 = vrot.lane.b32.xlu1 %v4531_v56, %s4747_s26 }
0x3719   :  { %v4533_v2 = vpop.eup %4532 }
0x371a   :  { %v3214_v24 = vadd.f32 1.0, %v4533_v2 }
0x371c   :  { %4534 = vrcp.f32 %v3214_v24 }
0x3726   :  { %v4535_v17 = vpop.eup %4534 }
0x3727   :  { %v3218_v43 = vmul.f32 %v4535_v17, %v3125_v38 }
0x378a   :  { %v3221_v60 = vpop.permute.xlu1 %3220 }
0x378b   :  { %v3223_v11 = vmul.f32 %v4535_v17, %v3221_v60 }
0x378d   :  { %3225 = vrot.lane.b32.xlu0 %v3223_v11, %s4748_s16 }
0x37ff   :  { %v3226_v50 = vpop.permute.xlu0 %3225 }
0x3800   :  { %v5552_v40 = vadd.f32 %v3226_v50, %v3218_v43 }
0x3802   :  { %4536 = vtanh.f32 %v5552_v40 }
0x380c   :  { %v4537_v44 = vpop.eup %4536 }
0x380d   :  { %3231 = vrot.lane.b32.xlu1 %v4537_v44, %s4747_s26 }
0x387f   :  { %v3232_v42 = vpop.permute.xlu1 %3231 }
0x3880   :  { %v3234_v47 = vmul.f32 %v4535_v17, %v3232_v42 }
0x3882   :  { %3236 = vrot.lane.b32.xlu0 %v3234_v47, %s4748_s16 }
0x38f4   :  { %v3237_v49 = vpop.permute.xlu0 %3236 }
0x38f5   :  { %3239 = vst.msk [vmem:[#allocation3 + $0x30] sm:$0xff] %vm302_vm5, %v3237_v49  ;;  %3963 = vmatmul.mubr.msk.f32.vlgmr.msra.gmra.mrb[52].mxu1 %vm302_vm5, %v3237_v49 }
0x38f6   :  { %4248 = vmatpush3.bf16.msra.mxu1 %v4245_v34  ;;  %3973 = vmatprep.mubr.msk.f32.mxu1 %vm302_vm5, %v3343_v51 }
0x38f7   :  { %4250 = vmatprep.subr.bf16.mxu1 %v4249_v45 }
0x38fa   :  { %4252 = vmatpush3.bf16.msra.mxu1 %v4249_v45 }
0x38fc   :  { %v3349_v19 = vld [vmem:[#allocation3 + $0x30] sm:$0xff] }
0x38fd   :  { %3974 = vmatmul.mubr.msk.f32.vlgmr.msra.gmra.mrb[54].mxu1 %vm302_vm5, %v3344_v53 }
0x38fe   :  { %3976 = vmatprep.mubr.msk.f32.mxu1 %vm302_vm5, %v3345_v55 }
0x3901   :  { %3977 = vmatmul.mubr.msk.f32.gmra.mrb[56].mxu1 %vm302_vm5, %v3346_v59 }
0x3902   :  { %3979 = vmatprep.mubr.msk.f32.mxu1 %vm302_vm5, %v3347_v61 }
0x3905   :  { %3980 = vmatmul.mubr.msk.f32.gmra.mrb[58].mxu1 %vm302_vm5, %v3348_v46 }
0x3906   :  { %3982 = vmatprep.mubr.msk.f32.mxu1 %vm302_vm5, %v3349_v19 }
0x39c8   :  { %v3309_v63 = vpop.f32.mrb[52].mxu1 }
0x39c9   :  { %v3313_v8 = vadd.f32 %v3309_v63, %v2500_v62  ;;  %v3964_v1 = vpop.f32.mrb[53].mxu1 }
0x39cb   :  { %4538 = vtanh.f32 %v3313_v8  ;;  %v3617_v20 = vmul.f32 -1.442695, %v3313_v8 }
0x39cd   :  { %4540 = vpow2.f32 %v3617_v20 }
0x39d0   :  { %v3975_v48 = vpop.f32.mrb[54].mxu1 }
0x39d1   :  { %v3458_v10 = vadd.f32 %v3975_v48, %v3618_v52  ;;  %v3452_v54 = vpop.f32.mrb[55].mxu1 }
0x39d2   :  { %v3453_v39 = vadd.f32 %v3618_v52, %v3452_v54 }
0x39d3   :  { %3492 = vst [vmem:[#allocation18 + $0x8] sm:$0xff] %v3458_v10 }
0x39d4   :  { %3491 = vst [vmem:[#allocation18] sm:$0xff] %v3453_v39  ;;  %v3978_v12 = vpop.f32.mrb[56].mxu1 }
0x39d5   :  { %v4539_v18 = vpop.eup %4538  ;;  %v3468_v15 = vadd.f32 %v3978_v12, %v3618_v52  ;;  %v3462_v57 = vpop.f32.mrb[57].mxu1 }
0x39d6   :  { %v3463_v58 = vadd.f32 %v3618_v52, %v3462_v57  ;;  %3323 = vrot.lane.b32.xlu1 %v4539_v18, %s4747_s26 }
0x39d7   :  { %3494 = vst [vmem:[#allocation18 + $0x18] sm:$0xff] %v3468_v15  ;;  %v4541_v6 = vpop.eup %4540 }
0x39d8   :  { %3493 = vst [vmem:[#allocation18 + $0x10] sm:$0xff] %v3463_v58  ;;  %v3981_v37 = vpop.f32.mrb[58].mxu1  ;;  %v3317_v3 = vadd.f32 1.0, %v4541_v6 }
0x39d9   :  { %v3478_v29 = vadd.f32 %v3981_v37, %v3618_v52  ;;  %v3472_v4 = vpop.f32.mrb[59].mxu1 }
0x39da   :  { %v3473_v5 = vadd.f32 %v3618_v52, %v3472_v4  ;;  %4542 = vrcp.f32 %v3317_v3 }
0x39db   :  { %3496 = vst [vmem:[#allocation18 + $0x28] sm:$0xff] %v3478_v29 }
0x39dc   :  { %3495 = vst [vmem:[#allocation18 + $0x20] sm:$0xff] %v3473_v5 }
0x39e4   :  { %v4543_v13 = vpop.eup %4542 }
0x39e5   :  { %v3321_v41 = vmul.f32 %v4543_v13, %v5552_v40 }
0x3a48   :  { %v3324_v14 = vpop.permute.xlu1 %3323 }
0x3a49   :  { %v3326_v21 = vmul.f32 %v4543_v13, %v3324_v14 }
0x3a4b   :  { %3328 = vrot.lane.b32.xlu0 %v3326_v21, %s4748_s16 }
0x3abd   :  { %v3329_v25 = vpop.permute.xlu0 %3328 }
0x3abe   :  { %v3331_v26 = vadd.f32 %v3329_v25, %v3321_v41 }
0x3ac0   :  { %4544 = vtanh.f32 %v3331_v26 }
0x3aca   :  { %v4545_v22 = vpop.eup %4544 }
0x3acb   :  { %3334 = vrot.lane.b32.xlu1 %v4545_v22, %s4747_s26  ;;  %s4700_s26 = scalar_lea.vmem %s3505_s24, 1024 }
0x3acc   :  { %p4701_p0 = scmp.ne.s32.totalorder %s3505_s24, %s4700_s26  ;;  %p4706_p2 = scmp.lt.s32.totalorder %s4700_s26, %s4700_s26 }
0x3ace   :  { %p4707_p3 = por %p4706_p2, %p4705_p1 }
0x3ad0   :  { %p4708_p4 = pnand %p4707_p3, %p4701_p0 }
0x3b3d   :  { %v3335_v38 = vpop.permute.xlu1 %3334 }
0x3b3e   :  { %v3337_v27 = vmul.f32 %v4543_v13, %v3335_v38 }
0x3b40   :  { %3339 = vrot.lane.b32.xlu0 %v3337_v27, %s4748_s16 }
0x3bb2   :  { %v3340_v28 = vpop.permute.xlu0 %3339 }
0x3bb3   :  { %3342 = vst.msk [vmem:[#allocation3 + $0x38] sm:$0xff] %vm302_vm5, %v3340_v28 }
0x3bba   :  { %v3350_v36 = vld [vmem:[#allocation3 + $0x38] sm:$0xff] }
0x3bbb   :  { %3983 = vmatmul.mubr.msk.f32.gmra.mrb[60].mxu1 %vm302_vm5, %v3350_v36 }
0x3c8e   :  { %v3984_v31 = vpop.f32.mrb[60].mxu1 }
0x3c8f   :  { %v3488_v32 = vadd.f32 %v3984_v31, %v3618_v52  ;;  %v3482_v35 = vpop.f32.mrb[61].mxu1 }
0x3c90   :  { %v3483_v9 = vadd.f32 %v3618_v52, %v3482_v35 }
0x3c91   :  { %3498 = vst [vmem:[#allocation18 + $0x38] sm:$0xff] %v3488_v32 }
0x3c92   :  { %3497 = vst [vmem:[#allocation18 + $0x30] sm:$0xff] %v3483_v9 }
0x3c93   :  { %4711 = shalt.err (!%p4708_p4)
}
0x3c94   :  { %s4712_s10 = scalar_lea.hbm %s5606_s13, 1024 }
0x3c95   :  { %p4713_p5 = scmp.ne.s32.totalorder %s5606_s13, %s4712_s10  ;;  %p4716_p6 = scmp.lt.u32.totalorder %s4712_s10, %s5606_s13 }
0x3c97   :  { %p4718_p7 = pnand %p4716_p6, %p4713_p5 }
0x3c99   :  { %4721 = shalt.err (!%p4718_p7)
}
0x3c9a   :  { %3510 = dma.vmem_to_hbm [thread:$0]  %s3505_s24, 1024, %s5606_s13, [#allocation8], %s4738_s28, %s4738_s28, %s4739_s14  }
0x3c9b   :  { %4730 = dma.done.wait [#allocation8], 1024  }
0x3c9c   :  { %4731 = vsyncadd [#allocation8], 4294966272 }
0x3c9d   :  { %3514 = vsyncpa [#allocation7], 1 }
0x3c9e   :  { %3515 = vsyncpa [#allocation10], 1 }
0x3c9f   :  { %3516 = vsyncpa [#allocation13], 1 }
0x3ca0   :  { %3517 = vsyncpa [#allocation16], 1 }
0x3ca1   :  { %3518 = vsyncpa [#allocation8], 1 }

</bundles_post_ra>
